<compile_context>
chip_gen: v5e
topology: v5e:2x2
jax: 0.10.0
libtpu: 0.0.40
codegen_flags: <defaults>
</compile_context>

<pallas_src>
import jax
import jax.numpy as jnp
from jax import lax
from jax.experimental import pallas as pl
from jax.experimental.pallas import tpu as pltpu

_EPS = 1e-12                          # torch.nn.functional.normalize eps
_LANE = 128
_VMEM_LIMIT = 32 * 1024 * 1024        # scoped-VMEM cap, safe on v5e/v6e/v7x
_VMEM_BUDGET = 24 * 1024 * 1024       # sizing budget (headroom under the cap)
_FUSED_MAX_ROWS = 1024                # single-block fused path up to this many rows


def _round_up(x, m):
    return ((x + m - 1) // m) * m


def _l2_normalize_rows(v):
    """v / max(||v||, eps) using rsqrt (EUP) + multiply instead of sqrt + divide."""
    sumsq = jnp.sum(v * v, axis=-1, keepdims=True)
    return v * lax.rsqrt(jnp.maximum(sumsq, _EPS * _EPS))


# ----------------------------------------------------------------------------
# Kernels
# ----------------------------------------------------------------------------
def _proto_kernel(scale_ref, att_ref, w1_ref, b1_ref, w2_ref, b2_ref, o_ref):
    """Class prototypes: relu(relu(att @ w1.T + b1) @ w2.T + b2), row-L2-normalize,
    and fold in scale_cls.  Runs once as a single VMEM block."""
    att = att_ref[...]                                            # [Cp, A]
    h = lax.dot_general(att, w1_ref[...],                         # w1: [Hp, A]
                        dimension_numbers=(((1,), (1,)), ((), ())),
                        preferred_element_type=jnp.float32) + b1_ref[...]
    h = jnp.maximum(h, 0.0)                                       # [Cp, Hp]
    p = lax.dot_general(h, w2_ref[...],                           # w2: [V, Hp]
                        dimension_numbers=(((1,), (1,)), ((), ())),
                        preferred_element_type=jnp.float32) + b2_ref[...]
    p = jnp.maximum(p, 0.0)                                       # [Cp, V]
    o_ref[...] = scale_ref[0] * _l2_normalize_rows(p)


def _scores_kernel(x_ref, proto_ref, o_ref):
    """Per-batch-tile: L2-normalize feature rows twice (as in the module) and
    matmul against the (pre-scaled, pre-normalized) prototypes on the MXU.
    Output tile is lane-dense (Cp is a multiple of 128)."""
    x = _l2_normalize_rows(_l2_normalize_rows(x_ref[...]))
    o_ref[...] = lax.dot_general(
        x, proto_ref[...],
        dimension_numbers=(((1,), (1,)), ((), ())),               # contract on V
        preferred_element_type=jnp.float32)


def _fused_kernel(scale_ref, x_ref, att_ref, w1_ref, b1_ref, w2_ref, b2_ref, o_ref):
    """Small-batch path: prototype MLP + normalization + scores in one launch."""
    att = att_ref[...]
    h = lax.dot_general(att, w1_ref[...],
                        dimension_numbers=(((1,), (1,)), ((), ())),
                        preferred_element_type=jnp.float32) + b1_ref[...]
    h = jnp.maximum(h, 0.0)
    p = lax.dot_general(h, w2_ref[...],
                        dimension_numbers=(((1,), (1,)), ((), ())),
                        preferred_element_type=jnp.float32) + b2_ref[...]
    p = jnp.maximum(p, 0.0)
    p = scale_ref[0] * _l2_normalize_rows(p)                      # [Cp, V]
    x = _l2_normalize_rows(_l2_normalize_rows(x_ref[...]))        # [Bp, V]
    o_ref[...] = lax.dot_general(
        x, p,
        dimension_numbers=(((1,), (1,)), ((), ())),
        preferred_element_type=jnp.float32)


# ----------------------------------------------------------------------------
# Host-side sizing helpers
# ----------------------------------------------------------------------------
def _fused_vmem_bytes(b_pad, c_pad, A, h_pad, V):
    elems = (b_pad * V                       # x tile
             + c_pad * A + h_pad * A + h_pad  # att, w1, b1
             + V * h_pad + V                  # w2, b2
             + b_pad * c_pad                  # output
             + c_pad * h_pad + c_pad * V      # h / p intermediates
             + b_pad * V)                     # normalized-x temp
    return 4 * elems


def _choose_tile_b(B, V, c_pad):
    """Largest batch tile (multiple of 8, <=1024) that fits the VMEM budget with
    double-buffered x/out tiles plus the resident prototype block, kept small
    enough that the parallel grid has >=2 steps (v7x dual-TC)."""
    b8 = _round_up(B, 8)
    fixed = 2 * c_pad * V * 4                 # resident prototypes (2 buffers)
    per_row = 2 * (V + c_pad) * 4             # double-buffered x + out rows
    t = (_VMEM_BUDGET - fixed) // per_row
    t = min(t, 1024, b8)
    t = min(t, _round_up(pl.cdiv(b8, 2), 8))  # >=2 grid steps
    t = max(8, (t // 8) * 8)
    return int(t)


# ----------------------------------------------------------------------------
# Parameter prep (hoisted out of the forward path — run once per model)
# ----------------------------------------------------------------------------
def prepare_fine_align_params(all_att, w1, b1, w2, b2, scale_cls):
    """Cast to f32, zero-pad the class dim to a multiple of 128 (lane-dense
    output stores) and the hidden dim 1600 -> 1664 (exact: relu(0)+0 contributes
    nothing), reshape biases to 2-D, and pack scale_cls as a (1,) SMEM scalar."""
    all_att = jnp.asarray(all_att, jnp.float32)           # [C, A]
    w1 = jnp.asarray(w1, jnp.float32)                     # [H, A]
    b1 = jnp.asarray(b1, jnp.float32)                     # [H]
    w2 = jnp.asarray(w2, jnp.float32)                     # [V, H]
    b2 = jnp.asarray(b2, jnp.float32)                     # [V]
    C, A = all_att.shape
    H = w1.shape[0]
    V = w2.shape[0]
    c_pad = _round_up(C, _LANE)
    h_pad = _round_up(H, _LANE)

    att_p = jnp.pad(all_att, ((0, c_pad - C), (0, 0)))
    w1_p = jnp.pad(w1, ((0, h_pad - H), (0, 0)))          # [Hp, A]
    b1_p = jnp.pad(b1, (0, h_pad - H)).reshape(1, h_pad)  # [1, Hp]
    w2_p = jnp.pad(w2, ((0, 0), (0, h_pad - H)))          # [V, Hp]
    b2_r = b2.reshape(1, V)                               # [1, V]
    scale = jnp.asarray(scale_cls, jnp.float32).reshape(1)

    return dict(att=att_p, w1=w1_p, b1=b1_p, w2=w2_p, b2=b2_r, scale=scale,
                num_classes=C, attr_dim=A, vision_dim=V,
                c_pad=c_pad, h_pad=h_pad)


# ----------------------------------------------------------------------------
# Eval forward
# ----------------------------------------------------------------------------
def fine_align_eval(x_fea, params):
    """Fine_Align eval forward.  x_fea: [B, vision_dim] -> scores [B, C]."""
    x_fea = jnp.asarray(x_fea, jnp.float32)
    B, V = x_fea.shape
    assert V == params["vision_dim"]
    C = params["num_classes"]
    A = params["attr_dim"]
    c_pad = params["c_pad"]
    h_pad = params["h_pad"]
    att, w1, b1, w2, b2, scale = (params["att"], params["w1"], params["b1"],
                                  params["w2"], params["b2"], params["scale"])

    b8 = _round_up(B, 8)

    # ---- Small batch: single fused launch (no intermediate HBM traffic). ----
    if b8 <= _FUSED_MAX_ROWS and _fused_vmem_bytes(b8, c_pad, A, h_pad, V) <= _VMEM_BUDGET:
        x_p = jnp.pad(x_fea, ((0, b8 - B), (0, 0))) if b8 != B else x_fea
        scores = pl.pallas_call(
            _fused_kernel,
            out_shape=jax.ShapeDtypeStruct((b8, c_pad), jnp.float32),
            in_specs=[
                pl.BlockSpec(memory_space=pltpu.MemorySpace.SMEM),   # scale_cls
                pl.BlockSpec((b8, V), lambda: (0, 0)),               # x
                pl.BlockSpec((c_pad, A), lambda: (0, 0)),            # attributes
                pl.BlockSpec((h_pad, A), lambda: (0, 0)),            # fc_s_1 weight
                pl.BlockSpec((1, h_pad), lambda: (0, 0)),            # fc_s_1 bias
                pl.BlockSpec((V, h_pad), lambda: (0, 0)),            # fc_s_2 weight
                pl.BlockSpec((1, V), lambda: (0, 0)),                # fc_s_2 bias
            ],
            out_specs=pl.BlockSpec((b8, c_pad), lambda: (0, 0)),
            compiler_params=pltpu.CompilerParams(vmem_limit_bytes=_VMEM_LIMIT),
        )(scale, x_p, att, w1, b1, w2, b2)
        return scores[:B, :C]

    # ---- Large batch: prototype kernel once, then batch-tiled scores. ----
    proto = pl.pallas_call(
        _proto_kernel,
        out_shape=jax.ShapeDtypeStruct((c_pad, V), jnp.float32),
        in_specs=[
            pl.BlockSpec(memory_space=pltpu.MemorySpace.SMEM),       # scale_cls
            pl.BlockSpec((c_pad, A), lambda: (0, 0)),
            pl.BlockSpec((h_pad, A), lambda: (0, 0)),
            pl.BlockSpec((1, h_pad), lambda: (0, 0)),
            pl.BlockSpec((V, h_pad), lambda: (0, 0)),
            pl.BlockSpec((1, V), lambda: (0, 0)),
        ],
        out_specs=pl.BlockSpec((c_pad, V), lambda: (0, 0)),
        compiler_params=pltpu.CompilerParams(vmem_limit_bytes=_VMEM_LIMIT),
    )(scale, att, w1, b1, w2, b2)

    tile_b = _choose_tile_b(B, V, c_pad)
    b_pad = _round_up(B, tile_b)
    x_p = jnp.pad(x_fea, ((0, b_pad - B), (0, 0))) if b_pad != B else x_fea

    scores = pl.pallas_call(
        _scores_kernel,
        out_shape=jax.ShapeDtypeStruct((b_pad, c_pad), jnp.float32),
        grid=(b_pad // tile_b,),
        in_specs=[
            pl.BlockSpec((tile_b, V), lambda i: (i, 0)),             # streamed x tiles
            # Constant index_map: the resident prototype block is fetched once
            # and not re-DMA'd across grid steps.
            pl.BlockSpec((c_pad, V), lambda i: (0, 0)),
        ],
        out_specs=pl.BlockSpec((tile_b, c_pad), lambda i: (i, 0)),
        compiler_params=pltpu.CompilerParams(
            dimension_semantics=("parallel",),
            vmem_limit_bytes=_VMEM_LIMIT),
    )(x_p, proto)
    return scores[:B, :C]


# ----------------------------------------------------------------------------
# Demo / self-test
# ----------------------------------------------------------------------------
def _reference(x_fea, all_att, w1, b1, w2, b2, scale):
    def l2n(v, axis=-1):
        return v / jnp.maximum(jnp.linalg.norm(v, axis=axis, keepdims=True), _EPS)
    proto = jax.nn.relu(jax.nn.relu(all_att @ w1.T + b1) @ w2.T + b2)
    return scale * (l2n(l2n(x_fea)) @ l2n(proto, 1).T)


if __name__ == "__main__":
    # Shapes consistent with the module's eval forward:
    #   vision_dim=64, attr_dim=32, hidden=1600 (hard-coded in fc_s_1),
    #   10 seen + 5 unseen classes.
    V, A, H = 64, 32, 1600
    N_SEEN, N_UNSEEN = 10, 5
    C = N_SEEN + N_UNSEEN
    SCALE = 20.0                        # args.scale_factor

    key = jax.random.PRNGKey(0)
    k = jax.random.split(key, 6)
    seen_att = jax.random.normal(k[0], (N_SEEN, A), dtype=jnp.float32)
    unseen_att = jax.random.normal(k[1], (N_UNSEEN, A), dtype=jnp.float32)
    all_att = jnp.concatenate([seen_att, unseen_att], axis=0)
    # fc_s_1 / fc_s_2, "normal(0, 0.02), bias=0" init (args.init_s2v == 1)
    w1 = 0.02 * jax.random.normal(k[2], (H, A), dtype=jnp.float32)
    b1 = jnp.zeros((H,), jnp.float32)
    w2 = 0.02 * jax.random.normal(k[3], (V, H), dtype=jnp.float32)
    b2 = jnp.zeros((V,), jnp.float32)

    params = prepare_fine_align_params(all_att, w1, b1, w2, b2, SCALE)

    # --- Test 1: small batch -> fused single-launch path. ---
    B_small = 8
    x_small = jax.random.normal(k[4], (B_small, V), dtype=jnp.float32)
    out_small = jax.block_until_ready(fine_align_eval(x_small, params))
    ref_small = _reference(x_small, all_att, w1, b1, w2, b2, SCALE)
    assert out_small.shape == (B_small, C) and out_small.dtype == jnp.float32
    assert jnp.allclose(out_small, ref_small, atol=1e-4, rtol=1e-4), float(
        jnp.max(jnp.abs(out_small - ref_small)))

    # --- Test 2: larger batch -> two-kernel, batch-tiled path (grid >= 2). ---
    B_big = 1040
    x_big = jax.random.normal(k[5], (B_big, V), dtype=jnp.float32)
    out_big = jax.block_until_ready(fine_align_eval(x_big, params))
    ref_big = _reference(x_big, all_att, w1, b1, w2, b2, SCALE)
    assert out_big.shape == (B_big, C) and out_big.dtype == jnp.float32
    assert jnp.allclose(out_big, ref_big, atol=1e-4, rtol=1e-4), float(
        jnp.max(jnp.abs(out_big - ref_big)))

    print("KERNEL_OK")
</pallas_src>

<mosaic_0001>
module attributes {stable_mosaic.version = 11 : i64} {
  func.func @_fused_kernel(%arg0: memref<1xf32, #tpu.memory_space<smem>>, %arg1: memref<8x64xf32, #tpu.memory_space<vmem>>, %arg2: memref<128x32xf32, #tpu.memory_space<vmem>>, %arg3: memref<1664x32xf32, #tpu.memory_space<vmem>>, %arg4: memref<1x1664xf32, #tpu.memory_space<vmem>>, %arg5: memref<64x1664xf32, #tpu.memory_space<vmem>>, %arg6: memref<1x64xf32, #tpu.memory_space<vmem>>, %arg7: memref<8x128xf32, #tpu.memory_space<vmem>>) attributes {dimension_semantics = [], scalar_prefetch = 0 : i64, scratch_operands = 0 : i64, tpu.core_type = #tpu.core_type<tc>} {
    %c0 = arith.constant 0 : index
    %c0_0 = arith.constant 0 : index
    %0 = vector.load %arg2[%c0, %c0_0] : memref<128x32xf32, #tpu.memory_space<vmem>>, vector<128x32xf32>
    %c0_1 = arith.constant 0 : index
    %c0_2 = arith.constant 0 : index
    %1 = vector.load %arg3[%c0_1, %c0_2] : memref<1664x32xf32, #tpu.memory_space<vmem>>, vector<1664x32xf32>
    %cst = arith.constant dense<0.000000e+00> : vector<128x1664xf32>
    %2 = tpu.matmul %0, %1, %cst {dimension_numbers = #tpu.dot_dimension_numbers<[1], [1], [0], [0], [0, 0, 1, 0], [], []>} : vector<128x32xf32>, vector<1664x32xf32>, vector<128x1664xf32> -> vector<128x1664xf32>
    %c0_3 = arith.constant 0 : index
    %c0_4 = arith.constant 0 : index
    %3 = vector.load %arg4[%c0_3, %c0_4] : memref<1x1664xf32, #tpu.memory_space<vmem>>, vector<1x1664xf32>
    %4 = vector.broadcast %3 : vector<1x1664xf32> to vector<128x1664xf32>
    %5 = arith.addf %2, %4 : vector<128x1664xf32>
    %cst_5 = arith.constant 0.000000e+00 : f32
    %6 = vector.broadcast %cst_5 : f32 to vector<128x1664xf32>
    %7 = arith.maximumf %5, %6 : vector<128x1664xf32>
    %c0_6 = arith.constant 0 : index
    %c0_7 = arith.constant 0 : index
    %8 = vector.load %arg5[%c0_6, %c0_7] : memref<64x1664xf32, #tpu.memory_space<vmem>>, vector<64x1664xf32>
    %cst_8 = arith.constant dense<0.000000e+00> : vector<128x64xf32>
    %9 = tpu.matmul %7, %8, %cst_8 {dimension_numbers = #tpu.dot_dimension_numbers<[1], [1], [0], [0], [0, 0, 1, 0], [], []>} : vector<128x1664xf32>, vector<64x1664xf32>, vector<128x64xf32> -> vector<128x64xf32>
    %c0_9 = arith.constant 0 : index
    %c0_10 = arith.constant 0 : index
    %10 = vector.load %arg6[%c0_9, %c0_10] : memref<1x64xf32, #tpu.memory_space<vmem>>, vector<1x64xf32>
    %11 = vector.broadcast %10 : vector<1x64xf32> to vector<128x64xf32>
    %12 = arith.addf %9, %11 : vector<128x64xf32>
    %cst_11 = arith.constant 0.000000e+00 : f32
    %13 = vector.broadcast %cst_11 : f32 to vector<128x64xf32>
    %14 = arith.maximumf %12, %13 : vector<128x64xf32>
    %c0_12 = arith.constant 0 : index
    %15 = memref.load %arg0[%c0_12] : memref<1xf32, #tpu.memory_space<smem>>
    %16 = arith.mulf %14, %14 : vector<128x64xf32>
    %cst_13 = arith.constant dense<0.000000e+00> : vector<128xf32>
    %17 = vector.multi_reduction <add>, %16, %cst_13 [1] : vector<128x64xf32> to vector<128xf32>
    %18 = vector.shape_cast %17 : vector<128xf32> to vector<128x1xf32>
    %cst_14 = arith.constant 1.000000e-24 : f32
    %19 = vector.broadcast %cst_14 : f32 to vector<128x1xf32>
    %20 = arith.maximumf %18, %19 : vector<128x1xf32>
    %21 = math.rsqrt %20 : vector<128x1xf32>
    %22 = vector.broadcast %21 : vector<128x1xf32> to vector<128x64xf32>
    %23 = arith.mulf %14, %22 : vector<128x64xf32>
    %24 = vector.broadcast %15 : f32 to vector<128x64xf32>
    %25 = arith.mulf %24, %23 : vector<128x64xf32>
    %c0_15 = arith.constant 0 : index
    %c0_16 = arith.constant 0 : index
    %26 = vector.load %arg1[%c0_15, %c0_16] : memref<8x64xf32, #tpu.memory_space<vmem>>, vector<8x64xf32>
    %27 = arith.mulf %26, %26 : vector<8x64xf32>
    %cst_17 = arith.constant dense<0.000000e+00> : vector<8xf32>
    %28 = vector.multi_reduction <add>, %27, %cst_17 [1] : vector<8x64xf32> to vector<8xf32>
    %29 = vector.shape_cast %28 : vector<8xf32> to vector<8x1xf32>
    %cst_18 = arith.constant 1.000000e-24 : f32
    %30 = vector.broadcast %cst_18 : f32 to vector<8x1xf32>
    %31 = arith.maximumf %29, %30 : vector<8x1xf32>
    %32 = math.rsqrt %31 : vector<8x1xf32>
    %33 = vector.broadcast %32 : vector<8x1xf32> to vector<8x64xf32>
    %34 = arith.mulf %26, %33 : vector<8x64xf32>
    %35 = arith.mulf %34, %34 : vector<8x64xf32>
    %cst_19 = arith.constant dense<0.000000e+00> : vector<8xf32>
    %36 = vector.multi_reduction <add>, %35, %cst_19 [1] : vector<8x64xf32> to vector<8xf32>
    %37 = vector.shape_cast %36 : vector<8xf32> to vector<8x1xf32>
    %cst_20 = arith.constant 1.000000e-24 : f32
    %38 = vector.broadcast %cst_20 : f32 to vector<8x1xf32>
    %39 = arith.maximumf %37, %38 : vector<8x1xf32>
    %40 = math.rsqrt %39 : vector<8x1xf32>
    %41 = vector.broadcast %40 : vector<8x1xf32> to vector<8x64xf32>
    %42 = arith.mulf %34, %41 : vector<8x64xf32>
    %cst_21 = arith.constant dense<0.000000e+00> : vector<8x128xf32>
    %43 = tpu.matmul %42, %25, %cst_21 {dimension_numbers = #tpu.dot_dimension_numbers<[1], [1], [0], [0], [0, 0, 1, 0], [], []>} : vector<8x64xf32>, vector<128x64xf32>, vector<8x128xf32> -> vector<8x128xf32>
    %c0_22 = arith.constant 0 : index
    %c0_23 = arith.constant 0 : index
    %44 = vector.load %arg7[%c0_22, %c0_23] : memref<8x128xf32, #tpu.memory_space<vmem>>, vector<8x128xf32>
    tpu.vector_store %arg7[%c0_22, %c0_23], %43 {strides = array<i32>} : memref<8x128xf32, #tpu.memory_space<vmem>>, vector<8x128xf32>,
    return
  }
}

</mosaic_0001>

<bundles_post_ra>
// kernel: tpu_custom_call.1
= control target key start
LH: loop header
LB: loop body
LE: loop exit
PB: predicated region body
PF: predicated region fallthrough
CT: control target
= control target key end

     0   :  { %vm282_vm0 = vcmask 261120   ;;  %s7144_s0 = inlined_call_operand.<no memory space> [shape: f32[1], index: 0, kind: input, shape index: {}]   ;;  %s7145_s1 = inlined_call_operand.vmem [shape: f32[8,64], index: 1, kind: input, shape index: {}]   ;;  %s7146_s2 = inlined_call_operand.vmem [shape: f32[128,32], index: 2, kind: input, shape index: {}]   ;;  %s7147_s3 = inlined_call_operand.vmem [shape: f32[1664,32], index: 3, kind: input, shape index: {}]   ;;  %s7148_s4 = inlined_call_operand.vmem [shape: f32[1,1664], index: 4, kind: input, shape index: {}]   ;;  %s7149_s5 = inlined_call_operand.vmem [shape: f32[64,1664], index: 5, kind: input, shape index: {}]   ;;  %s7150_s6 = inlined_call_operand.vmem [shape: f32[1,64], index: 6, kind: input, shape index: {}]   ;;  %s7151_s7 = inlined_call_operand.hbm [shape: f32[8,128], index: 7, kind: output, shape index: {}]  }
   0x1   :  { %v59_v0 = vld [vmem:[%s7147_s3 + $0x78] sm:$0xff]  ;;  %v58_v2 = vld [vmem:[%s7147_s3 + $0x70] sm:$0xff]  ;;  %v57_v4 = vld [vmem:[%s7147_s3 + $0x68] sm:$0xff] }
   0x2   :  { %v75_v1 = vld [vmem:[%s7147_s3 + $0xf8] sm:$0xff]  ;;  %3373 = vmatpush.xpose.msk.msra.mxu0 %vm282_vm0, %v59_v0  ;;  %3806 = vmatpush.xpose.msk.msra.mxu3 %vm282_vm0, %v59_v0  ;;  %v74_v3 = vld [vmem:[%s7147_s3 + $0xf0] sm:$0xff]  ;;  %v73_v5 = vld [vmem:[%s7147_s3 + $0xe8] sm:$0xff] }
   0x3   :  { %3405 = vmatpush.xpose.msk.msra.mxu1 %vm282_vm0, %v75_v1  ;;  %3822 = vmatpush.xpose.msk.msra.mxu2 %vm282_vm0, %v75_v1 }
   0x6   :  { %3374 = vmatpush.xpose.msk.msra.mxu0 %vm282_vm0, %v58_v2  ;;  %3807 = vmatpush.xpose.msk.msra.mxu3 %vm282_vm0, %v58_v2 }
   0x7   :  { %3406 = vmatpush.xpose.msk.msra.mxu1 %vm282_vm0, %v74_v3  ;;  %3823 = vmatpush.xpose.msk.msra.mxu2 %vm282_vm0, %v74_v3 }
   0x8   :  { %13 = vsyncpa [#allocation4], 0  ;;  %v56_v6 = vld [vmem:[%s7147_s3 + $0x60] sm:$0xff]  ;;  %v55_v8 = vld [vmem:[%s7147_s3 + $0x58] sm:$0xff]  ;;  %vm2994_vm1 = vcmask 523264   ;;  %s3364_s14 = sshll.u32 %s7151_s7, 4  ;;  %s3365_s14 = int_to_ptr.hbm [resolvable:$true] %s3364_s14 }
   0x9   :  { %v72_v7 = vld [vmem:[%s7147_s3 + $0xe0] sm:$0xff]  ;;  %v71_v9 = vld [vmem:[%s7147_s3 + $0xd8] sm:$0xff]  ;;  %v54_v10 = vld [vmem:[%s7147_s3 + $0x50] sm:$0xff] }
   0xa   :  { %3375 = vmatpush.xpose.msk.msra.mxu0 %vm282_vm0, %v57_v4  ;;  %3808 = vmatpush.xpose.msk.msra.mxu3 %vm282_vm0, %v57_v4  ;;  %v70_v11 = vld [vmem:[%s7147_s3 + $0xd0] sm:$0xff]  ;;  %v53_v12 = vld [vmem:[%s7147_s3 + $0x48] sm:$0xff]  ;;  %v52_v14 = vld [vmem:[%s7147_s3 + $0x40] sm:$0xff] }
   0xb   :  { %3407 = vmatpush.xpose.msk.msra.mxu1 %vm282_vm0, %v73_v5  ;;  %3824 = vmatpush.xpose.msk.msra.mxu2 %vm282_vm0, %v73_v5  ;;  %v69_v13 = vld [vmem:[%s7147_s3 + $0xc8] sm:$0xff]  ;;  %v68_v15 = vld [vmem:[%s7147_s3 + $0xc0] sm:$0xff]  ;;  %v51_v16 = vld [vmem:[%s7147_s3 + $0x38] sm:$0xff] }
   0xc   :  { %v67_v17 = vld [vmem:[%s7147_s3 + $0xb8] sm:$0xff]  ;;  %v50_v18 = vld [vmem:[%s7147_s3 + $0x30] sm:$0xff]  ;;  %v49_v20 = vld [vmem:[%s7147_s3 + $0x28] sm:$0xff] }
   0xd   :  { %v66_v19 = vld [vmem:[%s7147_s3 + $0xb0] sm:$0xff]  ;;  %v65_v21 = vld [vmem:[%s7147_s3 + $0xa8] sm:$0xff]  ;;  %v48_v22 = vld [vmem:[%s7147_s3 + $0x20] sm:$0xff] }
   0xe   :  { %3376 = vmatpush.xpose.msk.msra.mxu0 %vm282_vm0, %v56_v6  ;;  %3809 = vmatpush.xpose.msk.msra.mxu3 %vm282_vm0, %v56_v6  ;;  %v64_v23 = vld [vmem:[%s7147_s3 + $0xa0] sm:$0xff]  ;;  %v47_v24 = vld [vmem:[%s7147_s3 + $0x18] sm:$0xff]  ;;  %v46_v26 = vld [vmem:[%s7147_s3 + $0x10] sm:$0xff] }
   0xf   :  { %3408 = vmatpush.xpose.msk.msra.mxu1 %vm282_vm0, %v72_v7  ;;  %3825 = vmatpush.xpose.msk.msra.mxu2 %vm282_vm0, %v72_v7  ;;  %v63_v25 = vld [vmem:[%s7147_s3 + $0x98] sm:$0xff]  ;;  %v62_v27 = vld [vmem:[%s7147_s3 + $0x90] sm:$0xff]  ;;  %v45_v28 = vld [vmem:[%s7147_s3 + $0x8] sm:$0xff] }
  0x10   :  { %v61_v29 = vld [vmem:[%s7147_s3 + $0x88] sm:$0xff]  ;;  %v44_v30 = vld [vmem:[%s7147_s3] sm:$0xff]  ;;  %v91_v32 = vld [vmem:[%s7147_s3 + $0x178] sm:$0xff] }
  0x11   :  { %v60_v31 = vld [vmem:[%s7147_s3 + $0x80] sm:$0xff]  ;;  %v107_v33 = vld [vmem:[%s7147_s3 + $0x1f8] sm:$0xff]  ;;  %v90_v38 = vld [vmem:[%s7147_s3 + $0x170] sm:$0xff] }
  0x12   :  { %3377 = vmatpush.xpose.msk.msra.mxu0 %vm282_vm0, %v55_v8  ;;  %3810 = vmatpush.xpose.msk.msra.mxu3 %vm282_vm0, %v55_v8  ;;  %v4127_v34 = vld [vmem:[%s7146_s2] sm:$0xff]  ;;  %v123_v36 = vld [vmem:[%s7147_s3 + $0x278] sm:$0xff]  ;;  %v106_v39 = vld [vmem:[%s7147_s3 + $0x1f0] sm:$0xff] }
  0x13   :  { %3409 = vmatpush.xpose.msk.msra.mxu1 %vm282_vm0, %v71_v9  ;;  %3826 = vmatpush.xpose.msk.msra.mxu2 %vm282_vm0, %v71_v9  ;;  %v4132_v35 = vld [vmem:[%s7146_s2 + $0x40] sm:$0xff]  ;;  %v139_v37 = vld [vmem:[%s7147_s3 + $0x2f8] sm:$0xff]  ;;  %v122_v40 = vld [vmem:[%s7147_s3 + $0x270] sm:$0xff] }
  0x14   :  { %v138_v41 = vld [vmem:[%s7147_s3 + $0x2f0] sm:$0xff]  ;;  %v89_v42 = vld [vmem:[%s7147_s3 + $0x168] sm:$0xff]  ;;  %v88_v48 = vld [vmem:[%s7147_s3 + $0x160] sm:$0xff] }
  0x15   :  { %v105_v43 = vld [vmem:[%s7147_s3 + $0x1e8] sm:$0xff]  ;;  %v104_v49 = vld [vmem:[%s7147_s3 + $0x1e0] sm:$0xff]  ;;  %v87_v52 = vld [vmem:[%s7147_s3 + $0x158] sm:$0xff] }
  0x16   :  { %3378 = vmatpush.xpose.msk.msra.mxu0 %vm282_vm0, %v54_v10  ;;  %3811 = vmatpush.xpose.msk.msra.mxu3 %vm282_vm0, %v54_v10  ;;  %v4177_v44 = vld [vmem:[%s7146_s2 + $0x8] sm:$0xff]  ;;  %v120_v50 = vld [vmem:[%s7147_s3 + $0x260] sm:$0xff]  ;;  %v103_v53 = vld [vmem:[%s7147_s3 + $0x1d8] sm:$0xff] }
  0x17   :  { %3410 = vmatpush.xpose.msk.msra.mxu1 %vm282_vm0, %v70_v11  ;;  %3827 = vmatpush.xpose.msk.msra.mxu2 %vm282_vm0, %v70_v11  ;;  %v4182_v45 = vld [vmem:[%s7146_s2 + $0x48] sm:$0xff]  ;;  %v136_v51 = vld [vmem:[%s7147_s3 + $0x2e0] sm:$0xff]  ;;  %v4227_v54 = vld [vmem:[%s7146_s2 + $0x10] sm:$0xff] }
  0x18   :  { %v121_v46 = vld [vmem:[%s7147_s3 + $0x268] sm:$0xff]  ;;  %v4232_v55 = vld [vmem:[%s7146_s2 + $0x50] sm:$0xff]  ;;  %v119_v56 = vld [vmem:[%s7147_s3 + $0x258] sm:$0xff] }
  0x19   :  { %v137_v47 = vld [vmem:[%s7147_s3 + $0x2e8] sm:$0xff]  ;;  %v135_v57 = vld [vmem:[%s7147_s3 + $0x2d8] sm:$0xff]  ;;  %v86_v58 = vld [vmem:[%s7147_s3 + $0x150] sm:$0xff] }
  0x1a   :  { %3379 = vmatpush.xpose.msk.msra.mxu0 %vm282_vm0, %v53_v12  ;;  %3812 = vmatpush.xpose.msk.msra.mxu3 %vm282_vm0, %v53_v12  ;;  %v102_v59 = vld [vmem:[%s7147_s3 + $0x1d0] sm:$0xff]  ;;  %v85_v62 = vld [vmem:[%s7147_s3 + $0x148] sm:$0xff]  ;;  %v4277_v0 = vld [vmem:[%s7146_s2 + $0x18] sm:$0xff] }
  0x1b   :  { %3411 = vmatpush.xpose.msk.msra.mxu1 %vm282_vm0, %v69_v13  ;;  %3828 = vmatpush.xpose.msk.msra.mxu2 %vm282_vm0, %v69_v13  ;;  %v118_v60 = vld [vmem:[%s7147_s3 + $0x250] sm:$0xff]  ;;  %v101_v63 = vld [vmem:[%s7147_s3 + $0x1c8] sm:$0xff]  ;;  %v4282_v1 = vld [vmem:[%s7146_s2 + $0x58] sm:$0xff] }
  0x1c   :  { %v134_v61 = vld [vmem:[%s7147_s3 + $0x2d0] sm:$0xff]  ;;  %v117_v2 = vld [vmem:[%s7147_s3 + $0x248] sm:$0xff]  ;;  %v84_v4 = vld [vmem:[%s7147_s3 + $0x140] sm:$0xff] }
  0x1d   :  { %v133_v3 = vld [vmem:[%s7147_s3 + $0x2c8] sm:$0xff]  ;;  %v100_v5 = vld [vmem:[%s7147_s3 + $0x1c0] sm:$0xff]  ;;  %v83_v8 = vld [vmem:[%s7147_s3 + $0x138] sm:$0xff] }
  0x1e   :  { %3380 = vmatpush.xpose.msk.msra.mxu0 %vm282_vm0, %v52_v14  ;;  %3813 = vmatpush.xpose.msk.msra.mxu3 %vm282_vm0, %v52_v14  ;;  %v116_v6 = vld [vmem:[%s7147_s3 + $0x240] sm:$0xff]  ;;  %v99_v9 = vld [vmem:[%s7147_s3 + $0x1b8] sm:$0xff]  ;;  %v82_v14 = vld [vmem:[%s7147_s3 + $0x130] sm:$0xff] }
  0x1f   :  { %3412 = vmatpush.xpose.msk.msra.mxu1 %vm282_vm0, %v68_v15  ;;  %3829 = vmatpush.xpose.msk.msra.mxu2 %vm282_vm0, %v68_v15  ;;  %v132_v7 = vld [vmem:[%s7147_s3 + $0x2c0] sm:$0xff]  ;;  %v115_v12 = vld [vmem:[%s7147_s3 + $0x238] sm:$0xff]  ;;  %v98_v15 = vld [vmem:[%s7147_s3 + $0x1b0] sm:$0xff] }
  0x20   :  { %v4327_v10 = vld [vmem:[%s7146_s2 + $0x20] sm:$0xff]  ;;  %v131_v13 = vld [vmem:[%s7147_s3 + $0x2b8] sm:$0xff] }
  0x21   :  { %v4332_v11 = vld [vmem:[%s7146_s2 + $0x60] sm:$0xff] }
  0x22   :  { %3381 = vmatpush.xpose.msk.msra.mxu0 %vm282_vm0, %v51_v16  ;;  %3814 = vmatpush.xpose.msk.msra.mxu3 %vm282_vm0, %v51_v16  ;;  %v114_v16 = vld [vmem:[%s7147_s3 + $0x230] sm:$0xff] }
  0x23   :  { %3413 = vmatpush.xpose.msk.msra.mxu1 %vm282_vm0, %v67_v17  ;;  %3830 = vmatpush.xpose.msk.msra.mxu2 %vm282_vm0, %v67_v17  ;;  %v130_v17 = vld [vmem:[%s7147_s3 + $0x2b0] sm:$0xff] }
  0x26   :  { %3382 = vmatpush.xpose.msk.msra.mxu0 %vm282_vm0, %v50_v18  ;;  %3815 = vmatpush.xpose.msk.msra.mxu3 %vm282_vm0, %v50_v18  ;;  %v81_v18 = vld [vmem:[%s7147_s3 + $0x128] sm:$0xff] }
  0x27   :  { %3414 = vmatpush.xpose.msk.msra.mxu1 %vm282_vm0, %v66_v19  ;;  %3831 = vmatpush.xpose.msk.msra.mxu2 %vm282_vm0, %v66_v19  ;;  %v97_v19 = vld [vmem:[%s7147_s3 + $0x1a8] sm:$0xff] }
  0x2a   :  { %3383 = vmatpush.xpose.msk.msra.mxu0 %vm282_vm0, %v49_v20  ;;  %3816 = vmatpush.xpose.msk.msra.mxu3 %vm282_vm0, %v49_v20  ;;  %v4377_v20 = vld [vmem:[%s7146_s2 + $0x28] sm:$0xff] }
  0x2b   :  { %3415 = vmatpush.xpose.msk.msra.mxu1 %vm282_vm0, %v65_v21  ;;  %3832 = vmatpush.xpose.msk.msra.mxu2 %vm282_vm0, %v65_v21  ;;  %v4382_v21 = vld [vmem:[%s7146_s2 + $0x68] sm:$0xff] }
  0x2e   :  { %3384 = vmatpush.xpose.msk.msra.mxu0 %vm282_vm0, %v48_v22  ;;  %3817 = vmatpush.xpose.msk.msra.mxu3 %vm282_vm0, %v48_v22  ;;  %v113_v22 = vld [vmem:[%s7147_s3 + $0x228] sm:$0xff] }
  0x2f   :  { %3416 = vmatpush.xpose.msk.msra.mxu1 %vm282_vm0, %v64_v23  ;;  %3833 = vmatpush.xpose.msk.msra.mxu2 %vm282_vm0, %v64_v23  ;;  %v129_v23 = vld [vmem:[%s7147_s3 + $0x2a8] sm:$0xff] }
  0x32   :  { %3385 = vmatpush.xpose.msk.msra.mxu0 %vm282_vm0, %v47_v24  ;;  %3818 = vmatpush.xpose.msk.msra.mxu3 %vm282_vm0, %v47_v24  ;;  %v80_v24 = vld [vmem:[%s7147_s3 + $0x120] sm:$0xff] }
  0x33   :  { %3417 = vmatpush.xpose.msk.msra.mxu1 %vm282_vm0, %v63_v25  ;;  %3834 = vmatpush.xpose.msk.msra.mxu2 %vm282_vm0, %v63_v25  ;;  %v96_v25 = vld [vmem:[%s7147_s3 + $0x1a0] sm:$0xff] }
  0x36   :  { %3386 = vmatpush.xpose.msk.msra.mxu0 %vm282_vm0, %v46_v26  ;;  %3819 = vmatpush.xpose.msk.msra.mxu3 %vm282_vm0, %v46_v26  ;;  %v112_v26 = vld [vmem:[%s7147_s3 + $0x220] sm:$0xff] }
  0x37   :  { %3418 = vmatpush.xpose.msk.msra.mxu1 %vm282_vm0, %v62_v27  ;;  %3835 = vmatpush.xpose.msk.msra.mxu2 %vm282_vm0, %v62_v27  ;;  %v128_v27 = vld [vmem:[%s7147_s3 + $0x2a0] sm:$0xff] }
  0x3a   :  { %3387 = vmatpush.xpose.msk.msra.mxu0 %vm282_vm0, %v45_v28  ;;  %3820 = vmatpush.xpose.msk.msra.mxu3 %vm282_vm0, %v45_v28  ;;  %v79_v28 = vld [vmem:[%s7147_s3 + $0x118] sm:$0xff] }
  0x3b   :  { %3419 = vmatpush.xpose.msk.msra.mxu1 %vm282_vm0, %v61_v29  ;;  %3836 = vmatpush.xpose.msk.msra.mxu2 %vm282_vm0, %v61_v29  ;;  %v95_v29 = vld [vmem:[%s7147_s3 + $0x198] sm:$0xff] }
  0x3e   :  { %3388 = vmatpush.xpose.msk.msra.mxu0 %vm282_vm0, %v44_v30  ;;  %3821 = vmatpush.xpose.msk.msra.mxu3 %vm282_vm0, %v44_v30  ;;  %v4427_v30 = vld [vmem:[%s7146_s2 + $0x30] sm:$0xff] }
  0x3f   :  { %3420 = vmatpush.xpose.msk.msra.mxu1 %vm282_vm0, %v60_v31  ;;  %3837 = vmatpush.xpose.msk.msra.mxu2 %vm282_vm0, %v60_v31  ;;  %v4432_v31 = vld [vmem:[%s7146_s2 + $0x70] sm:$0xff] }
  0x41   :  { %3389 = vmatmul.msk.f32.vlgmr.msra.gmra.mxu0 %vm282_vm0, %v4127_v34  ;;  %3397 = vmatmul.msk.f32.vlgmr.msra.gmra.mxu3 %vm282_vm0, %v4132_v35 }
  0x42   :  { %3469 = vmatpush.xpose.msk.msrb.mxu3 %vm282_vm0, %v107_v33  ;;  %3421 = vmatmul.msk.f32.vlgmr.msra.gmra.mxu1 %vm282_vm0, %v4127_v34  ;;  %v127_v33 = vld [vmem:[%s7147_s3 + $0x298] sm:$0xff] }
  0x43   :  { %3437 = vmatpush.xpose.msk.msrb.mxu2 %vm282_vm0, %v91_v32  ;;  %3501 = vmatpush.xpose.msk.msrb.mxu0 %vm282_vm0, %v123_v36  ;;  %v111_v32 = vld [vmem:[%s7147_s3 + $0x218] sm:$0xff]  ;;  %v78_v36 = vld [vmem:[%s7147_s3 + $0x110] sm:$0xff] }
  0x44   :  { %3429 = vmatmul.msk.f32.vlgmr.msra.gmra.mxu2 %vm282_vm0, %v4132_v35  ;;  %3533 = vmatpush.xpose.msk.msrb.mxu1 %vm282_vm0, %v139_v37  ;;  %v94_v37 = vld [vmem:[%s7147_s3 + $0x190] sm:$0xff] }
  0x46   :  { %3470 = vmatpush.xpose.msk.msrb.mxu3 %vm282_vm0, %v106_v39  ;;  %v126_v39 = vld [vmem:[%s7147_s3 + $0x290] sm:$0xff] }
  0x47   :  { %3438 = vmatpush.xpose.msk.msrb.mxu2 %vm282_vm0, %v90_v38  ;;  %3502 = vmatpush.xpose.msk.msrb.mxu0 %vm282_vm0, %v122_v40  ;;  %v110_v38 = vld [vmem:[%s7147_s3 + $0x210] sm:$0xff]  ;;  %v77_v40 = vld [vmem:[%s7147_s3 + $0x108] sm:$0xff] }
  0x48   :  { %3534 = vmatpush.xpose.msk.msrb.mxu1 %vm282_vm0, %v138_v41  ;;  %v93_v41 = vld [vmem:[%s7147_s3 + $0x188] sm:$0xff] }
  0x49   :  { %3390 = vmatmul.msk.f32.gmra.mxu0 %vm282_vm0, %v4177_v44  ;;  %3398 = vmatmul.msk.f32.gmra.mxu3 %vm282_vm0, %v4182_v45 }
  0x4a   :  { %3471 = vmatpush.xpose.msk.msrb.mxu3 %vm282_vm0, %v105_v43  ;;  %3422 = vmatmul.msk.f32.gmra.mxu1 %vm282_vm0, %v4177_v44  ;;  %v4482_v43 = vld [vmem:[%s7146_s2 + $0x78] sm:$0xff] }
  0x4b   :  { %3439 = vmatpush.xpose.msk.msrb.mxu2 %vm282_vm0, %v89_v42  ;;  %3503 = vmatpush.xpose.msk.msrb.mxu0 %vm282_vm0, %v121_v46  ;;  %v4477_v42 = vld [vmem:[%s7146_s2 + $0x38] sm:$0xff]  ;;  %v109_v46 = vld [vmem:[%s7147_s3 + $0x208] sm:$0xff] }
  0x4c   :  { %3430 = vmatmul.msk.f32.gmra.mxu2 %vm282_vm0, %v4182_v45  ;;  %3535 = vmatpush.xpose.msk.msrb.mxu1 %vm282_vm0, %v137_v47  ;;  %v125_v47 = vld [vmem:[%s7147_s3 + $0x288] sm:$0xff] }
  0x4e   :  { %3472 = vmatpush.xpose.msk.msrb.mxu3 %vm282_vm0, %v104_v49  ;;  %v92_v49 = vld [vmem:[%s7147_s3 + $0x180] sm:$0xff] }
  0x4f   :  { %3440 = vmatpush.xpose.msk.msrb.mxu2 %vm282_vm0, %v88_v48  ;;  %3504 = vmatpush.xpose.msk.msrb.mxu0 %vm282_vm0, %v120_v50  ;;  %v76_v48 = vld [vmem:[%s7147_s3 + $0x100] sm:$0xff]  ;;  %v155_v50 = vld [vmem:[%s7147_s3 + $0x378] sm:$0xff] }
  0x50   :  { %3536 = vmatpush.xpose.msk.msrb.mxu1 %vm282_vm0, %v136_v51  ;;  %v171_v51 = vld [vmem:[%s7147_s3 + $0x3f8] sm:$0xff] }
  0x51   :  { %3391 = vmatmul.msk.f32.gmra.mxu0 %vm282_vm0, %v4227_v54  ;;  %3399 = vmatmul.msk.f32.gmra.mxu3 %vm282_vm0, %v4232_v55 }
  0x52   :  { %3473 = vmatpush.xpose.msk.msrb.mxu3 %vm282_vm0, %v103_v53  ;;  %3423 = vmatmul.msk.f32.gmra.mxu1 %vm282_vm0, %v4227_v54  ;;  %v124_v53 = vld [vmem:[%s7147_s3 + $0x280] sm:$0xff] }
  0x53   :  { %3441 = vmatpush.xpose.msk.msrb.mxu2 %vm282_vm0, %v87_v52  ;;  %3505 = vmatpush.xpose.msk.msrb.mxu0 %vm282_vm0, %v119_v56  ;;  %v108_v52 = vld [vmem:[%s7147_s3 + $0x200] sm:$0xff]  ;;  %v187_v56 = vld [vmem:[%s7147_s3 + $0x478] sm:$0xff] }
  0x54   :  { %3431 = vmatmul.msk.f32.gmra.mxu2 %vm282_vm0, %v4232_v55  ;;  %3537 = vmatpush.xpose.msk.msrb.mxu1 %vm282_vm0, %v135_v57  ;;  %v203_v57 = vld [vmem:[%s7147_s3 + $0x4f8] sm:$0xff] }
  0x56   :  { %3474 = vmatpush.xpose.msk.msrb.mxu3 %vm282_vm0, %v102_v59  ;;  %v170_v59 = vld [vmem:[%s7147_s3 + $0x3f0] sm:$0xff] }
  0x57   :  { %3442 = vmatpush.xpose.msk.msrb.mxu2 %vm282_vm0, %v86_v58  ;;  %3506 = vmatpush.xpose.msk.msrb.mxu0 %vm282_vm0, %v118_v60  ;;  %v154_v58 = vld [vmem:[%s7147_s3 + $0x370] sm:$0xff] }
  0x58   :  { %3538 = vmatpush.xpose.msk.msrb.mxu1 %vm282_vm0, %v134_v61  ;;  %v186_v60 = vld [vmem:[%s7147_s3 + $0x470] sm:$0xff] }
  0x59   :  { %3392 = vmatmul.msk.f32.gmra.mxu0 %vm282_vm0, %v4277_v0  ;;  %3400 = vmatmul.msk.f32.gmra.mxu3 %vm282_vm0, %v4282_v1  ;;  %v202_v61 = vld [vmem:[%s7147_s3 + $0x4f0] sm:$0xff] }
  0x5a   :  { %3475 = vmatpush.xpose.msk.msrb.mxu3 %vm282_vm0, %v101_v63  ;;  %3424 = vmatmul.msk.f32.gmra.mxu1 %vm282_vm0, %v4277_v0  ;;  %v169_v63 = vld [vmem:[%s7147_s3 + $0x3e8] sm:$0xff] }
  0x5b   :  { %3443 = vmatpush.xpose.msk.msrb.mxu2 %vm282_vm0, %v85_v62  ;;  %3507 = vmatpush.xpose.msk.msrb.mxu0 %vm282_vm0, %v117_v2  ;;  %v153_v62 = vld [vmem:[%s7147_s3 + $0x368] sm:$0xff] }
  0x5c   :  { %3432 = vmatmul.msk.f32.gmra.mxu2 %vm282_vm0, %v4282_v1  ;;  %3539 = vmatpush.xpose.msk.msrb.mxu1 %vm282_vm0, %v133_v3  ;;  %v185_v2 = vld [vmem:[%s7147_s3 + $0x468] sm:$0xff] }
  0x5d   :  { %v201_v3 = vld [vmem:[%s7147_s3 + $0x4e8] sm:$0xff] }
  0x5e   :  { %3476 = vmatpush.xpose.msk.msrb.mxu3 %vm282_vm0, %v100_v5  ;;  %v168_v5 = vld [vmem:[%s7147_s3 + $0x3e0] sm:$0xff] }
  0x5f   :  { %3444 = vmatpush.xpose.msk.msrb.mxu2 %vm282_vm0, %v84_v4  ;;  %3508 = vmatpush.xpose.msk.msrb.mxu0 %vm282_vm0, %v116_v6  ;;  %v152_v4 = vld [vmem:[%s7147_s3 + $0x360] sm:$0xff] }
  0x60   :  { %3540 = vmatpush.xpose.msk.msrb.mxu1 %vm282_vm0, %v132_v7  ;;  %v184_v6 = vld [vmem:[%s7147_s3 + $0x460] sm:$0xff] }
  0x61   :  { %3393 = vmatmul.msk.f32.gmra.mxu0 %vm282_vm0, %v4327_v10  ;;  %3401 = vmatmul.msk.f32.gmra.mxu3 %vm282_vm0, %v4332_v11  ;;  %v200_v7 = vld [vmem:[%s7147_s3 + $0x4e0] sm:$0xff] }
  0x62   :  { %3477 = vmatpush.xpose.msk.msrb.mxu3 %vm282_vm0, %v99_v9  ;;  %3425 = vmatmul.msk.f32.gmra.mxu1 %vm282_vm0, %v4327_v10  ;;  %v167_v9 = vld [vmem:[%s7147_s3 + $0x3d8] sm:$0xff] }
  0x63   :  { %3445 = vmatpush.xpose.msk.msrb.mxu2 %vm282_vm0, %v83_v8  ;;  %3509 = vmatpush.xpose.msk.msrb.mxu0 %vm282_vm0, %v115_v12  ;;  %v151_v8 = vld [vmem:[%s7147_s3 + $0x358] sm:$0xff] }
  0x64   :  { %3433 = vmatmul.msk.f32.gmra.mxu2 %vm282_vm0, %v4332_v11  ;;  %3541 = vmatpush.xpose.msk.msrb.mxu1 %vm282_vm0, %v131_v13  ;;  %v183_v12 = vld [vmem:[%s7147_s3 + $0x458] sm:$0xff] }
  0x65   :  { %v199_v13 = vld [vmem:[%s7147_s3 + $0x4d8] sm:$0xff] }
  0x66   :  { %3478 = vmatpush.xpose.msk.msrb.mxu3 %vm282_vm0, %v98_v15  ;;  %v166_v15 = vld [vmem:[%s7147_s3 + $0x3d0] sm:$0xff] }
  0x67   :  { %3446 = vmatpush.xpose.msk.msrb.mxu2 %vm282_vm0, %v82_v14  ;;  %3510 = vmatpush.xpose.msk.msrb.mxu0 %vm282_vm0, %v114_v16  ;;  %v150_v14 = vld [vmem:[%s7147_s3 + $0x350] sm:$0xff]  ;;  %v149_v16 = vld [vmem:[%s7147_s3 + $0x348] sm:$0xff] }
  0x68   :  { %3542 = vmatpush.xpose.msk.msrb.mxu1 %vm282_vm0, %v130_v17  ;;  %v182_v17 = vld [vmem:[%s7147_s3 + $0x450] sm:$0xff] }
  0x69   :  { %3394 = vmatmul.msk.f32.gmra.mxu0 %vm282_vm0, %v4377_v20  ;;  %3402 = vmatmul.msk.f32.gmra.mxu3 %vm282_vm0, %v4382_v21 }
  0x6a   :  { %3479 = vmatpush.xpose.msk.msrb.mxu3 %vm282_vm0, %v97_v19  ;;  %3426 = vmatmul.msk.f32.gmra.mxu1 %vm282_vm0, %v4377_v20  ;;  %v198_v19 = vld [vmem:[%s7147_s3 + $0x4d0] sm:$0xff] }
  0x6b   :  { %3447 = vmatpush.xpose.msk.msrb.mxu2 %vm282_vm0, %v81_v18  ;;  %3511 = vmatpush.xpose.msk.msrb.mxu0 %vm282_vm0, %v113_v22  ;;  %v165_v18 = vld [vmem:[%s7147_s3 + $0x3c8] sm:$0xff]  ;;  %v148_v22 = vld [vmem:[%s7147_s3 + $0x340] sm:$0xff] }
  0x6c   :  { %3434 = vmatmul.msk.f32.gmra.mxu2 %vm282_vm0, %v4382_v21  ;;  %3543 = vmatpush.xpose.msk.msrb.mxu1 %vm282_vm0, %v129_v23  ;;  %v164_v23 = vld [vmem:[%s7147_s3 + $0x3c0] sm:$0xff] }
  0x6e   :  { %3480 = vmatpush.xpose.msk.msrb.mxu3 %vm282_vm0, %v96_v25  ;;  %v197_v25 = vld [vmem:[%s7147_s3 + $0x4c8] sm:$0xff] }
  0x6f   :  { %3448 = vmatpush.xpose.msk.msrb.mxu2 %vm282_vm0, %v80_v24  ;;  %3512 = vmatpush.xpose.msk.msrb.mxu0 %vm282_vm0, %v112_v26  ;;  %v181_v24 = vld [vmem:[%s7147_s3 + $0x448] sm:$0xff]  ;;  %v147_v26 = vld [vmem:[%s7147_s3 + $0x338] sm:$0xff] }
  0x70   :  { %3544 = vmatpush.xpose.msk.msrb.mxu1 %vm282_vm0, %v128_v27  ;;  %v163_v27 = vld [vmem:[%s7147_s3 + $0x3b8] sm:$0xff] }
  0x71   :  { %3395 = vmatmul.msk.f32.gmra.mxu0 %vm282_vm0, %v4427_v30  ;;  %3403 = vmatmul.msk.f32.gmra.mxu3 %vm282_vm0, %v4432_v31 }
  0x72   :  { %3481 = vmatpush.xpose.msk.msrb.mxu3 %vm282_vm0, %v95_v29  ;;  %3427 = vmatmul.msk.f32.gmra.mxu1 %vm282_vm0, %v4427_v30  ;;  %v196_v29 = vld [vmem:[%s7147_s3 + $0x4c0] sm:$0xff] }
  0x73   :  { %3449 = vmatpush.xpose.msk.msrb.mxu2 %vm282_vm0, %v79_v28  ;;  %3513 = vmatpush.xpose.msk.msrb.mxu0 %vm282_vm0, %v111_v32  ;;  %v180_v28 = vld [vmem:[%s7147_s3 + $0x440] sm:$0xff]  ;;  %v146_v32 = vld [vmem:[%s7147_s3 + $0x330] sm:$0xff] }
  0x74   :  { %3435 = vmatmul.msk.f32.gmra.mxu2 %vm282_vm0, %v4432_v31  ;;  %3545 = vmatpush.xpose.msk.msrb.mxu1 %vm282_vm0, %v127_v33  ;;  %v162_v33 = vld [vmem:[%s7147_s3 + $0x3b0] sm:$0xff] }
  0x76   :  { %3482 = vmatpush.xpose.msk.msrb.mxu3 %vm282_vm0, %v94_v37  ;;  %v195_v37 = vld [vmem:[%s7147_s3 + $0x4b8] sm:$0xff] }
  0x77   :  { %3450 = vmatpush.xpose.msk.msrb.mxu2 %vm282_vm0, %v78_v36  ;;  %3514 = vmatpush.xpose.msk.msrb.mxu0 %vm282_vm0, %v110_v38  ;;  %v179_v36 = vld [vmem:[%s7147_s3 + $0x438] sm:$0xff]  ;;  %v145_v38 = vld [vmem:[%s7147_s3 + $0x328] sm:$0xff] }
  0x78   :  { %3546 = vmatpush.xpose.msk.msrb.mxu1 %vm282_vm0, %v126_v39  ;;  %v161_v39 = vld [vmem:[%s7147_s3 + $0x3a8] sm:$0xff] }
  0x79   :  { %3396 = vmatmul.msk.f32.gmra.mxu0 %vm282_vm0, %v4477_v42  ;;  %3404 = vmatmul.msk.f32.gmra.mxu3 %vm282_vm0, %v4482_v43 }
  0x7a   :  { %3483 = vmatpush.xpose.msk.msrb.mxu3 %vm282_vm0, %v93_v41  ;;  %3428 = vmatmul.msk.f32.gmra.mxu1 %vm282_vm0, %v4477_v42  ;;  %v194_v41 = vld [vmem:[%s7147_s3 + $0x4b0] sm:$0xff] }
  0x7b   :  { %3451 = vmatpush.xpose.msk.msrb.mxu2 %vm282_vm0, %v77_v40  ;;  %3515 = vmatpush.xpose.msk.msrb.mxu0 %vm282_vm0, %v109_v46  ;;  %v178_v40 = vld [vmem:[%s7147_s3 + $0x430] sm:$0xff]  ;;  %v144_v46 = vld [vmem:[%s7147_s3 + $0x320] sm:$0xff] }
  0x7c   :  { %3436 = vmatmul.msk.f32.gmra.mxu2 %vm282_vm0, %v4482_v43  ;;  %3547 = vmatpush.xpose.msk.msrb.mxu1 %vm282_vm0, %v125_v47  ;;  %v160_v47 = vld [vmem:[%s7147_s3 + $0x3a0] sm:$0xff] }
  0x7e   :  { %3484 = vmatpush.xpose.msk.msrb.mxu3 %vm282_vm0, %v92_v49 }
  0x7f   :  { %3452 = vmatpush.xpose.msk.msrb.mxu2 %vm282_vm0, %v76_v48  ;;  %3516 = vmatpush.xpose.msk.msrb.mxu0 %vm282_vm0, %v108_v52  ;;  %v177_v48 = vld [vmem:[%s7147_s3 + $0x428] sm:$0xff] }
  0x80   :  { %3548 = vmatpush.xpose.msk.msrb.mxu1 %vm282_vm0, %v124_v53  ;;  %v193_v52 = vld [vmem:[%s7147_s3 + $0x4a8] sm:$0xff] }
  0x81   :  { %3485 = vmatmul.msk.f32.vlgmr.msrb.gmra.mxu3 %vm282_vm0, %v4127_v34 }
  0x82   :  { %3597 = vmatpush.xpose.msk.msra.mxu3 %vm282_vm0, %v171_v51  ;;  %3517 = vmatmul.msk.f32.vlgmr.msrb.gmra.mxu0 %vm282_vm0, %v4127_v34 }
  0x83   :  { %3565 = vmatpush.xpose.msk.msra.mxu2 %vm282_vm0, %v155_v50  ;;  %3629 = vmatpush.xpose.msk.msra.mxu0 %vm282_vm0, %v187_v56  ;;  %v252_v50 = vld [vmem:[%s7148_s4] sm:$0xff] }
  0x84   :  { %3661 = vmatpush.xpose.msk.msra.mxu1 %vm282_vm0, %v203_v57  ;;  %3453 = vmatmul.msk.f32.vlgmr.msrb.gmra.mxu2 %vm282_vm0, %v4127_v34  ;;  %v4774_v53 = vperm.slane %v252_v50, 0  ;;  %v4779_v56 = vperm.slane %v252_v50, 1  ;;  %v143_v57 = vld [vmem:[%s7147_s3 + $0x318] sm:$0xff] }
  0x85   :  { %3549 = vmatmul.msk.f32.vlgmr.msrb.gmra.mxu1 %vm282_vm0, %v4127_v34 }
  0x86   :  { %3598 = vmatpush.xpose.msk.msra.mxu3 %vm282_vm0, %v170_v59  ;;  %v176_v59 = vld [vmem:[%s7147_s3 + $0x420] sm:$0xff] }
  0x87   :  { %3566 = vmatpush.xpose.msk.msra.mxu2 %vm282_vm0, %v154_v58  ;;  %3630 = vmatpush.xpose.msk.msra.mxu0 %vm282_vm0, %v186_v60  ;;  %v159_v58 = vld [vmem:[%s7147_s3 + $0x398] sm:$0xff] }
  0x88   :  { %3662 = vmatpush.xpose.msk.msra.mxu1 %vm282_vm0, %v202_v61 }
  0x89   :  { %3486 = vmatmul.msk.f32.gmra.mxu3 %vm282_vm0, %v4177_v44 }
  0x8a   :  { %3599 = vmatpush.xpose.msk.msra.mxu3 %vm282_vm0, %v169_v63  ;;  %3518 = vmatmul.msk.f32.gmra.mxu0 %vm282_vm0, %v4177_v44 }
  0x8b   :  { %3567 = vmatpush.xpose.msk.msra.mxu2 %vm282_vm0, %v153_v62  ;;  %3631 = vmatpush.xpose.msk.msra.mxu0 %vm282_vm0, %v185_v2 }
  0x8c   :  { %3663 = vmatpush.xpose.msk.msra.mxu1 %vm282_vm0, %v201_v3  ;;  %3454 = vmatmul.msk.f32.gmra.mxu2 %vm282_vm0, %v4177_v44  ;;  %v192_v3 = vld [vmem:[%s7147_s3 + $0x4a0] sm:$0xff] }
  0x8d   :  { %3550 = vmatmul.msk.f32.gmra.mxu1 %vm282_vm0, %v4177_v44 }
  0x8e   :  { %3600 = vmatpush.xpose.msk.msra.mxu3 %vm282_vm0, %v168_v5  ;;  %v158_v5 = vld [vmem:[%s7147_s3 + $0x390] sm:$0xff] }
  0x8f   :  { %3568 = vmatpush.xpose.msk.msra.mxu2 %vm282_vm0, %v152_v4  ;;  %3632 = vmatpush.xpose.msk.msra.mxu0 %vm282_vm0, %v184_v6  ;;  %v142_v4 = vld [vmem:[%s7147_s3 + $0x310] sm:$0xff]  ;;  %v175_v6 = vld [vmem:[%s7147_s3 + $0x418] sm:$0xff] }
  0x90   :  { %3664 = vmatpush.xpose.msk.msra.mxu1 %vm282_vm0, %v200_v7 }
  0x91   :  { %3487 = vmatmul.msk.f32.gmra.mxu3 %vm282_vm0, %v4227_v54 }
  0x92   :  { %3601 = vmatpush.xpose.msk.msra.mxu3 %vm282_vm0, %v167_v9  ;;  %3519 = vmatmul.msk.f32.gmra.mxu0 %vm282_vm0, %v4227_v54 }
  0x93   :  { %3569 = vmatpush.xpose.msk.msra.mxu2 %vm282_vm0, %v151_v8  ;;  %3633 = vmatpush.xpose.msk.msra.mxu0 %vm282_vm0, %v183_v12 }
  0x94   :  { %3665 = vmatpush.xpose.msk.msra.mxu1 %vm282_vm0, %v199_v13  ;;  %3455 = vmatmul.msk.f32.gmra.mxu2 %vm282_vm0, %v4227_v54 }
  0x95   :  { %3551 = vmatmul.msk.f32.gmra.mxu1 %vm282_vm0, %v4227_v54 }
  0x96   :  { %3602 = vmatpush.xpose.msk.msra.mxu3 %vm282_vm0, %v166_v15  ;;  %v141_v15 = vld [vmem:[%s7147_s3 + $0x308] sm:$0xff] }
  0x97   :  { %3570 = vmatpush.xpose.msk.msra.mxu2 %vm282_vm0, %v150_v14  ;;  %3634 = vmatpush.xpose.msk.msra.mxu0 %vm282_vm0, %v182_v17  ;;  %v191_v14 = vld [vmem:[%s7147_s3 + $0x498] sm:$0xff]  ;;  %v174_v17 = vld [vmem:[%s7147_s3 + $0x410] sm:$0xff] }
  0x98   :  { %3666 = vmatpush.xpose.msk.msra.mxu1 %vm282_vm0, %v198_v19 }
  0x99   :  { %3488 = vmatmul.msk.f32.gmra.mxu3 %vm282_vm0, %v4277_v0 }
  0x9a   :  { %3603 = vmatpush.xpose.msk.msra.mxu3 %vm282_vm0, %v165_v18  ;;  %3520 = vmatmul.msk.f32.gmra.mxu0 %vm282_vm0, %v4277_v0 }
  0x9b   :  { %3571 = vmatpush.xpose.msk.msra.mxu2 %vm282_vm0, %v149_v16  ;;  %3635 = vmatpush.xpose.msk.msra.mxu0 %vm282_vm0, %v181_v24  ;;  %v157_v16 = vld [vmem:[%s7147_s3 + $0x388] sm:$0xff] }
  0x9c   :  { %3456 = vmatmul.msk.f32.gmra.mxu2 %vm282_vm0, %v4277_v0  ;;  %3667 = vmatpush.xpose.msk.msra.mxu1 %vm282_vm0, %v197_v25  ;;  %v190_v25 = vld [vmem:[%s7147_s3 + $0x490] sm:$0xff] }
  0x9d   :  { %3552 = vmatmul.msk.f32.gmra.mxu1 %vm282_vm0, %v4277_v0 }
  0x9e   :  { %3604 = vmatpush.xpose.msk.msra.mxu3 %vm282_vm0, %v164_v23 }
  0x9f   :  { %3572 = vmatpush.xpose.msk.msra.mxu2 %vm282_vm0, %v148_v22  ;;  %3636 = vmatpush.xpose.msk.msra.mxu0 %vm282_vm0, %v180_v28  ;;  %v189_v28 = vld [vmem:[%s7147_s3 + $0x488] sm:$0xff] }
  0xa0   :  { %3668 = vmatpush.xpose.msk.msra.mxu1 %vm282_vm0, %v196_v29 }
  0xa1   :  { %3489 = vmatmul.msk.f32.gmra.mxu3 %vm282_vm0, %v4327_v10 }
  0xa2   :  { %3521 = vmatmul.msk.f32.gmra.mxu0 %vm282_vm0, %v4327_v10  ;;  %3605 = vmatpush.xpose.msk.msra.mxu3 %vm282_vm0, %v163_v27  ;;  %v173_v27 = vld [vmem:[%s7147_s3 + $0x408] sm:$0xff] }
  0xa3   :  { %3573 = vmatpush.xpose.msk.msra.mxu2 %vm282_vm0, %v147_v26  ;;  %3637 = vmatpush.xpose.msk.msra.mxu0 %vm282_vm0, %v179_v36  ;;  %v140_v26 = vld [vmem:[%s7147_s3 + $0x300] sm:$0xff] }
  0xa4   :  { %3457 = vmatmul.msk.f32.gmra.mxu2 %vm282_vm0, %v4327_v10  ;;  %3669 = vmatpush.xpose.msk.msra.mxu1 %vm282_vm0, %v195_v37 }
  0xa5   :  { %3553 = vmatmul.msk.f32.gmra.mxu1 %vm282_vm0, %v4327_v10 }
  0xa6   :  { %3606 = vmatpush.xpose.msk.msra.mxu3 %vm282_vm0, %v162_v33 }
  0xa7   :  { %3574 = vmatpush.xpose.msk.msra.mxu2 %vm282_vm0, %v146_v32  ;;  %3638 = vmatpush.xpose.msk.msra.mxu0 %vm282_vm0, %v178_v40  ;;  %v188_v40 = vld [vmem:[%s7147_s3 + $0x480] sm:$0xff] }
  0xa8   :  { %3670 = vmatpush.xpose.msk.msra.mxu1 %vm282_vm0, %v194_v41  ;;  %v219_v41 = vld [vmem:[%s7147_s3 + $0x578] sm:$0xff] }
  0xa9   :  { %3490 = vmatmul.msk.f32.gmra.mxu3 %vm282_vm0, %v4377_v20 }
  0xaa   :  { %3522 = vmatmul.msk.f32.gmra.mxu0 %vm282_vm0, %v4377_v20  ;;  %3607 = vmatpush.xpose.msk.msra.mxu3 %vm282_vm0, %v161_v39  ;;  %v172_v39 = vld [vmem:[%s7147_s3 + $0x400] sm:$0xff] }
  0xab   :  { %3575 = vmatpush.xpose.msk.msra.mxu2 %vm282_vm0, %v145_v38  ;;  %3639 = vmatpush.xpose.msk.msra.mxu0 %vm282_vm0, %v177_v48 }
  0xac   :  { %3458 = vmatmul.msk.f32.gmra.mxu2 %vm282_vm0, %v4377_v20  ;;  %3671 = vmatpush.xpose.msk.msra.mxu1 %vm282_vm0, %v193_v52 }
  0xad   :  { %3554 = vmatmul.msk.f32.gmra.mxu1 %vm282_vm0, %v4377_v20 }
  0xae   :  { %3608 = vmatpush.xpose.msk.msra.mxu3 %vm282_vm0, %v160_v47 }
  0xaf   :  { %3576 = vmatpush.xpose.msk.msra.mxu2 %vm282_vm0, %v144_v46  ;;  %3640 = vmatpush.xpose.msk.msra.mxu0 %vm282_vm0, %v176_v59  ;;  %v235_v46 = vld [vmem:[%s7147_s3 + $0x5f8] sm:$0xff]  ;;  %v234_v59 = vld [vmem:[%s7147_s3 + $0x5f0] sm:$0xff] }
  0xb0   :  { %3672 = vmatpush.xpose.msk.msra.mxu1 %vm282_vm0, %v192_v3 }
  0xb1   :  { %3491 = vmatmul.msk.f32.gmra.mxu3 %vm282_vm0, %v4427_v30 }
  0xb2   :  { %3523 = vmatmul.msk.f32.gmra.mxu0 %vm282_vm0, %v4427_v30  ;;  %3609 = vmatpush.xpose.msk.msra.mxu3 %vm282_vm0, %v159_v58  ;;  %v218_v58 = vld [vmem:[%s7147_s3 + $0x570] sm:$0xff] }
  0xb3   :  { %3577 = vmatpush.xpose.msk.msra.mxu2 %vm282_vm0, %v143_v57  ;;  %3641 = vmatpush.xpose.msk.msra.mxu0 %vm282_vm0, %v175_v6 }
  0xb4   :  { %3459 = vmatmul.msk.f32.gmra.mxu2 %vm282_vm0, %v4427_v30  ;;  %3673 = vmatpush.xpose.msk.msra.mxu1 %vm282_vm0, %v191_v14  ;;  %v233_v14 = vld [vmem:[%s7147_s3 + $0x5e8] sm:$0xff] }
  0xb5   :  { %3555 = vmatmul.msk.f32.gmra.mxu1 %vm282_vm0, %v4427_v30 }
  0xb6   :  { %3610 = vmatpush.xpose.msk.msra.mxu3 %vm282_vm0, %v158_v5 }
  0xb7   :  { %3578 = vmatpush.xpose.msk.msra.mxu2 %vm282_vm0, %v142_v4  ;;  %3642 = vmatpush.xpose.msk.msra.mxu0 %vm282_vm0, %v174_v17 }
  0xb8   :  { %3674 = vmatpush.xpose.msk.msra.mxu1 %vm282_vm0, %v190_v25 }
  0xb9   :  { %3492 = vmatmul.msk.f32.gmra.mxu3 %vm282_vm0, %v4477_v42 }
  0xba   :  { %3524 = vmatmul.msk.f32.gmra.mxu0 %vm282_vm0, %v4477_v42  ;;  %3611 = vmatpush.xpose.msk.msra.mxu3 %vm282_vm0, %v157_v16 }
  0xbb   :  { %3579 = vmatpush.xpose.msk.msra.mxu2 %vm282_vm0, %v141_v15  ;;  %3643 = vmatpush.xpose.msk.msra.mxu0 %vm282_vm0, %v173_v27  ;;  %v250_v15 = vld [vmem:[%s7147_s3 + $0x670] sm:$0xff]  ;;  %v232_v27 = vld [vmem:[%s7147_s3 + $0x5e0] sm:$0xff] }
  0xbc   :  { %3460 = vmatmul.msk.f32.gmra.mxu2 %vm282_vm0, %v4477_v42  ;;  %3675 = vmatpush.xpose.msk.msra.mxu1 %vm282_vm0, %v189_v28  ;;  %v249_v28 = vld [vmem:[%s7147_s3 + $0x668] sm:$0xff] }
  0xbd   :  { %3556 = vmatmul.msk.f32.gmra.mxu1 %vm282_vm0, %v4477_v42 }
  0xbe   :  { %v4764_v49 = vpop.f32.mrf.mxu0 }
  0xbf   :  { %v4769_v51 = vpop.f32.mrf.mxu1  ;;  %3580 = vmatpush.xpose.msk.msra.mxu2 %vm282_vm0, %v140_v26  ;;  %3644 = vmatpush.xpose.msk.msra.mxu0 %vm282_vm0, %v172_v39  ;;  %v216_v26 = vld [vmem:[%s7147_s3 + $0x560] sm:$0xff] }
  0xc0   :  { %3676 = vmatpush.xpose.msk.msra.mxu1 %vm282_vm0, %v188_v40 }
  0xc1   :  { %3493 = vmatmul.msk.f32.gmra.mxu3 %vm282_vm0, %v4132_v35 }
  0xc2   :  { %3525 = vmatmul.msk.f32.gmra.mxu0 %vm282_vm0, %v4132_v35 }
  0xc3   :  { %3693 = vmatpush.xpose.msk.msrb.mxu2 %vm282_vm0, %v219_v41 }
  0xc4   :  { %3461 = vmatmul.msk.f32.gmra.mxu2 %vm282_vm0, %v4132_v35  ;;  %v996_v60 = vpop.f32.mrf.mxu3 }
  0xc5   :  { %3557 = vmatmul.msk.f32.gmra.mxu1 %vm282_vm0, %v4132_v35  ;;  %v4799_v61 = vadd.f32 %v996_v60, %v4774_v53  ;;  %v251_v60 = vld [vmem:[%s7147_s3 + $0x678] sm:$0xff] }
  0xc6   :  { %v4805_v63 = vpop.f32.mrf.mxu0  ;;  %3757 = vmatpush.xpose.msk.msrb.mxu0 %vm282_vm0, %v251_v60 }
  0xc7   :  { %v1061_v35 = vpop.f32.mrf.mxu2  ;;  %v4807_v2 = vpop.f32.mrf.mxu1  ;;  %3694 = vmatpush.xpose.msk.msrb.mxu2 %vm282_vm0, %v218_v58  ;;  %v248_v58 = vld [vmem:[%s7147_s3 + $0x660] sm:$0xff] }
  0xc8   :  { %v4803_v62 = vadd.f32 %v1061_v35, %v4779_v56 }
  0xc9   :  { %3494 = vmatmul.msk.f32.gmra.mxu3 %vm282_vm0, %v4182_v45 }
  0xca   :  { %7152 = vst [vmem:[#allocation6_spill] sm:$0xff] %v4803_v62  ;;  %3526 = vmatmul.msk.f32.gmra.mxu0 %vm282_vm0, %v4182_v45  ;;  %v2021_v62 = vld [vmem:[%s7149_s5 + $0x68] sm:$0xff] }
  0xcb   :  { %3758 = vmatpush.xpose.msk.msrb.mxu0 %vm282_vm0, %v250_v15 }
  0xcc   :  { %3462 = vmatmul.msk.f32.gmra.mxu2 %vm282_vm0, %v4182_v45  ;;  %v999_v7 = vpop.f32.mrf.mxu3 }
  0xcd   :  { %3558 = vmatmul.msk.f32.gmra.mxu1 %vm282_vm0, %v4182_v45  ;;  %v4833_v8 = vadd.f32 %v999_v7, %v4774_v53  ;;  %v2099_v7 = vld [vmem:[%s7149_s5 + $0x2d8] sm:$0xff] }
  0xce   :  { %v4839_v12 = vpop.f32.mrf.mxu0  ;;  %2124 = vmatpush.xpose.msrb.mxu1 %v2099_v7  ;;  %v230_v7 = vld [vmem:[%s7147_s3 + $0x5d0] sm:$0xff] }
  0xcf   :  { %v1064_v45 = vpop.f32.mrf.mxu2  ;;  %v4841_v13 = vpop.f32.mrf.mxu1  ;;  %3759 = vmatpush.xpose.msk.msrb.mxu0 %vm282_vm0, %v249_v28  ;;  %v246_v28 = vld [vmem:[%s7147_s3 + $0x650] sm:$0xff] }
  0xd0   :  { %v4837_v9 = vadd.f32 %v1064_v45, %v4779_v56  ;;  %v217_v45 = vld [vmem:[%s7147_s3 + $0x568] sm:$0xff] }
  0xd1   :  { %3495 = vmatmul.msk.f32.gmra.mxu3 %vm282_vm0, %v4232_v55  ;;  %3695 = vmatpush.xpose.msk.msrb.mxu2 %vm282_vm0, %v217_v45  ;;  %v247_v45 = vld [vmem:[%s7147_s3 + $0x658] sm:$0xff] }
  0xd2   :  { %7153 = vst [vmem:[#allocation7_spill] sm:$0xff] %v4837_v9  ;;  %3527 = vmatmul.msk.f32.gmra.mxu0 %vm282_vm0, %v4232_v55 }
  0xd3   :  { %3760 = vmatpush.xpose.msk.msrb.mxu0 %vm282_vm0, %v248_v58  ;;  %v245_v58 = vld [vmem:[%s7147_s3 + $0x648] sm:$0xff] }
  0xd4   :  { %3463 = vmatmul.msk.f32.gmra.mxu2 %vm282_vm0, %v4232_v55  ;;  %v1002_v18 = vpop.f32.mrf.mxu3 }
  0xd5   :  { %3559 = vmatmul.msk.f32.gmra.mxu1 %vm282_vm0, %v4232_v55  ;;  %v4867_v19 = vadd.f32 %v1002_v18, %v4774_v53  ;;  %3696 = vmatpush.xpose.msk.msrb.mxu2 %vm282_vm0, %v216_v26  ;;  %v213_v26 = vld [vmem:[%s7147_s3 + $0x548] sm:$0xff] }
  0xd6   :  { %v4873_v23 = vpop.f32.mrf.mxu0 }
  0xd7   :  { %v1067_v55 = vpop.f32.mrf.mxu2  ;;  %v4875_v24 = vpop.f32.mrf.mxu1  ;;  %3761 = vmatpush.xpose.msk.msrb.mxu0 %vm282_vm0, %v247_v45 }
  0xd8   :  { %v4871_v22 = vadd.f32 %v1067_v55, %v4779_v56 }
  0xd9   :  { %3496 = vmatmul.msk.f32.gmra.mxu3 %vm282_vm0, %v4282_v1 }
  0xda   :  { %7154 = vst [vmem:[#allocation8_spill] sm:$0xff] %v4871_v22  ;;  %3528 = vmatmul.msk.f32.gmra.mxu0 %vm282_vm0, %v4282_v1 }
  0xdb   :  { %3762 = vmatpush.xpose.msk.msrb.mxu0 %vm282_vm0, %v246_v28  ;;  %v244_v28 = vld [vmem:[%s7147_s3 + $0x640] sm:$0xff] }
  0xdc   :  { %3464 = vmatmul.msk.f32.gmra.mxu2 %vm282_vm0, %v4282_v1  ;;  %v1005_v29 = vpop.f32.mrf.mxu3 }
  0xdd   :  { %3560 = vmatmul.msk.f32.gmra.mxu1 %vm282_vm0, %v4282_v1  ;;  %v156_v1 = vld [vmem:[%s7147_s3 + $0x380] sm:$0xff]  ;;  %v4904_v32 = vadd.f32 %v1005_v29, %v4774_v53 }
  0xde   :  { %3612 = vmatpush.xpose.msk.msra.mxu3 %vm282_vm0, %v156_v1  ;;  %v4911_v37 = vpop.f32.mrf.mxu0 }
  0xdf   :  { %v1070_v33 = vpop.f32.mrf.mxu2  ;;  %v4913_v38 = vpop.f32.mrf.mxu1  ;;  %3763 = vmatpush.xpose.msk.msrb.mxu0 %vm282_vm0, %v245_v58 }
  0xe0   :  { %v4909_v36 = vadd.f32 %v1070_v33, %v4779_v56 }
  0xe1   :  { %3497 = vmatmul.msk.f32.gmra.mxu3 %vm282_vm0, %v4332_v11 }
  0xe2   :  { %7155 = vst [vmem:[#allocation9_spill] sm:$0xff] %v4909_v36  ;;  %3529 = vmatmul.msk.f32.gmra.mxu0 %vm282_vm0, %v4332_v11  ;;  %3725 = vmatpush.xpose.msk.msrb.mxu3 %vm282_vm0, %v235_v46  ;;  %v2086_v46 = vld [vmem:[%s7149_s5 + $0x270] sm:$0xff]  ;;  %v5317_v36 = vld [vmem:[%s7146_s2 + $0x48] sm:$0xff] }
  0xe3   :  { %2125 = vmatpush.xpose.msrb.mxu1 %v2086_v46  ;;  %3764 = vmatpush.xpose.msk.msrb.mxu0 %vm282_vm0, %v244_v28 }
  0xe4   :  { %3465 = vmatmul.msk.f32.gmra.mxu2 %vm282_vm0, %v4332_v11  ;;  %v1008_v47 = vpop.f32.mrf.mxu3 }
  0xe5   :  { %3561 = vmatmul.msk.f32.gmra.mxu1 %vm282_vm0, %v4332_v11  ;;  %v4940_v48 = vadd.f32 %v1008_v47, %v4774_v53  ;;  %v215_v47 = vld [vmem:[%s7147_s3 + $0x558] sm:$0xff] }
  0xe6   :  { %v4945_v11 = vpop.f32.mrf.mxu0  ;;  %3726 = vmatpush.xpose.msk.msrb.mxu3 %vm282_vm0, %v234_v59  ;;  %3697 = vmatpush.xpose.msk.msrb.mxu2 %vm282_vm0, %v215_v47  ;;  %v212_v47 = vld [vmem:[%s7147_s3 + $0x540] sm:$0xff] }
  0xe7   :  { %v1073_v50 = vpop.f32.mrf.mxu2  ;;  %v4947_v57 = vpop.f32.mrf.mxu1 }
  0xe8   :  { %v4943_v52 = vadd.f32 %v1073_v50, %v4779_v56  ;;  %v231_v50 = vld [vmem:[%s7147_s3 + $0x5d8] sm:$0xff] }
  0xe9   :  { %3498 = vmatmul.msk.f32.gmra.mxu3 %vm282_vm0, %v4382_v21 }
  0xea   :  { %7156 = vst [vmem:[#allocation10_spill] sm:$0xff] %v4943_v52  ;;  %3530 = vmatmul.msk.f32.gmra.mxu0 %vm282_vm0, %v4382_v21  ;;  %3727 = vmatpush.xpose.msk.msrb.mxu3 %vm282_vm0, %v233_v14 }
  0xec   :  { %3466 = vmatmul.msk.f32.gmra.mxu2 %vm282_vm0, %v4382_v21  ;;  %v1011_v35 = vpop.f32.mrf.mxu3 }
  0xed   :  { %3562 = vmatmul.msk.f32.gmra.mxu1 %vm282_vm0, %v4382_v21  ;;  %v4969_v3 = vadd.f32 %v1011_v35, %v4774_v53 }
  0xee   :  { %v4975_v5 = vpop.f32.mrf.mxu0  ;;  %3728 = vmatpush.xpose.msk.msrb.mxu3 %vm282_vm0, %v232_v27  ;;  %v229_v27 = vld [vmem:[%s7147_s3 + $0x5c8] sm:$0xff] }
  0xef   :  { %v1076_v21 = vpop.f32.mrf.mxu2  ;;  %v4977_v6 = vpop.f32.mrf.mxu1 }
  0xf0   :  { %v4973_v4 = vadd.f32 %v1076_v21, %v4779_v56  ;;  %v214_v21 = vld [vmem:[%s7147_s3 + $0x550] sm:$0xff] }
  0xf1   :  { %3499 = vmatmul.msk.f32.gmra.mxu3 %vm282_vm0, %v4432_v31  ;;  %3698 = vmatpush.xpose.msk.msrb.mxu2 %vm282_vm0, %v214_v21 }
  0xf2   :  { %7157 = vst [vmem:[#allocation11_spill] sm:$0xff] %v4973_v4  ;;  %3531 = vmatmul.msk.f32.gmra.mxu0 %vm282_vm0, %v4432_v31  ;;  %3729 = vmatpush.xpose.msk.msrb.mxu3 %vm282_vm0, %v231_v50  ;;  %v228_v50 = vld [vmem:[%s7147_s3 + $0x5c0] sm:$0xff] }
  0xf4   :  { %3467 = vmatmul.msk.f32.gmra.mxu2 %vm282_vm0, %v4432_v31  ;;  %v1014_v16 = vpop.f32.mrf.mxu3 }
  0xf5   :  { %3563 = vmatmul.msk.f32.gmra.mxu1 %vm282_vm0, %v4432_v31  ;;  %v5002_v17 = vadd.f32 %v1014_v16, %v4774_v53  ;;  %3699 = vmatpush.xpose.msk.msrb.mxu2 %vm282_vm0, %v213_v26  ;;  %v211_v26 = vld [vmem:[%s7147_s3 + $0x538] sm:$0xff] }
  0xf6   :  { %v5008_v55 = vpop.f32.mrf.mxu0  ;;  %3730 = vmatpush.xpose.msk.msrb.mxu3 %vm282_vm0, %v230_v7 }
  0xf7   :  { %v1079_v31 = vpop.f32.mrf.mxu2  ;;  %v5010_v25 = vpop.f32.mrf.mxu1 }
  0xf8   :  { %v5006_v18 = vadd.f32 %v1079_v31, %v4779_v56  ;;  %7159 = vst [vmem:[#allocation13_spill] sm:$0xff] %v5010_v25  ;;  %v2073_v31 = vld [vmem:[%s7149_s5 + $0x208] sm:$0xff]  ;;  %v3884_v25 = vld [vmem:[%s7146_s2] sm:$0xff] }
  0xf9   :  { %3500 = vmatmul.msk.f32.gmra.mxu3 %vm282_vm0, %v4482_v43  ;;  %2126 = vmatpush.xpose.msrb.mxu1 %v2073_v31  ;;  %v2060_v31 = vld [vmem:[%s7149_s5 + $0x1a0] sm:$0xff] }
  0xfa   :  { %7158 = vst [vmem:[#allocation12_spill] sm:$0xff] %v5006_v18  ;;  %3532 = vmatmul.msk.f32.gmra.mxu0 %vm282_vm0, %v4482_v43  ;;  %3731 = vmatpush.xpose.msk.msrb.mxu3 %vm282_vm0, %v229_v27  ;;  %v227_v27 = vld [vmem:[%s7147_s3 + $0x5b8] sm:$0xff]  ;;  %v5284_v18 = vld [vmem:[%s7146_s2 + $0x40] sm:$0xff] }
  0xfb   :  { %3700 = vmatpush.xpose.msk.msrb.mxu2 %vm282_vm0, %v212_v47 }
  0xfc   :  { %3468 = vmatmul.msk.f32.gmra.mxu2 %vm282_vm0, %v4482_v43  ;;  %v1017_v29 = vpop.f32.mrf.mxu3 }
  0xfd   :  { %3564 = vmatmul.msk.f32.gmra.mxu1 %vm282_vm0, %v4482_v43  ;;  %v5032_v1 = vadd.f32 %v1017_v29, %v4774_v53 }
  0xfe   :  { %3732 = vmatpush.xpose.msk.msrb.mxu3 %vm282_vm0, %v228_v50  ;;  %2127 = vmatpush.xpose.msrb.mxu1 %v2060_v31  ;;  %v210_v31 = vld [vmem:[%s7147_s3 + $0x530] sm:$0xff] }
  0xff   :  { %v1082_v33 = vpop.f32.mrf.mxu2  ;;  %v5038_v40 = vpop.f32.mrf.mxu0  ;;  %3701 = vmatpush.xpose.msk.msrb.mxu2 %vm282_vm0, %v211_v26  ;;  %v226_v26 = vld [vmem:[%s7147_s3 + $0x5b0] sm:$0xff] }
 0x100   :  { %v5036_v39 = vadd.f32 %v1082_v33, %v4779_v56 }
 0x101   :  { %3613 = vmatmul.msk.f32.vlgmr.msra.gmra.mxu3 %vm282_vm0, %v4127_v34 }
 0x102   :  { %7160 = vst [vmem:[#allocation14_spill] sm:$0xff] %v5036_v39  ;;  %v5040_v41 = vpop.f32.mrf.mxu1  ;;  %3645 = vmatmul.msk.f32.vlgmr.msra.gmra.mxu0 %vm282_vm0, %v4127_v34  ;;  %3733 = vmatpush.xpose.msk.msrb.mxu3 %vm282_vm0, %v227_v27  ;;  %v243_v27 = vld [vmem:[%s7147_s3 + $0x638] sm:$0xff]  ;;  %v2034_v39 = vld [vmem:[%s7149_s5 + $0xd0] sm:$0xff] }
 0x103   :  { %7161 = vst [vmem:[#allocation15_spill] sm:$0xff] %v5040_v41  ;;  %3702 = vmatpush.xpose.msk.msrb.mxu2 %vm282_vm0, %v210_v31  ;;  %3765 = vmatpush.xpose.msk.msrb.mxu0 %vm282_vm0, %v243_v27  ;;  %v209_v31 = vld [vmem:[%s7147_s3 + $0x528] sm:$0xff] }
 0x104   :  { %3581 = vmatmul.msk.f32.vlgmr.msra.gmra.mxu2 %vm282_vm0, %v4127_v34  ;;  %v5062_v59 = vpop.f32.mrf.mxu3 }
 0x105   :  { %3677 = vmatmul.msk.f32.vlgmr.msra.gmra.mxu1 %vm282_vm0, %v4127_v34 }
 0x106   :  { %3734 = vmatpush.xpose.msk.msrb.mxu3 %vm282_vm0, %v226_v26  ;;  %v225_v26 = vld [vmem:[%s7147_s3 + $0x5a8] sm:$0xff] }
 0x107   :  { %v5066_v60 = vpop.f32.mrf.mxu2  ;;  %v5069_v34 = vpop.f32.mrf.mxu0  ;;  %3703 = vmatpush.xpose.msk.msrb.mxu2 %vm282_vm0, %v209_v31  ;;  %v208_v31 = vld [vmem:[%s7147_s3 + $0x520] sm:$0xff] }
 0x109   :  { %3614 = vmatmul.msk.f32.gmra.mxu3 %vm282_vm0, %v4177_v44 }
 0x10a   :  { %v5071_v35 = vpop.f32.mrf.mxu1  ;;  %3646 = vmatmul.msk.f32.gmra.mxu0 %vm282_vm0, %v4177_v44  ;;  %3735 = vmatpush.xpose.msk.msrb.mxu3 %vm282_vm0, %v225_v26  ;;  %v224_v26 = vld [vmem:[%s7147_s3 + $0x5a0] sm:$0xff] }
 0x10b   :  { %7162 = vst [vmem:[#allocation16_spill] sm:$0xff] %v5071_v35  ;;  %3704 = vmatpush.xpose.msk.msrb.mxu2 %vm282_vm0, %v208_v31  ;;  %v207_v31 = vld [vmem:[%s7147_s3 + $0x518] sm:$0xff] }
 0x10c   :  { %3582 = vmatmul.msk.f32.gmra.mxu2 %vm282_vm0, %v4177_v44  ;;  %v5090_v14 = vpop.f32.mrf.mxu3 }
 0x10d   :  { %3678 = vmatmul.msk.f32.gmra.mxu1 %vm282_vm0, %v4177_v44 }
 0x10e   :  { %3736 = vmatpush.xpose.msk.msrb.mxu3 %vm282_vm0, %v224_v26  ;;  %v223_v26 = vld [vmem:[%s7147_s3 + $0x598] sm:$0xff] }
 0x10f   :  { %v5094_v15 = vpop.f32.mrf.mxu2  ;;  %v5097_v44 = vpop.f32.mrf.mxu0  ;;  %3705 = vmatpush.xpose.msk.msrb.mxu2 %vm282_vm0, %v207_v31  ;;  %v206_v31 = vld [vmem:[%s7147_s3 + $0x510] sm:$0xff] }
 0x111   :  { %3615 = vmatmul.msk.f32.gmra.mxu3 %vm282_vm0, %v4227_v54 }
 0x112   :  { %v5099_v16 = vpop.f32.mrf.mxu1  ;;  %3647 = vmatmul.msk.f32.gmra.mxu0 %vm282_vm0, %v4227_v54  ;;  %3737 = vmatpush.xpose.msk.msrb.mxu3 %vm282_vm0, %v223_v26  ;;  %v222_v26 = vld [vmem:[%s7147_s3 + $0x590] sm:$0xff] }
 0x113   :  { %7163 = vst [vmem:[#allocation17_spill] sm:$0xff] %v5099_v16  ;;  %3706 = vmatpush.xpose.msk.msrb.mxu2 %vm282_vm0, %v206_v31  ;;  %v205_v31 = vld [vmem:[%s7147_s3 + $0x508] sm:$0xff] }
 0x114   :  { %3583 = vmatmul.msk.f32.gmra.mxu2 %vm282_vm0, %v4227_v54  ;;  %v5121_v29 = vpop.f32.mrf.mxu3 }
 0x115   :  { %3679 = vmatmul.msk.f32.gmra.mxu1 %vm282_vm0, %v4227_v54 }
 0x116   :  { %3738 = vmatpush.xpose.msk.msrb.mxu3 %vm282_vm0, %v222_v26  ;;  %v221_v26 = vld [vmem:[%s7147_s3 + $0x588] sm:$0xff] }
 0x117   :  { %v5125_v33 = vpop.f32.mrf.mxu2  ;;  %v5128_v54 = vpop.f32.mrf.mxu0  ;;  %3707 = vmatpush.xpose.msk.msrb.mxu2 %vm282_vm0, %v205_v31  ;;  %v204_v31 = vld [vmem:[%s7147_s3 + $0x500] sm:$0xff] }
 0x119   :  { %3616 = vmatmul.msk.f32.gmra.mxu3 %vm282_vm0, %v4277_v0 }
 0x11a   :  { %v5130_v46 = vpop.f32.mrf.mxu1  ;;  %3648 = vmatmul.msk.f32.gmra.mxu0 %vm282_vm0, %v4277_v0  ;;  %3739 = vmatpush.xpose.msk.msrb.mxu3 %vm282_vm0, %v221_v26  ;;  %v237_v26 = vld [vmem:[%s7147_s3 + $0x608] sm:$0xff] }
 0x11b   :  { %7164 = vst [vmem:[#allocation18_spill] sm:$0xff] %v5130_v46  ;;  %v2047_v46 = vld [vmem:[%s7149_s5 + $0x138] sm:$0xff]  ;;  %3708 = vmatpush.xpose.msk.msrb.mxu2 %vm282_vm0, %v204_v31  ;;  %v5426_v31 = vld [vmem:[%s7146_s2 + $0x60] sm:$0xff] }
 0x11c   :  { %3584 = vmatmul.msk.f32.gmra.mxu2 %vm282_vm0, %v4277_v0  ;;  %v5149_v21 = vpop.f32.mrf.mxu3  ;;  %2128 = vmatpush.xpose.msrb.mxu1 %v2047_v46  ;;  %v242_v46 = vld [vmem:[%s7147_s3 + $0x630] sm:$0xff] }
 0x11d   :  { %3680 = vmatmul.msk.f32.gmra.mxu1 %vm282_vm0, %v4277_v0  ;;  %3766 = vmatpush.xpose.msk.msrb.mxu0 %vm282_vm0, %v242_v46  ;;  %v241_v46 = vld [vmem:[%s7147_s3 + $0x628] sm:$0xff] }
 0x11f   :  { %v5153_v7 = vpop.f32.mrf.mxu2  ;;  %v5156_v0 = vpop.f32.mrf.mxu0 }
 0x120   :  { %2129 = vmatpush.xpose.msrb.mxu1 %v2034_v39  ;;  %v240_v39 = vld [vmem:[%s7147_s3 + $0x620] sm:$0xff] }
 0x121   :  { %3617 = vmatmul.msk.f32.gmra.mxu3 %vm282_vm0, %v4327_v10  ;;  %3767 = vmatpush.xpose.msk.msrb.mxu0 %vm282_vm0, %v241_v46 }
 0x122   :  { %v5158_v45 = vpop.f32.mrf.mxu1  ;;  %3649 = vmatmul.msk.f32.gmra.mxu0 %vm282_vm0, %v4327_v10 }
 0x123   :  { %7165 = vst [vmem:[#allocation19_spill] sm:$0xff] %v5158_v45 }
 0x124   :  { %3585 = vmatmul.msk.f32.gmra.mxu2 %vm282_vm0, %v4327_v10  ;;  %v5180_v47 = vpop.f32.mrf.mxu3  ;;  %2130 = vmatpush.xpose.msrb.mxu1 %v2021_v62  ;;  %v238_v62 = vld [vmem:[%s7147_s3 + $0x610] sm:$0xff] }
 0x125   :  { %3681 = vmatmul.msk.f32.gmra.mxu1 %vm282_vm0, %v4327_v10  ;;  %3768 = vmatpush.xpose.msk.msrb.mxu0 %vm282_vm0, %v240_v39  ;;  %v239_v39 = vld [vmem:[%s7147_s3 + $0x618] sm:$0xff] }
 0x127   :  { %v5184_v50 = vpop.f32.mrf.mxu2  ;;  %v5187_v10 = vpop.f32.mrf.mxu0 }
 0x129   :  { %3618 = vmatmul.msk.f32.gmra.mxu3 %vm282_vm0, %v4377_v20  ;;  %3769 = vmatpush.xpose.msk.msrb.mxu0 %vm282_vm0, %v239_v39 }
 0x12a   :  { %v5189_v58 = vpop.f32.mrf.mxu1  ;;  %3650 = vmatmul.msk.f32.gmra.mxu0 %vm282_vm0, %v4377_v20 }
 0x12b   :  { %7166 = vst [vmem:[#allocation20_spill] sm:$0xff] %v5189_v58 }
 0x12c   :  { %3586 = vmatmul.msk.f32.gmra.mxu2 %vm282_vm0, %v4377_v20  ;;  %v5208_v28 = vpop.f32.mrf.mxu3 }
 0x12d   :  { %3682 = vmatmul.msk.f32.gmra.mxu1 %vm282_vm0, %v4377_v20  ;;  %3770 = vmatpush.xpose.msk.msrb.mxu0 %vm282_vm0, %v238_v62  ;;  %v220_v62 = vld [vmem:[%s7147_s3 + $0x580] sm:$0xff] }
 0x12e   :  { %3740 = vmatpush.xpose.msk.msrb.mxu3 %vm282_vm0, %v220_v62 }
 0x12f   :  { %v5212_v58 = vpop.f32.mrf.mxu2  ;;  %v5215_v20 = vpop.f32.mrf.mxu0 }
 0x131   :  { %3619 = vmatmul.msk.f32.gmra.mxu3 %vm282_vm0, %v4427_v30  ;;  %3771 = vmatpush.xpose.msk.msrb.mxu0 %vm282_vm0, %v237_v26 }
 0x132   :  { %v5217_v45 = vpop.f32.mrf.mxu1  ;;  %3651 = vmatmul.msk.f32.gmra.mxu0 %vm282_vm0, %v4427_v30 }
 0x133   :  { %7167 = vst [vmem:[#allocation21_spill] sm:$0xff] %v5217_v45 }
 0x134   :  { %3587 = vmatmul.msk.f32.gmra.mxu2 %vm282_vm0, %v4427_v30  ;;  %v5239_v27 = vpop.f32.mrf.mxu3 }
 0x135   :  { %3683 = vmatmul.msk.f32.gmra.mxu1 %vm282_vm0, %v4427_v30 }
 0x137   :  { %v5243_v45 = vpop.f32.mrf.mxu2  ;;  %v5246_v30 = vpop.f32.mrf.mxu0 }
 0x138   :  { %7168 = vst [vmem:[#allocation22_spill] sm:$0xff] %v5246_v30  ;;  %v5511_v30 = vld [vmem:[%s7146_s2 + $0x78] sm:$0xff] }
 0x139   :  { %3620 = vmatmul.msk.f32.gmra.mxu3 %vm282_vm0, %v4477_v42 }
 0x13a   :  { %v5248_v16 = vpop.f32.mrf.mxu1  ;;  %3652 = vmatmul.msk.f32.gmra.mxu0 %vm282_vm0, %v4477_v42 }
 0x13b   :  { %7169 = vst [vmem:[#allocation23_spill] sm:$0xff] %v5248_v16 }
 0x13c   :  { %3588 = vmatmul.msk.f32.gmra.mxu2 %vm282_vm0, %v4477_v42  ;;  %v5267_v16 = vpop.f32.mrf.mxu3 }
 0x13d   :  { %3684 = vmatmul.msk.f32.gmra.mxu1 %vm282_vm0, %v4477_v42  ;;  %7170 = vst [vmem:[#allocation24_spill] sm:$0xff] %v5267_v16 }
 0x13f   :  { %v5271_v35 = vpop.f32.mrf.mxu2  ;;  %v5274_v42 = vpop.f32.mrf.mxu0 }
 0x140   :  { %7171 = vst [vmem:[#allocation25_spill] sm:$0xff] %v5274_v42  ;;  %v5386_v42 = vld [vmem:[%s7146_s2 + $0x58] sm:$0xff] }
 0x141   :  { %3621 = vmatmul.msk.f32.gmra.mxu3 %vm282_vm0, %v5284_v18 }
 0x142   :  { %v5276_v41 = vpop.f32.mrf.mxu1  ;;  %3653 = vmatmul.msk.f32.gmra.mxu0 %vm282_vm0, %v5284_v18 }
 0x143   :  { %7172 = vst [vmem:[#allocation26_spill] sm:$0xff] %v5276_v41 }
 0x144   :  { %3589 = vmatmul.msk.f32.gmra.mxu2 %vm282_vm0, %v5284_v18  ;;  %v5303_v46 = vpop.f32.mrf.mxu3 }
 0x145   :  { %3685 = vmatmul.msk.f32.gmra.mxu1 %vm282_vm0, %v5284_v18  ;;  %7173 = vst [vmem:[#allocation27_spill] sm:$0xff] %v5303_v46  ;;  %v236_v46 = vld [vmem:[%s7147_s3 + $0x600] sm:$0xff] }
 0x146   :  { %3772 = vmatpush.xpose.msk.msrb.mxu0 %vm282_vm0, %v236_v46  ;;  %v2101_v46 = vld [vmem:[%s7149_s5 + $0x2e8] sm:$0xff] }
 0x147   :  { %v5307_v41 = vpop.f32.mrf.mxu2  ;;  %v5310_v4 = vpop.f32.mrf.mxu0  ;;  %2254 = vmatpush.xpose.msra.mxu3 %v2101_v46 }
 0x148   :  { %7174 = vst [vmem:[#allocation28_spill] sm:$0xff] %v5307_v41 }
 0x149   :  { %7175 = vst [vmem:[#allocation29_spill] sm:$0xff] %v5310_v4  ;;  %3622 = vmatmul.msk.f32.gmra.mxu3 %vm282_vm0, %v5317_v36 }
 0x14a   :  { %v5312_v52 = vpop.f32.mrf.mxu1  ;;  %3654 = vmatmul.msk.f32.gmra.mxu0 %vm282_vm0, %v5317_v36 }
 0x14b   :  { %7176 = vst [vmem:[#allocation30_spill] sm:$0xff] %v5312_v52 }
 0x14c   :  { %3590 = vmatmul.msk.f32.gmra.mxu2 %vm282_vm0, %v5317_v36  ;;  %v5336_v52 = vpop.f32.mrf.mxu3 }
 0x14d   :  { %3686 = vmatmul.msk.f32.gmra.mxu1 %vm282_vm0, %v5317_v36  ;;  %7177 = vst [vmem:[#allocation31_spill] sm:$0xff] %v5336_v52  ;;  %v5353_v52 = vld [vmem:[%s7146_s2 + $0x50] sm:$0xff] }
 0x14f   :  { %v5340_v22 = vpop.f32.mrf.mxu2  ;;  %v5343_v9 = vpop.f32.mrf.mxu0 }
 0x150   :  { %7178 = vst [vmem:[#allocation32_spill] sm:$0xff] %v5340_v22 }
 0x151   :  { %7179 = vst [vmem:[#allocation33_spill] sm:$0xff] %v5343_v9  ;;  %3623 = vmatmul.msk.f32.gmra.mxu3 %vm282_vm0, %v5353_v52 }
 0x152   :  { %v5345_v4 = vpop.f32.mrf.mxu1  ;;  %3655 = vmatmul.msk.f32.gmra.mxu0 %vm282_vm0, %v5353_v52 }
 0x153   :  { %7180 = vst [vmem:[#allocation34_spill] sm:$0xff] %v5345_v4 }
 0x154   :  { %3591 = vmatmul.msk.f32.gmra.mxu2 %vm282_vm0, %v5353_v52  ;;  %v5372_v39 = vpop.f32.mrf.mxu3 }
 0x155   :  { %3687 = vmatmul.msk.f32.gmra.mxu1 %vm282_vm0, %v5353_v52  ;;  %7181 = vst [vmem:[#allocation35_spill] sm:$0xff] %v5372_v39 }
 0x157   :  { %v5376_v4 = vpop.f32.mrf.mxu2  ;;  %v5379_v9 = vpop.f32.mrf.mxu0 }
 0x158   :  { %7182 = vst [vmem:[#allocation36_spill] sm:$0xff] %v5376_v4  ;;  %v2008_v4 = vld [vmem:[%s7149_s5] sm:$0xff] }
 0x159   :  { %7183 = vst [vmem:[#allocation37_spill] sm:$0xff] %v5379_v9  ;;  %3624 = vmatmul.msk.f32.gmra.mxu3 %vm282_vm0, %v5386_v42  ;;  %2131 = vmatpush.xpose.msrb.mxu1 %v2008_v4  ;;  %v2100_v4 = vld [vmem:[%s7149_s5 + $0x2e0] sm:$0xff] }
 0x15a   :  { %v5381_v22 = vpop.f32.mrf.mxu1  ;;  %3656 = vmatmul.msk.f32.gmra.mxu0 %vm282_vm0, %v5386_v42  ;;  %2189 = vmatpush.xpose.msra.mxu2 %v2100_v4  ;;  %v2102_v4 = vld [vmem:[%s7149_s5 + $0x2f0] sm:$0xff] }
 0x15b   :  { %7184 = vst [vmem:[#allocation38_spill] sm:$0xff] %v5381_v22  ;;  %2319 = vmatpush.xpose.msra.mxu0 %v2102_v4  ;;  %v2087_v4 = vld [vmem:[%s7149_s5 + $0x278] sm:$0xff] }
 0x15c   :  { %3592 = vmatmul.msk.f32.gmra.mxu2 %vm282_vm0, %v5386_v42  ;;  %v5405_v22 = vpop.f32.mrf.mxu3 }
 0x15d   :  { %3688 = vmatmul.msk.f32.gmra.mxu1 %vm282_vm0, %v5386_v42  ;;  %7185 = vst [vmem:[#allocation39_spill] sm:$0xff] %v5405_v22  ;;  %v5453_v22 = vld [vmem:[%s7146_s2 + $0x68] sm:$0xff] }
 0x15e   :  { %2190 = vmatpush.xpose.msra.mxu2 %v2087_v4 }
 0x15f   :  { %v5409_v9 = vpop.f32.mrf.mxu2  ;;  %v5412_v39 = vpop.f32.mrf.mxu0 }
 0x160   :  { %7186 = vst [vmem:[#allocation40_spill] sm:$0xff] %v5409_v9  ;;  %v5480_v9 = vld [vmem:[%s7146_s2 + $0x70] sm:$0xff] }
 0x161   :  { %7187 = vst [vmem:[#allocation41_spill] sm:$0xff] %v5412_v39  ;;  %3625 = vmatmul.msk.f32.gmra.mxu3 %vm282_vm0, %v5426_v31 }
 0x162   :  { %v5420_v41 = vpop.f32.mrf.mxu1  ;;  %3657 = vmatmul.msk.f32.gmra.mxu0 %vm282_vm0, %v5426_v31 }
 0x163   :  { %7188 = vst [vmem:[#allocation42_spill] sm:$0xff] %v5420_v41 }
 0x164   :  { %3593 = vmatmul.msk.f32.gmra.mxu2 %vm282_vm0, %v5426_v31  ;;  %v5442_v26 = vpop.f32.mrf.mxu3 }
 0x165   :  { %3689 = vmatmul.msk.f32.gmra.mxu1 %vm282_vm0, %v5426_v31  ;;  %7189 = vst [vmem:[#allocation43_spill] sm:$0xff] %v5442_v26 }
 0x167   :  { %v5444_v62 = vpop.f32.mrf.mxu2  ;;  %v5446_v41 = vpop.f32.mrf.mxu0 }
 0x168   :  { %7190 = vst [vmem:[#allocation44_spill] sm:$0xff] %v5444_v62  ;;  %v2103_v62 = vld [vmem:[%s7149_s5 + $0x2f8] sm:$0xff] }
 0x169   :  { %7191 = vst [vmem:[#allocation45_spill] sm:$0xff] %v5446_v41  ;;  %3626 = vmatmul.msk.f32.gmra.mxu3 %vm282_vm0, %v5453_v22  ;;  %2384 = vmatpush.xpose.msra.mxu1 %v2103_v62 }
 0x16a   :  { %v5448_v39 = vpop.f32.mrf.mxu1  ;;  %3658 = vmatmul.msk.f32.gmra.mxu0 %vm282_vm0, %v5453_v22 }
 0x16b   :  { %7192 = vst [vmem:[#allocation46_spill] sm:$0xff] %v5448_v39 }
 0x16c   :  { %3594 = vmatmul.msk.f32.gmra.mxu2 %vm282_vm0, %v5453_v22  ;;  %v5466_v46 = vpop.f32.mrf.mxu3 }
 0x16d   :  { %3690 = vmatmul.msk.f32.gmra.mxu1 %vm282_vm0, %v5453_v22  ;;  %7193 = vst [vmem:[#allocation47_spill] sm:$0xff] %v5466_v46 }
 0x16f   :  { %v5468_v39 = vpop.f32.mrf.mxu2  ;;  %v5470_v41 = vpop.f32.mrf.mxu0 }
 0x170   :  { %7194 = vst [vmem:[#allocation48_spill] sm:$0xff] %v5468_v39 }
 0x171   :  { %7195 = vst [vmem:[#allocation49_spill] sm:$0xff] %v5470_v41  ;;  %3627 = vmatmul.msk.f32.gmra.mxu3 %vm282_vm0, %v5480_v9 }
 0x172   :  { %v5472_v26 = vpop.f32.mrf.mxu1  ;;  %3659 = vmatmul.msk.f32.gmra.mxu0 %vm282_vm0, %v5480_v9 }
 0x173   :  { %7196 = vst [vmem:[#allocation50_spill] sm:$0xff] %v5472_v26  ;;  %v2088_v26 = vld [vmem:[%s7149_s5 + $0x280] sm:$0xff] }
 0x174   :  { %3595 = vmatmul.msk.f32.gmra.mxu2 %vm282_vm0, %v5480_v9  ;;  %v5496_v41 = vpop.f32.mrf.mxu3  ;;  %2255 = vmatpush.xpose.msra.mxu3 %v2088_v26  ;;  %v2089_v26 = vld [vmem:[%s7149_s5 + $0x288] sm:$0xff] }
 0x175   :  { %3691 = vmatmul.msk.f32.gmra.mxu1 %vm282_vm0, %v5480_v9  ;;  %7197 = vst [vmem:[#allocation51_spill] sm:$0xff] %v5496_v41  ;;  %2320 = vmatpush.xpose.msra.mxu0 %v2089_v26  ;;  %v2075_v26 = vld [vmem:[%s7149_s5 + $0x218] sm:$0xff] }
 0x177   :  { %v5498_v62 = vpop.f32.mrf.mxu2  ;;  %v5500_v46 = vpop.f32.mrf.mxu0 }
 0x178   :  { %7198 = vst [vmem:[#allocation52_spill] sm:$0xff] %v5498_v62  ;;  %v2090_v62 = vld [vmem:[%s7149_s5 + $0x290] sm:$0xff]  ;;  %2256 = vmatpush.xpose.msra.mxu3 %v2075_v26  ;;  %v979_v26 = vadd.f32 %v4839_v12, %v4774_v53  ;;  %v2061_v12 = vld [vmem:[%s7149_s5 + $0x1a8] sm:$0xff] }
 0x179   :  { %7199 = vst [vmem:[#allocation53_spill] sm:$0xff] %v5500_v46  ;;  %3628 = vmatmul.msk.f32.gmra.mxu3 %vm282_vm0, %v4482_v43  ;;  %2385 = vmatpush.xpose.msra.mxu1 %v2090_v62  ;;  %v976_v62 = vadd.f32 %v4805_v63, %v4774_v53  ;;  %v2076_v63 = vld [vmem:[%s7149_s5 + $0x220] sm:$0xff] }
 0x17a   :  { %v5502_v39 = vpop.f32.mrf.mxu1  ;;  %3660 = vmatmul.msk.f32.gmra.mxu0 %vm282_vm0, %v5511_v30 }
 0x17b   :  { %7200 = vst [vmem:[#allocation54_spill] sm:$0xff] %v5502_v39  ;;  %2321 = vmatpush.xpose.msra.mxu0 %v2076_v63  ;;  %v2062_v63 = vld [vmem:[%s7149_s5 + $0x1b0] sm:$0xff] }
 0x17c   :  { %3596 = vmatmul.msk.f32.gmra.mxu2 %vm282_vm0, %v4482_v43  ;;  %v5520_v4 = vpop.f32.mrf.mxu3  ;;  %v973_v43 = vadd.f32 %v4764_v49, %v4774_v53  ;;  %v2074_v49 = vld [vmem:[%s7149_s5 + $0x210] sm:$0xff]  ;;  %2257 = vmatpush.xpose.msra.mxu3 %v2062_v63  ;;  %v985_v63 = vadd.f32 %v4911_v37, %v4774_v53  ;;  %v2048_v37 = vld [vmem:[%s7149_s5 + $0x140] sm:$0xff] }
 0x17d   :  { %3692 = vmatmul.msk.f32.gmra.mxu1 %vm282_vm0, %v5511_v30  ;;  %7201 = vst [vmem:[#allocation55_spill] sm:$0xff] %v5520_v4  ;;  %2191 = vmatpush.xpose.msra.mxu2 %v2074_v49  ;;  %v3885_v4 = vld [vmem:[%s7146_s2 + $0x8] sm:$0xff] }
 0x17e   :  { %v1800_v16 = vmax.f32 %v973_v43, 0.0 }
 0x17f   :  { %v5524_v39 = vpop.f32.mrf.mxu2  ;;  %v5526_v46 = vpop.f32.mrf.mxu0 }
 0x180   :  { %7202 = vst [vmem:[#allocation56_spill] sm:$0xff] %v5526_v46 }
 0x181   :  { %3741 = vmatmul.msk.f32.vlgmr.msrb.gmra.mxu3 %vm282_vm0, %v3884_v25  ;;  %2192 = vmatpush.xpose.msra.mxu2 %v2061_v12 }
 0x182   :  { %v5528_v41 = vpop.f32.mrf.mxu1  ;;  %3773 = vmatmul.msk.f32.vlgmr.msrb.gmra.mxu0 %vm282_vm0, %v3884_v25 }
 0x183   :  { %7203 = vst [vmem:[#allocation57_spill] sm:$0xff] %v5528_v41 }
 0x184   :  { %3709 = vmatmul.msk.f32.vlgmr.msrb.gmra.mxu2 %vm282_vm0, %v3884_v25  ;;  %v5545_v43 = vpop.f32.mrf.mxu3 }
 0x185   :  { %2132 = vmatmul.f32.vlgmr.msrb.gmra.mxu1 %v1800_v16  ;;  %7204 = vst [vmem:[#allocation58_spill] sm:$0xff] %v5545_v43  ;;  %v1813_v16 = vmax.f32 %v976_v62, 0.0  ;;  %v3886_v43 = vld [vmem:[%s7146_s2 + $0x10] sm:$0xff]  ;;  %2193 = vmatpush.xpose.msra.mxu2 %v2048_v37 }
 0x187   :  { %v5549_v41 = vpop.f32.mrf.mxu2  ;;  %v5551_v46 = vpop.f32.mrf.mxu0 }
 0x188   :  { %7205 = vst [vmem:[#allocation59_spill] sm:$0xff] %v5551_v46 }
 0x189   :  { %3742 = vmatmul.msk.f32.gmra.mxu3 %vm282_vm0, %v3885_v4 }
 0x18a   :  { %v5553_v25 = vpop.f32.mrf.mxu1  ;;  %3774 = vmatmul.msk.f32.gmra.mxu0 %vm282_vm0, %v3885_v4 }
 0x18b   :  { %7206 = vst [vmem:[#allocation60_spill] sm:$0xff] %v5553_v25 }
 0x18c   :  { %3710 = vmatmul.msk.f32.gmra.mxu2 %vm282_vm0, %v3885_v4  ;;  %v5564_v49 = vpop.f32.mrf.mxu3  ;;  %v2077_v4 = vld [vmem:[%s7149_s5 + $0x228] sm:$0xff] }
 0x18d   :  { %2135 = vmatmul.f32.gmra.mxu1 %v1813_v16  ;;  %7207 = vst [vmem:[#allocation61_spill] sm:$0xff] %v5564_v49  ;;  %v1826_v16 = vmax.f32 %v979_v26, 0.0  ;;  %v3887_v49 = vld [vmem:[%s7146_s2 + $0x18] sm:$0xff] }
 0x18e   :  { %2386 = vmatpush.xpose.msra.mxu1 %v2077_v4  ;;  %v982_v4 = vadd.f32 %v4873_v23, %v4774_v53  ;;  %v2063_v23 = vld [vmem:[%s7149_s5 + $0x1b8] sm:$0xff] }
 0x18f   :  { %v5568_v62 = vpop.f32.mrf.mxu2  ;;  %v5570_v25 = vpop.f32.mrf.mxu0  ;;  %2322 = vmatpush.xpose.msra.mxu0 %v2063_v23  ;;  %v2049_v23 = vld [vmem:[%s7149_s5 + $0x148] sm:$0xff] }
 0x190   :  { %7208 = vst [vmem:[#allocation62_spill] sm:$0xff] %v5570_v25  ;;  %2258 = vmatpush.xpose.msra.mxu3 %v2049_v23  ;;  %v991_v23 = vadd.f32 %v4975_v5, %v4774_v53  ;;  %v2035_v5 = vld [vmem:[%s7149_s5 + $0xd8] sm:$0xff] }
 0x191   :  { %3743 = vmatmul.msk.f32.gmra.mxu3 %vm282_vm0, %v3886_v43  ;;  %2194 = vmatpush.xpose.msra.mxu2 %v2035_v5 }
 0x192   :  { %v5572_v46 = vpop.f32.mrf.mxu1  ;;  %3775 = vmatmul.msk.f32.gmra.mxu0 %vm282_vm0, %v3886_v43 }
 0x193   :  { %7209 = vst [vmem:[#allocation63_spill] sm:$0xff] %v5572_v46 }
 0x194   :  { %3711 = vmatmul.msk.f32.gmra.mxu2 %vm282_vm0, %v3886_v43  ;;  %v5589_v26 = vpop.f32.mrf.mxu3 }
 0x195   :  { %2138 = vmatmul.f32.gmra.mxu1 %v1826_v16  ;;  %7210 = vst [vmem:[#allocation64_spill] sm:$0xff] %v5589_v26  ;;  %v1839_v16 = vmax.f32 %v982_v4, 0.0  ;;  %v3888_v26 = vld [vmem:[%s7146_s2 + $0x20] sm:$0xff] }
 0x197   :  { %v5593_v46 = vpop.f32.mrf.mxu2  ;;  %v5595_v25 = vpop.f32.mrf.mxu0 }
 0x198   :  { %7211 = vst [vmem:[#allocation65_spill] sm:$0xff] %v5595_v25 }
 0x199   :  { %3744 = vmatmul.msk.f32.gmra.mxu3 %vm282_vm0, %v3887_v49 }
 0x19a   :  { %v5597_v43 = vpop.f32.mrf.mxu1  ;;  %3776 = vmatmul.msk.f32.gmra.mxu0 %vm282_vm0, %v3887_v49 }
 0x19b   :  { %7212 = vst [vmem:[#allocation66_spill] sm:$0xff] %v5597_v43 }
 0x19c   :  { %3712 = vmatmul.msk.f32.gmra.mxu2 %vm282_vm0, %v3887_v49  ;;  %v5608_v12 = vpop.f32.mrf.mxu3  ;;  %v2064_v49 = vld [vmem:[%s7149_s5 + $0x1c0] sm:$0xff] }
 0x19d   :  { %2141 = vmatmul.f32.gmra.mxu1 %v1839_v16  ;;  %7213 = vst [vmem:[#allocation67_spill] sm:$0xff] %v5608_v12  ;;  %v1852_v16 = vmax.f32 %v985_v63, 0.0  ;;  %v3889_v12 = vld [vmem:[%s7146_s2 + $0x28] sm:$0xff] }
 0x19e   :  { %2387 = vmatpush.xpose.msra.mxu1 %v2064_v49  ;;  %v988_v49 = vadd.f32 %v4945_v11, %v4774_v53  ;;  %v2050_v11 = vld [vmem:[%s7149_s5 + $0x150] sm:$0xff] }
 0x19f   :  { %v5612_v4 = vpop.f32.mrf.mxu2  ;;  %v5614_v43 = vpop.f32.mrf.mxu0  ;;  %2323 = vmatpush.xpose.msra.mxu0 %v2050_v11  ;;  %v2036_v11 = vld [vmem:[%s7149_s5 + $0xe0] sm:$0xff] }
 0x1a0   :  { %7214 = vst [vmem:[#allocation68_spill] sm:$0xff] %v5614_v43  ;;  %2259 = vmatpush.xpose.msra.mxu3 %v2036_v11 }
 0x1a1   :  { %3745 = vmatmul.msk.f32.gmra.mxu3 %vm282_vm0, %v3888_v26 }
 0x1a2   :  { %v5616_v25 = vpop.f32.mrf.mxu1  ;;  %3777 = vmatmul.msk.f32.gmra.mxu0 %vm282_vm0, %v3888_v26 }
 0x1a3   :  { %7215 = vst [vmem:[#allocation69_spill] sm:$0xff] %v5616_v25 }
 0x1a4   :  { %3713 = vmatmul.msk.f32.gmra.mxu2 %vm282_vm0, %v3888_v26  ;;  %v5633_v63 = vpop.f32.mrf.mxu3 }
 0x1a5   :  { %2144 = vmatmul.f32.gmra.mxu1 %v1852_v16  ;;  %7216 = vst [vmem:[#allocation70_spill] sm:$0xff] %v5633_v63  ;;  %v1865_v16 = vmax.f32 %v988_v49, 0.0  ;;  %v3890_v63 = vld [vmem:[%s7146_s2 + $0x30] sm:$0xff] }
 0x1a7   :  { %v5637_v25 = vpop.f32.mrf.mxu2  ;;  %v5639_v43 = vpop.f32.mrf.mxu0 }
 0x1a8   :  { %7217 = vst [vmem:[#allocation71_spill] sm:$0xff] %v5639_v43 }
 0x1a9   :  { %3746 = vmatmul.msk.f32.gmra.mxu3 %vm282_vm0, %v3889_v12 }
 0x1aa   :  { %v5641_v26 = vpop.f32.mrf.mxu1  ;;  %3778 = vmatmul.msk.f32.gmra.mxu0 %vm282_vm0, %v3889_v12 }
 0x1ab   :  { %7218 = vst [vmem:[#allocation72_spill] sm:$0xff] %v5641_v26 }
 0x1ac   :  { %3714 = vmatmul.msk.f32.gmra.mxu2 %vm282_vm0, %v3889_v12  ;;  %v5652_v37 = vpop.f32.mrf.mxu3  ;;  %v2051_v12 = vld [vmem:[%s7149_s5 + $0x158] sm:$0xff] }
 0x1ad   :  { %2147 = vmatmul.f32.gmra.mxu1 %v1865_v16  ;;  %7219 = vst [vmem:[#allocation73_spill] sm:$0xff] %v5652_v37  ;;  %v1878_v16 = vmax.f32 %v991_v23, 0.0  ;;  %v3891_v37 = vld [vmem:[%s7146_s2 + $0x38] sm:$0xff] }
 0x1ae   :  { %2388 = vmatpush.xpose.msra.mxu1 %v2051_v12  ;;  %v994_v12 = vadd.f32 %v5008_v55, %v4774_v53  ;;  %v2037_v53 = vld [vmem:[%s7149_s5 + $0xe8] sm:$0xff] }
 0x1af   :  { %v5656_v49 = vpop.f32.mrf.mxu2  ;;  %v5658_v26 = vpop.f32.mrf.mxu0  ;;  %2324 = vmatpush.xpose.msra.mxu0 %v2037_v53  ;;  %v2023_v53 = vld [vmem:[%s7149_s5 + $0x78] sm:$0xff] }
 0x1b0   :  { %7220 = vst [vmem:[#allocation74_spill] sm:$0xff] %v5658_v26  ;;  %2260 = vmatpush.xpose.msra.mxu3 %v2023_v53 }
 0x1b1   :  { %3747 = vmatmul.msk.f32.gmra.mxu3 %vm282_vm0, %v3890_v63 }
 0x1b2   :  { %v5660_v43 = vpop.f32.mrf.mxu1  ;;  %3779 = vmatmul.msk.f32.gmra.mxu0 %vm282_vm0, %v3890_v63 }
 0x1b3   :  { %7221 = vst [vmem:[#allocation75_spill] sm:$0xff] %v5660_v43 }
 0x1b4   :  { %3715 = vmatmul.msk.f32.gmra.mxu2 %vm282_vm0, %v3890_v63  ;;  %v5677_v23 = vpop.f32.mrf.mxu3 }
 0x1b5   :  { %2150 = vmatmul.f32.gmra.mxu1 %v1878_v16  ;;  %v1891_v16 = vmax.f32 %v994_v12, 0.0 }
 0x1b7   :  { %v5681_v43 = vpop.f32.mrf.mxu2  ;;  %v5683_v26 = vpop.f32.mrf.mxu0 }
 0x1b9   :  { %3748 = vmatmul.msk.f32.gmra.mxu3 %vm282_vm0, %v3891_v37 }
 0x1ba   :  { %v5685_v63 = vpop.f32.mrf.mxu1  ;;  %3780 = vmatmul.msk.f32.gmra.mxu0 %vm282_vm0, %v3891_v37 }
 0x1bb   :  { %7222 = vst [vmem:[#allocation76_spill] sm:$0xff] %v5685_v63  ;;  %v2038_v63 = vld [vmem:[%s7149_s5 + $0xf0] sm:$0xff] }
 0x1bc   :  { %3716 = vmatmul.msk.f32.gmra.mxu2 %vm282_vm0, %v3891_v37  ;;  %v5696_v55 = vpop.f32.mrf.mxu3  ;;  %v1904_v37 = vmax.f32 %v4799_v61, 0.0  ;;  %2389 = vmatpush.xpose.msra.mxu1 %v2038_v63 }
 0x1bd   :  { %2153 = vmatmul.f32.gmra.mxu1 %v1891_v16  ;;  %v2022_v16 = vld [vmem:[%s7149_s5 + $0x70] sm:$0xff] }
 0x1be   :  { %2195 = vmatpush.xpose.msra.mxu2 %v2022_v16 }
 0x1bf   :  { %v5698_v5 = vpop.f32.mrf.mxu2  ;;  %v5700_v11 = vpop.f32.mrf.mxu0 }
 0x1c0   :  { %7223 = vst [vmem:[#allocation77_spill] sm:$0xff] %v5700_v11 }
 0x1c1   :  { %3749 = vmatmul.msk.f32.gmra.mxu3 %vm282_vm0, %v5284_v18 }
 0x1c2   :  { %v5702_v12 = vpop.f32.mrf.mxu1  ;;  %3781 = vmatmul.msk.f32.gmra.mxu0 %vm282_vm0, %v5284_v18 }
 0x1c3   :  { %7224 = vst [vmem:[#allocation78_spill] sm:$0xff] %v5702_v12 }
 0x1c4   :  { %3717 = vmatmul.msk.f32.gmra.mxu2 %vm282_vm0, %v5284_v18  ;;  %v5720_v61 = vpop.f32.mrf.mxu3  ;;  %v1917_v18 = vmax.f32 %v4833_v8, 0.0 }
 0x1c5   :  { %2156 = vmatmul.f32.gmra.mxu1 %v1904_v37  ;;  %v2024_v37 = vld [vmem:[%s7149_s5 + $0x80] sm:$0xff] }
 0x1c6   :  { %2325 = vmatpush.xpose.msra.mxu0 %v2024_v37  ;;  %v2010_v37 = vld [vmem:[%s7149_s5 + $0x10] sm:$0xff] }
 0x1c7   :  { %v5722_v63 = vpop.f32.mrf.mxu2  ;;  %v5724_v12 = vpop.f32.mrf.mxu0  ;;  %2261 = vmatpush.xpose.msra.mxu3 %v2010_v37 }
 0x1c8   :  { %7225 = vst [vmem:[#allocation79_spill] sm:$0xff] %v5724_v12  ;;  %v2025_v12 = vld [vmem:[%s7149_s5 + $0x88] sm:$0xff] }
 0x1c9   :  { %3750 = vmatmul.msk.f32.gmra.mxu3 %vm282_vm0, %v5317_v36  ;;  %2390 = vmatpush.xpose.msra.mxu1 %v2025_v12 }
 0x1ca   :  { %v5726_v11 = vpop.f32.mrf.mxu1  ;;  %3782 = vmatmul.msk.f32.gmra.mxu0 %vm282_vm0, %v5317_v36 }
 0x1cb   :  { %7226 = vst [vmem:[#allocation80_spill] sm:$0xff] %v5726_v11 }
 0x1cc   :  { %3718 = vmatmul.msk.f32.gmra.mxu2 %vm282_vm0, %v5317_v36  ;;  %v5738_v16 = vpop.f32.mrf.mxu3  ;;  %v1930_v36 = vmax.f32 %v4867_v19, 0.0 }
 0x1cd   :  { %2159 = vmatmul.f32.gmra.mxu1 %v1917_v18  ;;  %v2009_v18 = vld [vmem:[%s7149_s5 + $0x8] sm:$0xff] }
 0x1ce   :  { %2196 = vmatpush.xpose.msra.mxu2 %v2009_v18 }
 0x1cf   :  { %v5740_v53 = vpop.f32.mrf.mxu2  ;;  %v5742_v8 = vpop.f32.mrf.mxu0 }
 0x1d0   :  { %7227 = vst [vmem:[#allocation81_spill] sm:$0xff] %v5742_v8 }
 0x1d1   :  { %3751 = vmatmul.msk.f32.gmra.mxu3 %vm282_vm0, %v5353_v52 }
 0x1d2   :  { %v5744_v11 = vpop.f32.mrf.mxu1  ;;  %3783 = vmatmul.msk.f32.gmra.mxu0 %vm282_vm0, %v5353_v52 }
 0x1d3   :  { %7228 = vst [vmem:[#allocation82_spill] sm:$0xff] %v5744_v11 }
 0x1d4   :  { %3719 = vmatmul.msk.f32.gmra.mxu2 %vm282_vm0, %v5353_v52  ;;  %v5762_v19 = vpop.f32.mrf.mxu3  ;;  %v1943_v52 = vmax.f32 %v4904_v32, 0.0 }
 0x1d5   :  { %2162 = vmatmul.f32.gmra.mxu1 %v1930_v36  ;;  %v2011_v36 = vld [vmem:[%s7149_s5 + $0x18] sm:$0xff] }
 0x1d6   :  { %2326 = vmatpush.xpose.msra.mxu0 %v2011_v36 }
 0x1d7   :  { %v5764_v12 = vpop.f32.mrf.mxu2  ;;  %v5766_v11 = vpop.f32.mrf.mxu0 }
 0x1d8   :  { %7229 = vst [vmem:[#allocation83_spill] sm:$0xff] %v5766_v11 }
 0x1d9   :  { %3752 = vmatmul.msk.f32.gmra.mxu3 %vm282_vm0, %v5386_v42 }
 0x1da   :  { %v5768_v8 = vpop.f32.mrf.mxu1  ;;  %3784 = vmatmul.msk.f32.gmra.mxu0 %vm282_vm0, %v5386_v42 }
 0x1db   :  { %7230 = vst [vmem:[#allocation84_spill] sm:$0xff] %v5768_v8  ;;  %v2012_v8 = vld [vmem:[%s7149_s5 + $0x20] sm:$0xff] }
 0x1dc   :  { %3720 = vmatmul.msk.f32.gmra.mxu2 %vm282_vm0, %v5386_v42  ;;  %v5780_v18 = vpop.f32.mrf.mxu3  ;;  %2391 = vmatpush.xpose.msra.mxu1 %v2012_v8  ;;  %v1956_v42 = vmax.f32 %v4940_v48, 0.0  ;;  %v2105_v8 = vld [vmem:[%s7149_s5 + $0x308] sm:$0xff] }
 0x1dd   :  { %2165 = vmatmul.f32.gmra.mxu1 %v1943_v52  ;;  %7231 = vst [vmem:[#allocation85_spill] sm:$0xff] %v5780_v18  ;;  %v2104_v52 = vld [vmem:[%s7149_s5 + $0x300] sm:$0xff]  ;;  %2514 = vmatpush.xpose.msrb.mxu3 %v2105_v8 }
 0x1de   :  { %2449 = vmatpush.xpose.msrb.mxu2 %v2104_v52 }
 0x1df   :  { %v5782_v37 = vpop.f32.mrf.mxu2  ;;  %v5784_v32 = vpop.f32.mrf.mxu0 }
 0x1e0   :  { %7232 = vst [vmem:[#allocation86_spill] sm:$0xff] %v5784_v32 }
 0x1e1   :  { %3753 = vmatmul.msk.f32.gmra.mxu3 %vm282_vm0, %v5426_v31 }
 0x1e2   :  { %v5789_v11 = vpop.f32.mrf.mxu1  ;;  %3785 = vmatmul.msk.f32.gmra.mxu0 %vm282_vm0, %v5426_v31 }
 0x1e3   :  { %7233 = vst [vmem:[#allocation87_spill] sm:$0xff] %v5789_v11 }
 0x1e4   :  { %3721 = vmatmul.msk.f32.gmra.mxu2 %vm282_vm0, %v5426_v31  ;;  %v5804_v36 = vpop.f32.mrf.mxu3  ;;  %v1969_v31 = vmax.f32 %v4969_v3, 0.0 }
 0x1e5   :  { %2168 = vmatmul.f32.gmra.mxu1 %v1956_v42  ;;  %7234 = vst [vmem:[#allocation88_spill] sm:$0xff] %v5804_v36  ;;  %v2106_v42 = vld [vmem:[%s7149_s5 + $0x310] sm:$0xff] }
 0x1e6   :  { %2579 = vmatpush.xpose.msrb.mxu0 %v2106_v42  ;;  %v2092_v42 = vld [vmem:[%s7149_s5 + $0x2a0] sm:$0xff] }
 0x1e7   :  { %v5806_v48 = vpop.f32.mrf.mxu2  ;;  %v5808_v11 = vpop.f32.mrf.mxu0  ;;  %2515 = vmatpush.xpose.msrb.mxu3 %v2092_v42 }
 0x1e8   :  { %7235 = vst [vmem:[#allocation89_spill] sm:$0xff] %v5806_v48 }
 0x1e9   :  { %7236 = vst [vmem:[#allocation90_spill] sm:$0xff] %v5808_v11  ;;  %3754 = vmatmul.msk.f32.gmra.mxu3 %vm282_vm0, %v5453_v22  ;;  %v2107_v11 = vld [vmem:[%s7149_s5 + $0x318] sm:$0xff] }
 0x1ea   :  { %v5810_v32 = vpop.f32.mrf.mxu1  ;;  %3786 = vmatmul.msk.f32.gmra.mxu0 %vm282_vm0, %v5453_v22  ;;  %2644 = vmatpush.xpose.msrb.mxu1 %v2107_v11 }
 0x1eb   :  { %7237 = vst [vmem:[#allocation91_spill] sm:$0xff] %v5810_v32 }
 0x1ec   :  { %3722 = vmatmul.msk.f32.gmra.mxu2 %vm282_vm0, %v5453_v22  ;;  %v5822_v52 = vpop.f32.mrf.mxu3  ;;  %v1982_v22 = vmax.f32 %v5002_v17, 0.0 }
 0x1ed   :  { %2171 = vmatmul.f32.gmra.mxu1 %v1969_v31  ;;  %7238 = vst [vmem:[#allocation92_spill] sm:$0xff] %v5822_v52  ;;  %v2091_v31 = vld [vmem:[%s7149_s5 + $0x298] sm:$0xff] }
 0x1ee   :  { %2450 = vmatpush.xpose.msrb.mxu2 %v2091_v31  ;;  %v1995_v31 = vmax.f32 %v5032_v1, 0.0  ;;  %v2093_v1 = vld [vmem:[%s7149_s5 + $0x2a8] sm:$0xff] }
 0x1ef   :  { %v5824_v8 = vpop.f32.mrf.mxu2  ;;  %v5826_v3 = vpop.f32.mrf.mxu0  ;;  %2580 = vmatpush.xpose.msrb.mxu0 %v2093_v1 }
 0x1f0   :  { %7239 = vst [vmem:[#allocation93_spill] sm:$0xff] %v5824_v8 }
 0x1f1   :  { %7240 = vst [vmem:[#allocation94_spill] sm:$0xff] %v5826_v3  ;;  %3755 = vmatmul.msk.f32.gmra.mxu3 %vm282_vm0, %v5480_v9 }
 0x1f2   :  { %v5828_v32 = vpop.f32.mrf.mxu1  ;;  %3787 = vmatmul.msk.f32.gmra.mxu0 %vm282_vm0, %v5480_v9 }
 0x1f3   :  { %7241 = vst [vmem:[#allocation95_spill] sm:$0xff] %v5828_v32  ;;  %v5853_v32 = vld [vmem:[%s7148_s4] sm:$0xff] }
 0x1f4   :  { %3723 = vmatmul.msk.f32.gmra.mxu2 %vm282_vm0, %v5480_v9  ;;  %v5846_v17 = vpop.f32.mrf.mxu3  ;;  %v5856_v9 = vperm.slane %v5853_v32, 2  ;;  %v5861_v3 = vperm.slane %v5853_v32, 3  ;;  %v5867_v42 = vperm.slane %v5853_v32, 4 }
 0x1f5   :  { %2174 = vmatmul.f32.gmra.mxu1 %v1982_v22  ;;  %7242 = vst [vmem:[#allocation96_spill] sm:$0xff] %v5846_v17 }
 0x1f6   :  { %v1168_v17 = vadd.f32 %v5062_v59, %v5861_v3  ;;  %v1171_v1 = vadd.f32 %v5090_v14, %v5861_v3  ;;  %v1109_v14 = vadd.f32 %v5125_v33, %v5856_v9 }
 0x1f7   :  { %v5848_v11 = vpop.f32.mrf.mxu2  ;;  %v5858_v22 = vpop.f32.mrf.mxu0 }
 0x1f8   :  { %7243 = vst [vmem:[#allocation97_spill] sm:$0xff] %v5848_v11  ;;  %v1803_v48 = vmax.f32 %v1168_v17, 0.0  ;;  %v2079_v17 = vld [vmem:[%s7149_s5 + $0x238] sm:$0xff]  ;;  %v1828_v33 = vmax.f32 %v1109_v14, 0.0  ;;  %v2066_v14 = vld [vmem:[%s7149_s5 + $0x1d0] sm:$0xff] }
 0x1f9   :  { %7244 = vst [vmem:[#allocation98_spill] sm:$0xff] %v5858_v22  ;;  %3756 = vmatmul.msk.f32.gmra.mxu3 %vm282_vm0, %v5511_v30  ;;  %v1103_v22 = vadd.f32 %v5066_v60, %v5856_v9 }
 0x1fa   :  { %v5863_v52 = vpop.f32.mrf.mxu1  ;;  %3788 = vmatmul.msk.f32.gmra.mxu0 %vm282_vm0, %v5511_v30  ;;  %2516 = vmatpush.xpose.msrb.mxu3 %v2079_v17 }
 0x1fb   :  { %7245 = vst [vmem:[#allocation99_spill] sm:$0xff] %v5863_v52  ;;  %v1038_v52 = vadd.f32 %v4769_v51, %v4779_v56  ;;  %v1802_v60 = vmax.f32 %v1103_v22, 0.0  ;;  %v2094_v51 = vld [vmem:[%s7149_s5 + $0x2b0] sm:$0xff]  ;;  %v1041_v22 = vadd.f32 %v4807_v2, %v4779_v56 }
 0x1fc   :  { %3724 = vmatmul.msk.f32.gmra.mxu2 %vm282_vm0, %v5511_v30  ;;  %v5884_v11 = vpop.f32.mrf.mxu3  ;;  %v1233_v30 = vadd.f32 %v5038_v40, %v5867_v42  ;;  %2645 = vmatpush.xpose.msrb.mxu1 %v2094_v51  ;;  %v1106_v40 = vadd.f32 %v5094_v15, %v5856_v9  ;;  %v1236_v15 = vadd.f32 %v5069_v34, %v5867_v42  ;;  %v2080_v34 = vld [vmem:[%s7149_s5 + $0x240] sm:$0xff] }
 0x1fd   :  { %2177 = vmatmul.f32.gmra.mxu1 %v1995_v31  ;;  %v1801_v36 = vmax.f32 %v1038_v52, 0.0  ;;  %v2078_v52 = vld [vmem:[%s7149_s5 + $0x230] sm:$0xff]  ;;  %v1814_v51 = vmax.f32 %v1041_v22, 0.0  ;;  %2581 = vmatpush.xpose.msrb.mxu0 %v2080_v34  ;;  %v1239_v22 = vadd.f32 %v5097_v44, %v5867_v42  ;;  %v1112_v44 = vadd.f32 %v5153_v7, %v5856_v9 }
 0x1fe   :  { %v1804_v59 = vmax.f32 %v1233_v30, 0.0  ;;  %2451 = vmatpush.xpose.msrb.mxu2 %v2078_v52  ;;  %v1815_v30 = vmax.f32 %v1106_v40, 0.0  ;;  %v1817_v2 = vmax.f32 %v1236_v15, 0.0  ;;  %v1044_v40 = vadd.f32 %v4841_v13, %v4779_v56  ;;  %v2081_v13 = vld [vmem:[%s7149_s5 + $0x248] sm:$0xff]  ;;  %2517 = vmatpush.xpose.msrb.mxu3 %v2066_v14 }
 0x1ff   :  { %v5888_v8 = vpop.f32.mrf.mxu2  ;;  %v5890_v31 = vpop.f32.mrf.mxu0  ;;  %v1174_v52 = vadd.f32 %v5121_v29, %v5861_v3  ;;  %v1830_v29 = vmax.f32 %v1239_v22, 0.0  ;;  %v1047_v34 = vadd.f32 %v4875_v24, %v4779_v56  ;;  %v1242_v7 = vadd.f32 %v5128_v54, %v5867_v42  ;;  %v2067_v54 = vld [vmem:[%s7149_s5 + $0x1d8] sm:$0xff] }
 0x200   :  { %7246 = vst [vmem:[#allocation100_spill] sm:$0xff] %v5890_v31  ;;  %2646 = vmatpush.xpose.msrb.mxu1 %v2081_v13 }
 0x201   :  { %2262 = vmatmul.f32.vlgmr.msra.gmra.mxu3 %v1802_v60  ;;  %v1843_v24 = vmax.f32 %v1242_v7, 0.0  ;;  %2582 = vmatpush.xpose.msrb.mxu0 %v2067_v54  ;;  %v1053_v54 = vadd.f32 %v4947_v57, %v4779_v56 }
 0x202   :  { %v5892_v18 = vpop.f32.mrf.mxu1  ;;  %2327 = vmatmul.f32.vlgmr.msra.gmra.mxu0 %v1803_v48 }
 0x204   :  { %2197 = vmatmul.f32.vlgmr.msra.gmra.mxu2 %v1801_v36  ;;  %v5909_v36 = vpop.f32.mrf.mxu3 }
 0x205   :  { %2392 = vmatmul.f32.vlgmr.msra.gmra.mxu1 %v1804_v59  ;;  %v1816_v59 = vmax.f32 %v1171_v1, 0.0 }
 0x207   :  { %v5913_v48 = vpop.f32.mrf.mxu2  ;;  %v5915_v60 = vpop.f32.mrf.mxu0 }
 0x208   :  { %7247 = vst [vmem:[#allocation101_spill] sm:$0xff] %v5915_v60 }
 0x209   :  { %2265 = vmatmul.f32.gmra.mxu3 %v1815_v30  ;;  %v1827_v30 = vmax.f32 %v1044_v40, 0.0  ;;  %v1177_v40 = vadd.f32 %v5149_v21, %v5861_v3  ;;  %v1115_v21 = vadd.f32 %v5184_v50, %v5856_v9 }
 0x20a   :  { %v5917_v31 = vpop.f32.mrf.mxu1  ;;  %2330 = vmatmul.f32.gmra.mxu0 %v1816_v59 }
 0x20b   :  { %v1842_v13 = vmax.f32 %v1177_v40, 0.0  ;;  %v1854_v50 = vmax.f32 %v1115_v21, 0.0  ;;  %v2053_v21 = vld [vmem:[%s7149_s5 + $0x168] sm:$0xff] }
 0x20c   :  { %2200 = vmatmul.f32.gmra.mxu2 %v1814_v51  ;;  %v5928_v17 = vpop.f32.mrf.mxu3  ;;  %v1829_v51 = vmax.f32 %v1174_v52, 0.0  ;;  %2518 = vmatpush.xpose.msrb.mxu3 %v2053_v21 }
 0x20d   :  { %2395 = vmatmul.f32.gmra.mxu1 %v1817_v2  ;;  %7248 = vst [vmem:[#allocation102_spill] sm:$0xff] %v5928_v17  ;;  %v2065_v2 = vld [vmem:[%s7149_s5 + $0x1c8] sm:$0xff] }
 0x20e   :  { %2452 = vmatpush.xpose.msrb.mxu2 %v2065_v2  ;;  %v1180_v2 = vadd.f32 %v5180_v47, %v5861_v3 }
 0x20f   :  { %v5932_v1 = vpop.f32.mrf.mxu2  ;;  %v5934_v15 = vpop.f32.mrf.mxu0 }
 0x210   :  { %7249 = vst [vmem:[#allocation103_spill] sm:$0xff] %v5932_v1 }
 0x211   :  { %7250 = vst [vmem:[#allocation104_spill] sm:$0xff] %v5934_v15  ;;  %2268 = vmatmul.f32.gmra.mxu3 %v1828_v33  ;;  %v1841_v33 = vmax.f32 %v1112_v44, 0.0  ;;  %v1050_v44 = vadd.f32 %v4913_v38, %v4779_v56  ;;  %v2068_v38 = vld [vmem:[%s7149_s5 + $0x1e0] sm:$0xff] }
 0x212   :  { %v5936_v59 = vpop.f32.mrf.mxu1  ;;  %2333 = vmatmul.f32.gmra.mxu0 %v1829_v51  ;;  %v1840_v51 = vmax.f32 %v1047_v34, 0.0  ;;  %v1245_v34 = vadd.f32 %v5156_v0, %v5867_v42  ;;  %2647 = vmatpush.xpose.msrb.mxu1 %v2068_v38  ;;  %v1118_v0 = vadd.f32 %v5212_v58, %v5856_v9  ;;  %v1248_v58 = vadd.f32 %v5187_v10, %v5867_v42  ;;  %v2054_v10 = vld [vmem:[%s7149_s5 + $0x170] sm:$0xff] }
 0x213   :  { %2583 = vmatpush.xpose.msrb.mxu0 %v2054_v10  ;;  %v7263_v10 = vld [vmem:[#allocation13_spill] sm:$0xff] }
 0x214   :  { %2203 = vmatmul.f32.gmra.mxu2 %v1827_v30  ;;  %v5953_v52 = vpop.f32.mrf.mxu3  ;;  %v1856_v47 = vmax.f32 %v1245_v34, 0.0  ;;  %v1869_v57 = vmax.f32 %v1248_v58, 0.0 }
 0x215   :  { %2398 = vmatmul.f32.gmra.mxu1 %v1830_v29  ;;  %7251 = vst [vmem:[#allocation105_spill] sm:$0xff] %v5953_v52 }
 0x217   :  { %v5957_v22 = vpop.f32.mrf.mxu2  ;;  %v5959_v30 = vpop.f32.mrf.mxu0 }
 0x218   :  { %7252 = vst [vmem:[#allocation106_spill] sm:$0xff] %v5957_v22 }
 0x219   :  { %7253 = vst [vmem:[#allocation107_spill] sm:$0xff] %v5959_v30  ;;  %2271 = vmatmul.f32.gmra.mxu3 %v1841_v33  ;;  %v1853_v33 = vmax.f32 %v1050_v44, 0.0  ;;  %v1183_v44 = vadd.f32 %v5208_v28, %v5861_v3  ;;  %v1121_v28 = vadd.f32 %v5243_v45, %v5856_v9 }
 0x21a   :  { %v5961_v29 = vpop.f32.mrf.mxu1  ;;  %2336 = vmatmul.f32.gmra.mxu0 %v1842_v13 }
 0x21b   :  { %v1868_v38 = vmax.f32 %v1183_v44, 0.0  ;;  %v1880_v45 = vmax.f32 %v1121_v28, 0.0  ;;  %v2040_v28 = vld [vmem:[%s7149_s5 + $0x100] sm:$0xff] }
 0x21c   :  { %2206 = vmatmul.f32.gmra.mxu2 %v1840_v51  ;;  %v5972_v14 = vpop.f32.mrf.mxu3  ;;  %v1855_v51 = vmax.f32 %v1180_v2, 0.0  ;;  %2519 = vmatpush.xpose.msrb.mxu3 %v2040_v28  ;;  %v2041_v28 = vld [vmem:[%s7149_s5 + $0x108] sm:$0xff] }
 0x21d   :  { %2401 = vmatmul.f32.gmra.mxu1 %v1843_v24  ;;  %7254 = vst [vmem:[#allocation108_spill] sm:$0xff] %v5972_v14  ;;  %v2052_v24 = vld [vmem:[%s7149_s5 + $0x160] sm:$0xff]  ;;  %2584 = vmatpush.xpose.msrb.mxu0 %v2041_v28  ;;  %v7276_v28 = vld [vmem:[#allocation32_spill] sm:$0xff] }
 0x21e   :  { %2453 = vmatpush.xpose.msrb.mxu2 %v2052_v24  ;;  %v1186_v24 = vadd.f32 %v5239_v27, %v5861_v3  ;;  %v6254_v14 = vld [vmem:[%s7150_s6] ss:$0 sm:$0xff] }
 0x21f   :  { %v5976_v40 = vpop.f32.mrf.mxu2  ;;  %v5978_v7 = vpop.f32.mrf.mxu0 }
 0x220   :  { %7255 = vst [vmem:[#allocation109_spill] sm:$0xff] %v5976_v40 }
 0x221   :  { %7256 = vst [vmem:[#allocation110_spill] sm:$0xff] %v5978_v7  ;;  %2274 = vmatmul.f32.gmra.mxu3 %v1854_v50  ;;  %v1867_v50 = vmax.f32 %v1118_v0, 0.0  ;;  %v1056_v0 = vadd.f32 %v4977_v6, %v4779_v56  ;;  %v2055_v6 = vld [vmem:[%s7149_s5 + $0x178] sm:$0xff] }
 0x222   :  { %v5980_v13 = vpop.f32.mrf.mxu1  ;;  %2339 = vmatmul.f32.gmra.mxu0 %v1855_v51  ;;  %v1866_v51 = vmax.f32 %v1053_v54, 0.0  ;;  %v1251_v54 = vadd.f32 %v5215_v20, %v5867_v42  ;;  %2648 = vmatpush.xpose.msrb.mxu1 %v2055_v6  ;;  %v1124_v20 = vadd.f32 %v5271_v35, %v5856_v9  ;;  %v7266_v35 = vld [vmem:[#allocation22_spill] sm:$0xff] }
 0x224   :  { %2209 = vmatmul.f32.gmra.mxu2 %v1853_v33  ;;  %v5997_v2 = vpop.f32.mrf.mxu3  ;;  %v1882_v27 = vmax.f32 %v1251_v54, 0.0  ;;  %v1893_v6 = vmax.f32 %v1124_v20, 0.0  ;;  %v7270_v20 = vld [vmem:[#allocation27_spill] sm:$0xff] }
 0x225   :  { %2404 = vmatmul.f32.gmra.mxu1 %v1856_v47  ;;  %7257 = vst [vmem:[#allocation111_spill] sm:$0xff] %v5997_v2 }
 0x227   :  { %v6001_v34 = vpop.f32.mrf.mxu2  ;;  %v6003_v33 = vpop.f32.mrf.mxu0 }
 0x228   :  { %7258 = vst [vmem:[#allocation112_spill] sm:$0xff] %v6001_v34 }
 0x229   :  { %7259 = vst [vmem:[#allocation113_spill] sm:$0xff] %v6003_v33  ;;  %2277 = vmatmul.f32.gmra.mxu3 %v1867_v50  ;;  %v1879_v50 = vmax.f32 %v1056_v0, 0.0  ;;  %v1059_v0 = vadd.f32 %v7263_v10, %v4779_v56  ;;  %v7269_v10 = vld [vmem:[#allocation28_spill] sm:$0xff] }
 0x22a   :  { %v6005_v47 = vpop.f32.mrf.mxu1  ;;  %2342 = vmatmul.f32.gmra.mxu0 %v1868_v38 }
 0x22c   :  { %2212 = vmatmul.f32.gmra.mxu2 %v1866_v51  ;;  %v6016_v21 = vpop.f32.mrf.mxu3  ;;  %v1881_v51 = vmax.f32 %v1186_v24, 0.0  ;;  %v7264_v24 = vld [vmem:[#allocation24_spill] sm:$0xff] }
 0x22d   :  { %2407 = vmatmul.f32.gmra.mxu1 %v1869_v57  ;;  %7260 = vst [vmem:[#allocation114_spill] sm:$0xff] %v6016_v21  ;;  %v2039_v57 = vld [vmem:[%s7149_s5 + $0xf8] sm:$0xff]  ;;  %v1189_v54 = vadd.f32 %v7264_v24, %v5861_v3  ;;  %v1192_v24 = vadd.f32 %v7270_v20, %v5861_v3  ;;  %v2042_v20 = vld [vmem:[%s7149_s5 + $0x110] sm:$0xff] }
 0x22e   :  { %2454 = vmatpush.xpose.msrb.mxu2 %v2039_v57  ;;  %v1127_v57 = vadd.f32 %v7269_v10, %v5856_v9  ;;  %2649 = vmatpush.xpose.msrb.mxu1 %v2042_v20 }
 0x22f   :  { %v6020_v44 = vpop.f32.mrf.mxu2  ;;  %v6022_v58 = vpop.f32.mrf.mxu0  ;;  %v1894_v33 = vmax.f32 %v1189_v54, 0.0  ;;  %v1907_v10 = vmax.f32 %v1192_v24, 0.0  ;;  %v2027_v24 = vld [vmem:[%s7149_s5 + $0x98] sm:$0xff] }
 0x230   :  { %7261 = vst [vmem:[#allocation115_spill] sm:$0xff] %v6020_v44  ;;  %2520 = vmatpush.xpose.msrb.mxu3 %v2027_v24 }
 0x231   :  { %7262 = vst [vmem:[#allocation116_spill] sm:$0xff] %v6022_v58  ;;  %2280 = vmatmul.f32.gmra.mxu3 %v1880_v45  ;;  %v1892_v58 = vmax.f32 %v1059_v0, 0.0  ;;  %v7272_v0 = vld [vmem:[#allocation25_spill] sm:$0xff] }
 0x232   :  { %v6024_v38 = vpop.f32.mrf.mxu1  ;;  %2345 = vmatmul.f32.gmra.mxu0 %v1881_v51  ;;  %v1257_v54 = vadd.f32 %v7272_v0, %v5867_v42  ;;  %v1130_v0 = vadd.f32 %v7276_v28, %v5856_v9  ;;  %v7282_v28 = vld [vmem:[#allocation7_spill] sm:$0xff] }
 0x234   :  { %2215 = vmatmul.f32.gmra.mxu2 %v1879_v50  ;;  %v6041_v45 = vpop.f32.mrf.mxu3  ;;  %v1254_v50 = vadd.f32 %v7266_v35, %v5867_v42 }
 0x235   :  { %2410 = vmatmul.f32.gmra.mxu1 %v1882_v27  ;;  %7265 = vst [vmem:[#allocation13_spill] sm:$0xff] %v6041_v45  ;;  %v1908_v45 = vmax.f32 %v1257_v54, 0.0 }
 0x236   :  { %v1895_v56 = vmax.f32 %v1254_v50, 0.0 }
 0x237   :  { %v6045_v51 = vpop.f32.mrf.mxu2  ;;  %v6047_v27 = vpop.f32.mrf.mxu0 }
 0x238   :  { %7267 = vst [vmem:[#allocation24_spill] sm:$0xff] %v6045_v51 }
 0x239   :  { %7268 = vst [vmem:[#allocation22_spill] sm:$0xff] %v6047_v27  ;;  %2283 = vmatmul.f32.gmra.mxu3 %v1893_v6  ;;  %v7275_v6 = vld [vmem:[#allocation6_spill] sm:$0xff] }
 0x23a   :  { %v6049_v21 = vpop.f32.mrf.mxu1  ;;  %2348 = vmatmul.f32.gmra.mxu0 %v1894_v33  ;;  %v1906_v33 = vmax.f32 %v1127_v57, 0.0  ;;  %v2026_v57 = vld [vmem:[%s7149_s5 + $0x90] sm:$0xff] }
 0x23b   :  { %2455 = vmatpush.xpose.msrb.mxu2 %v2026_v57  ;;  %v7283_v57 = vld [vmem:[#allocation36_spill] sm:$0xff] }
 0x23c   :  { %2218 = vmatmul.f32.gmra.mxu2 %v1892_v58  ;;  %v6058_v35 = vpop.f32.mrf.mxu3  ;;  %v1133_v24 = vadd.f32 %v7283_v57, %v5856_v9 }
 0x23d   :  { %2413 = vmatmul.f32.gmra.mxu1 %v1895_v56  ;;  %7271 = vst [vmem:[#allocation28_spill] sm:$0xff] %v6058_v35  ;;  %v1905_v56 = vmax.f32 %v7275_v6, 0.0  ;;  %v7277_v6 = vld [vmem:[#allocation31_spill] sm:$0xff]  ;;  %v1918_v35 = vmax.f32 %v7282_v28, 0.0  ;;  %v7289_v28 = vld [vmem:[#allocation8_spill] sm:$0xff] }
 0x23f   :  { %v6062_v50 = vpop.f32.mrf.mxu2  ;;  %v6064_v58 = vpop.f32.mrf.mxu0 }
 0x240   :  { %7273 = vst [vmem:[#allocation27_spill] sm:$0xff] %v6062_v50 }
 0x241   :  { %7274 = vst [vmem:[#allocation25_spill] sm:$0xff] %v6064_v58  ;;  %2286 = vmatmul.f32.gmra.mxu3 %v1906_v33  ;;  %v1195_v58 = vadd.f32 %v7277_v6, %v5861_v3  ;;  %v7279_v33 = vld [vmem:[#allocation29_spill] sm:$0xff] }
 0x242   :  { %v6067_v27 = vpop.f32.mrf.mxu1  ;;  %2351 = vmatmul.f32.gmra.mxu0 %v1907_v10  ;;  %v2028_v6 = vld [vmem:[%s7149_s5 + $0xa0] sm:$0xff] }
 0x243   :  { %v1920_v50 = vmax.f32 %v1195_v58, 0.0  ;;  %2585 = vmatpush.xpose.msrb.mxu0 %v2028_v6  ;;  %v7286_v58 = vld [vmem:[#allocation33_spill] sm:$0xff]  ;;  %v7290_v6 = vld [vmem:[#allocation40_spill] sm:$0xff] }
 0x244   :  { %2221 = vmatmul.f32.gmra.mxu2 %v1905_v56  ;;  %v6082_v54 = vpop.f32.mrf.mxu3  ;;  %v1260_v56 = vadd.f32 %v7279_v33, %v5867_v42 }
 0x245   :  { %2416 = vmatmul.f32.gmra.mxu1 %v1908_v45  ;;  %7278 = vst [vmem:[#allocation6_spill] sm:$0xff] %v6082_v54  ;;  %v1919_v45 = vmax.f32 %v1130_v0, 0.0  ;;  %v7284_v0 = vld [vmem:[#allocation35_spill] sm:$0xff] }
 0x246   :  { %v1921_v44 = vmax.f32 %v1260_v56, 0.0  ;;  %v1198_v33 = vadd.f32 %v7284_v0, %v5861_v3  ;;  %v1263_v56 = vadd.f32 %v7286_v58, %v5867_v42  ;;  %v2029_v0 = vld [vmem:[%s7149_s5 + $0xa8] sm:$0xff]  ;;  %v1136_v58 = vadd.f32 %v7290_v6, %v5856_v9  ;;  %v7296_v6 = vld [vmem:[#allocation9_spill] sm:$0xff] }
 0x247   :  { %v6086_v10 = vpop.f32.mrf.mxu2  ;;  %v6088_v20 = vpop.f32.mrf.mxu0  ;;  %2650 = vmatpush.xpose.msrb.mxu1 %v2029_v0 }
 0x248   :  { %7280 = vst [vmem:[#allocation32_spill] sm:$0xff] %v6086_v10  ;;  %v1933_v57 = vmax.f32 %v1198_v33, 0.0  ;;  %v1934_v10 = vmax.f32 %v1263_v56, 0.0  ;;  %v2014_v33 = vld [vmem:[%s7149_s5 + $0x30] sm:$0xff] }
 0x249   :  { %7281 = vst [vmem:[#allocation31_spill] sm:$0xff] %v6088_v20  ;;  %2289 = vmatmul.f32.gmra.mxu3 %v1919_v45 }
 0x24a   :  { %v6091_v51 = vpop.f32.mrf.mxu1  ;;  %2354 = vmatmul.f32.gmra.mxu0 %v1920_v50  ;;  %2521 = vmatpush.xpose.msrb.mxu3 %v2014_v33 }
 0x24c   :  { %2224 = vmatmul.f32.gmra.mxu2 %v1918_v35  ;;  %v6100_v20 = vpop.f32.mrf.mxu3  ;;  %v1932_v35 = vmax.f32 %v1133_v24, 0.0  ;;  %v2013_v24 = vld [vmem:[%s7149_s5 + $0x28] sm:$0xff] }
 0x24d   :  { %2419 = vmatmul.f32.gmra.mxu1 %v1921_v44  ;;  %7285 = vst [vmem:[#allocation29_spill] sm:$0xff] %v6100_v20  ;;  %v1931_v44 = vmax.f32 %v7289_v28, 0.0  ;;  %v7291_v28 = vld [vmem:[#allocation39_spill] sm:$0xff]  ;;  %2456 = vmatpush.xpose.msrb.mxu2 %v2013_v24  ;;  %v1944_v20 = vmax.f32 %v7296_v6, 0.0  ;;  %v7297_v24 = vld [vmem:[#allocation44_spill] sm:$0xff]  ;;  %v7303_v6 = vld [vmem:[#allocation10_spill] sm:$0xff] }
 0x24e   :  { %v1139_v33 = vadd.f32 %v7297_v24, %v5856_v9  ;;  %v1957_v24 = vmax.f32 %v7303_v6, 0.0  ;;  %v2109_v6 = vld [vmem:[%s7149_s5 + $0x328] sm:$0xff] }
 0x24f   :  { %v6104_v45 = vpop.f32.mrf.mxu2  ;;  %v6106_v50 = vpop.f32.mrf.mxu0  ;;  %2774 = vmatpush.xpose.msra.mxu3 %v2109_v6 }
 0x250   :  { %7287 = vst [vmem:[#allocation7_spill] sm:$0xff] %v6104_v45 }
 0x251   :  { %7288 = vst [vmem:[#allocation36_spill] sm:$0xff] %v6106_v50  ;;  %2292 = vmatmul.f32.gmra.mxu3 %v1932_v35  ;;  %v1201_v50 = vadd.f32 %v7291_v28, %v5861_v3  ;;  %v7293_v35 = vld [vmem:[#allocation37_spill] sm:$0xff]  ;;  %v2015_v28 = vld [vmem:[%s7149_s5 + $0x38] sm:$0xff] }
 0x252   :  { %v6109_v54 = vpop.f32.mrf.mxu1  ;;  %2357 = vmatmul.f32.gmra.mxu0 %v1933_v57 }
 0x253   :  { %v1946_v45 = vmax.f32 %v1201_v50, 0.0  ;;  %2586 = vmatpush.xpose.msrb.mxu0 %v2015_v28  ;;  %v7300_v50 = vld [vmem:[#allocation41_spill] sm:$0xff]  ;;  %v7304_v28 = vld [vmem:[#allocation48_spill] sm:$0xff] }
 0x254   :  { %2227 = vmatmul.f32.gmra.mxu2 %v1931_v44  ;;  %v6124_v56 = vpop.f32.mrf.mxu3  ;;  %v1266_v44 = vadd.f32 %v7293_v35, %v5867_v42 }
 0x255   :  { %2422 = vmatmul.f32.gmra.mxu1 %v1934_v10  ;;  %7292 = vst [vmem:[#allocation35_spill] sm:$0xff] %v6124_v56  ;;  %v1945_v10 = vmax.f32 %v1136_v58, 0.0  ;;  %v7298_v58 = vld [vmem:[#allocation43_spill] sm:$0xff] }
 0x256   :  { %v1947_v2 = vmax.f32 %v1266_v44, 0.0  ;;  %v1204_v35 = vadd.f32 %v7298_v58, %v5861_v3  ;;  %v1269_v44 = vadd.f32 %v7300_v50, %v5867_v42  ;;  %v1142_v50 = vadd.f32 %v7304_v28, %v5856_v9  ;;  %v7310_v28 = vld [vmem:[#allocation11_spill] sm:$0xff] }
 0x257   :  { %v6128_v57 = vpop.f32.mrf.mxu2  ;;  %v6130_v0 = vpop.f32.mrf.mxu0 }
 0x258   :  { %7294 = vst [vmem:[#allocation33_spill] sm:$0xff] %v6128_v57  ;;  %v1959_v56 = vmax.f32 %v1204_v35, 0.0  ;;  %v1960_v58 = vmax.f32 %v1269_v44, 0.0  ;;  %v7305_v35 = vld [vmem:[#allocation47_spill] sm:$0xff] }
 0x259   :  { %7295 = vst [vmem:[#allocation8_spill] sm:$0xff] %v6130_v0  ;;  %2295 = vmatmul.f32.gmra.mxu3 %v1945_v10 }
 0x25a   :  { %v6133_v7 = vpop.f32.mrf.mxu1  ;;  %2360 = vmatmul.f32.gmra.mxu0 %v1946_v45 }
 0x25c   :  { %2230 = vmatmul.f32.gmra.mxu2 %v1944_v20  ;;  %v6142_v0 = vpop.f32.mrf.mxu3  ;;  %v1958_v20 = vmax.f32 %v1139_v33, 0.0  ;;  %v2108_v33 = vld [vmem:[%s7149_s5 + $0x320] sm:$0xff] }
 0x25d   :  { %2425 = vmatmul.f32.gmra.mxu1 %v1947_v2  ;;  %7299 = vst [vmem:[#allocation40_spill] sm:$0xff] %v6142_v0  ;;  %v2016_v2 = vld [vmem:[%s7149_s5 + $0x40] sm:$0xff]  ;;  %2709 = vmatpush.xpose.msra.mxu2 %v2108_v33  ;;  %v1970_v0 = vmax.f32 %v7310_v28, 0.0  ;;  %v7311_v33 = vld [vmem:[#allocation52_spill] sm:$0xff] }
 0x25e   :  { %2651 = vmatpush.xpose.msrb.mxu1 %v2016_v2  ;;  %v1145_v6 = vadd.f32 %v7311_v33, %v5856_v9  ;;  %v7317_v28 = vld [vmem:[#allocation12_spill] sm:$0xff] }
 0x25f   :  { %v6146_v10 = vpop.f32.mrf.mxu2  ;;  %v6148_v45 = vpop.f32.mrf.mxu0 }
 0x260   :  { %7301 = vst [vmem:[#allocation39_spill] sm:$0xff] %v6146_v10 }
 0x261   :  { %7302 = vst [vmem:[#allocation37_spill] sm:$0xff] %v6148_v45  ;;  %2298 = vmatmul.f32.gmra.mxu3 %v1958_v20  ;;  %v1207_v45 = vadd.f32 %v7305_v35, %v5861_v3  ;;  %v2110_v35 = vld [vmem:[%s7149_s5 + $0x330] sm:$0xff] }
 0x262   :  { %v6154_v57 = vpop.f32.mrf.mxu1  ;;  %2363 = vmatmul.f32.gmra.mxu0 %v1959_v56  ;;  %v7307_v56 = vld [vmem:[#allocation45_spill] sm:$0xff] }
 0x263   :  { %v1272_v44 = vadd.f32 %v7307_v56, %v5867_v42  ;;  %v1972_v10 = vmax.f32 %v1207_v45, 0.0  ;;  %2839 = vmatpush.xpose.msra.mxu0 %v2110_v35  ;;  %v7314_v45 = vld [vmem:[#allocation49_spill] sm:$0xff]  ;;  %v2111_v35 = vld [vmem:[%s7149_s5 + $0x338] sm:$0xff] }
 0x264   :  { %2233 = vmatmul.f32.gmra.mxu2 %v1957_v24  ;;  %v6166_v2 = vpop.f32.mrf.mxu3  ;;  %v1971_v24 = vmax.f32 %v1142_v50, 0.0  ;;  %v7312_v50 = vld [vmem:[#allocation51_spill] sm:$0xff]  ;;  %2904 = vmatpush.xpose.msra.mxu1 %v2111_v35 }
 0x265   :  { %2428 = vmatmul.f32.gmra.mxu1 %v1960_v58  ;;  %7306 = vst [vmem:[#allocation9_spill] sm:$0xff] %v6166_v2  ;;  %v1973_v30 = vmax.f32 %v1272_v44, 0.0  ;;  %v1210_v56 = vadd.f32 %v7312_v50, %v5861_v3  ;;  %v1275_v44 = vadd.f32 %v7314_v45, %v5867_v42  ;;  %v1148_v50 = vadd.f32 %v5524_v39, %v5856_v9  ;;  %v7318_v45 = vld [vmem:[#allocation55_spill] sm:$0xff]  ;;  %v6217_v9 = vld [vmem:[%s7148_s4 + $0x8] sm:$0x1f] }
 0x267   :  { %v6170_v20 = vpop.f32.mrf.mxu2  ;;  %v6172_v58 = vpop.f32.mrf.mxu0  ;;  %v1985_v33 = vmax.f32 %v1210_v56, 0.0  ;;  %v2096_v56 = vld [vmem:[%s7149_s5 + $0x2c0] sm:$0xff] }
 0x268   :  { %7308 = vst [vmem:[#allocation44_spill] sm:$0xff] %v6170_v20  ;;  %v1986_v20 = vmax.f32 %v1275_v44, 0.0  ;;  %v1213_v44 = vadd.f32 %v7318_v45, %v5861_v3  ;;  %2775 = vmatpush.xpose.msra.mxu3 %v2096_v56  ;;  %v7323_v45 = vld [vmem:[#allocation14_spill] sm:$0xff] }
 0x269   :  { %7309 = vst [vmem:[#allocation43_spill] sm:$0xff] %v6172_v58  ;;  %2301 = vmatmul.f32.gmra.mxu3 %v1971_v24  ;;  %v1996_v35 = vmax.f32 %v7323_v45, 0.0 }
 0x26a   :  { %v6175_v34 = vpop.f32.mrf.mxu1  ;;  %2366 = vmatmul.f32.gmra.mxu0 %v1972_v10 }
 0x26c   :  { %2236 = vmatmul.f32.gmra.mxu2 %v1970_v0  ;;  %v6184_v58 = vpop.f32.mrf.mxu3  ;;  %v1984_v0 = vmax.f32 %v1145_v6, 0.0  ;;  %v2095_v6 = vld [vmem:[%s7149_s5 + $0x2b8] sm:$0xff] }
 0x26d   :  { %2431 = vmatmul.f32.gmra.mxu1 %v1973_v30  ;;  %7313 = vst [vmem:[#allocation41_spill] sm:$0xff] %v6184_v58  ;;  %v1983_v30 = vmax.f32 %v7317_v28, 0.0  ;;  %2710 = vmatpush.xpose.msra.mxu2 %v2095_v6  ;;  %v7320_v28 = vld [vmem:[#allocation53_spill] sm:$0xff]  ;;  %v6226_v6 = vperm.slane %v5853_v32, 5 }
 0x26f   :  { %v6188_v24 = vpop.f32.mrf.mxu2  ;;  %v6190_v10 = vpop.f32.mrf.mxu0 }
 0x270   :  { %7315 = vst [vmem:[#allocation10_spill] sm:$0xff] %v6188_v24 }
 0x271   :  { %7316 = vst [vmem:[#allocation48_spill] sm:$0xff] %v6190_v10  ;;  %2304 = vmatmul.f32.gmra.mxu3 %v1984_v0 }
 0x272   :  { %v6193_v2 = vpop.f32.mrf.mxu1  ;;  %2369 = vmatmul.f32.gmra.mxu0 %v1985_v33  ;;  %v6220_v33 = vperm.slane %v5853_v32, 6 }
 0x274   :  { %2239 = vmatmul.f32.gmra.mxu2 %v1983_v30  ;;  %v6208_v0 = vpop.f32.mrf.mxu3  ;;  %v1278_v30 = vadd.f32 %v7320_v28, %v5867_v42  ;;  %v1998_v42 = vmax.f32 %v1213_v44, 0.0  ;;  %v6229_v28 = vperm.slane %v5853_v32, 7  ;;  %v2097_v44 = vld [vmem:[%s7149_s5 + $0x2c8] sm:$0xff]  ;;  %v7324_v32 = vld [vmem:[#allocation15_spill] sm:$0xff] }
 0x275   :  { %2434 = vmatmul.f32.gmra.mxu1 %v1986_v20  ;;  %7319 = vst [vmem:[#allocation47_spill] sm:$0xff] %v6208_v0  ;;  %v1997_v20 = vmax.f32 %v1148_v50, 0.0  ;;  %v6234_v0 = vperm.slane %v6217_v9, 0  ;;  %v1363_v50 = vadd.f32 %v5549_v41, %v6220_v33  ;;  %v1298_v45 = vadd.f32 %v7324_v32, %v6226_v6  ;;  %2840 = vmatpush.xpose.msra.mxu0 %v2097_v44  ;;  %v2082_v44 = vld [vmem:[%s7149_s5 + $0x250] sm:$0xff] }
 0x276   :  { %v1999_v10 = vmax.f32 %v1278_v30, 0.0  ;;  %2711 = vmatpush.xpose.msra.mxu2 %v2082_v44  ;;  %v7333_v44 = vld [vmem:[#allocation64_spill] sm:$0xff] }
 0x277   :  { %v6212_v39 = vpop.f32.mrf.mxu2  ;;  %v6222_v3 = vpop.f32.mrf.mxu0  ;;  %v1806_v41 = vmax.f32 %v1363_v50, 0.0  ;;  %v1805_v58 = vmax.f32 %v1298_v45, 0.0  ;;  %v1366_v50 = vadd.f32 %v5568_v62, %v6220_v33  ;;  %v2083_v45 = vld [vmem:[%s7149_s5 + $0x258] sm:$0xff]  ;;  %v7331_v62 = vld [vmem:[#allocation59_spill] sm:$0xff] }
 0x278   :  { %7321 = vst [vmem:[#allocation45_spill] sm:$0xff] %v6212_v39  ;;  %2776 = vmatpush.xpose.msra.mxu3 %v2083_v45 }
 0x279   :  { %7322 = vst [vmem:[#allocation11_spill] sm:$0xff] %v6222_v3  ;;  %2307 = vmatmul.f32.gmra.mxu3 %v1997_v20  ;;  %v7325_v3 = vld [vmem:[#allocation58_spill] sm:$0xff]  ;;  %v7327_v20 = vld [vmem:[#allocation56_spill] sm:$0xff]  ;;  %v1819_v15 = vmax.f32 %v1366_v50, 0.0 }
 0x27a   :  { %v6231_v56 = vpop.f32.mrf.mxu1  ;;  %2372 = vmatmul.f32.gmra.mxu0 %v1998_v42  ;;  %v1428_v30 = vadd.f32 %v7325_v3, %v6229_v28  ;;  %v2098_v3 = vld [vmem:[%s7149_s5 + $0x2d0] sm:$0xff] }
 0x27b   :  { %2905 = vmatpush.xpose.msra.mxu1 %v2098_v3  ;;  %v2084_v3 = vld [vmem:[%s7149_s5 + $0x260] sm:$0xff] }
 0x27c   :  { %2242 = vmatmul.f32.gmra.mxu2 %v1996_v35  ;;  %v6245_v39 = vpop.f32.mrf.mxu3  ;;  %v1493_v35 = vadd.f32 %v7327_v20, %v6234_v0  ;;  %v1807_v24 = vmax.f32 %v1428_v30, 0.0  ;;  %v7329_v30 = vld [vmem:[#allocation16_spill] sm:$0xff]  ;;  %2841 = vmatpush.xpose.msra.mxu0 %v2084_v3  ;;  %v2069_v3 = vld [vmem:[%s7149_s5 + $0x1e8] sm:$0xff] }
 0x27d   :  { %2437 = vmatmul.f32.gmra.mxu1 %v1999_v10  ;;  %7326 = vst [vmem:[#allocation52_spill] sm:$0xff] %v6245_v39  ;;  %2712 = vmatpush.xpose.msra.mxu2 %v2069_v3 }
 0x27e   :  { %v1808_v40 = vmax.f32 %v1493_v35, 0.0  ;;  %v2134_v35 = vadd.f32 %v6254_v14, %v5892_v18  ;;  %v1369_v18 = vadd.f32 %v5593_v46, %v6220_v33  ;;  %v7334_v46 = vld [vmem:[#allocation62_spill] sm:$0xff] }
 0x27f   :  { %v6249_v42 = vpop.f32.mrf.mxu2  ;;  %v2328_v10 = vpop.f32.mrf.mxu0 }
 0x280   :  { %7328 = vst [vmem:[#allocation51_spill] sm:$0xff] %v6249_v42 }
 0x281   :  { %2522 = vmatmul.f32.vlgmr.msrb.gmra.mxu3 %v1806_v41 }
 0x282   :  { %v2393_v32 = vpop.f32.mrf.mxu1  ;;  %2587 = vmatmul.f32.vlgmr.msrb.gmra.mxu0 %v1807_v24  ;;  %v7330_v24 = vld [vmem:[#allocation61_spill] sm:$0xff] }
 0x283   :  { %v1431_v20 = vadd.f32 %v7330_v24, %v6229_v28 }
 0x284   :  { %2457 = vmatmul.f32.vlgmr.msrb.gmra.mxu2 %v1805_v58  ;;  %v1301_v58 = vadd.f32 %v7329_v30, %v6226_v6  ;;  %v2263_v41 = vpop.f32.mrf.mxu3 }
 0x285   :  { %2652 = vmatmul.f32.vlgmr.msrb.gmra.mxu1 %v1808_v40  ;;  %v1496_v40 = vadd.f32 %v7331_v62, %v6234_v0  ;;  %v1820_v60 = vmax.f32 %v1431_v20, 0.0 }
 0x286   :  { %v1818_v22 = vmax.f32 %v1301_v58, 0.0  ;;  %v1832_v58 = vmax.f32 %v1369_v18, 0.0  ;;  %v1372_v18 = vadd.f32 %v5612_v4, %v6220_v33  ;;  %v7337_v4 = vld [vmem:[#allocation65_spill] sm:$0xff] }
 0x287   :  { %v2198_v39 = vpop.f32.mrf.mxu2  ;;  %v2331_v52 = vpop.f32.mrf.mxu0  ;;  %v1821_v1 = vmax.f32 %v1496_v40, 0.0 }
 0x288   :  { %v2199_v42 = vadd.f32 %v2198_v39, %v2134_v35  ;;  %v7332_v39 = vld [vmem:[#allocation17_spill] sm:$0xff] }
 0x289   :  { %2525 = vmatmul.f32.gmra.mxu3 %v1819_v15  ;;  %v1304_v50 = vadd.f32 %v7332_v39, %v6226_v6  ;;  %v2137_v15 = vadd.f32 %v6254_v14, %v5917_v31  ;;  %v2085_v31 = vld [vmem:[%s7149_s5 + $0x268] sm:$0xff] }
 0x28a   :  { %v2264_v30 = vadd.f32 %v2263_v41, %v2199_v42  ;;  %v2396_v17 = vpop.f32.mrf.mxu1  ;;  %2590 = vmatmul.f32.gmra.mxu0 %v1820_v60  ;;  %v1434_v42 = vadd.f32 %v7333_v44, %v6229_v28  ;;  %2906 = vmatpush.xpose.msra.mxu1 %v2085_v31  ;;  %v7338_v31 = vld [vmem:[#allocation19_spill] sm:$0xff] }
 0x28b   :  { %v1831_v35 = vmax.f32 %v1304_v50, 0.0  ;;  %v7336_v50 = vld [vmem:[#allocation67_spill] sm:$0xff] }
 0x28c   :  { %v2329_v24 = vadd.f32 %v2328_v10, %v2264_v30  ;;  %2460 = vmatmul.f32.gmra.mxu2 %v1818_v22  ;;  %v2266_v10 = vpop.f32.mrf.mxu3  ;;  %v1833_v41 = vmax.f32 %v1434_v42, 0.0  ;;  %v1437_v44 = vadd.f32 %v7336_v50, %v6229_v28  ;;  %v2140_v42 = vadd.f32 %v6254_v14, %v5936_v59 }
 0x28d   :  { %2655 = vmatmul.f32.gmra.mxu1 %v1821_v1  ;;  %v1499_v1 = vadd.f32 %v7334_v46, %v6234_v0  ;;  %v1502_v46 = vadd.f32 %v7337_v4, %v6234_v0 }
 0x28e   :  { %v6286_v60 = vadd.f32 %v2393_v32, %v2329_v24  ;;  %v7335_v32 = vld [vmem:[#allocation18_spill] sm:$0xff] }
 0x28f   :  { %v2201_v22 = vpop.f32.mrf.mxu2  ;;  %v2334_v20 = vpop.f32.mrf.mxu0  ;;  %v1834_v30 = vmax.f32 %v1499_v1, 0.0  ;;  %v1307_v24 = vadd.f32 %v7335_v32, %v6226_v6  ;;  %v1847_v32 = vmax.f32 %v1502_v46, 0.0 }
 0x290   :  { %v2202_v45 = vadd.f32 %v2201_v22, %v2137_v15 }
 0x291   :  { %2528 = vmatmul.f32.gmra.mxu3 %v1832_v58 }
 0x292   :  { %v2267_v62 = vadd.f32 %v2266_v10, %v2202_v45  ;;  %v2399_v40 = vpop.f32.mrf.mxu1  ;;  %2593 = vmatmul.f32.gmra.mxu0 %v1833_v41  ;;  %v1845_v45 = vmax.f32 %v1372_v18, 0.0  ;;  %v1846_v41 = vmax.f32 %v1437_v44, 0.0  ;;  %v1310_v18 = vadd.f32 %v7338_v31, %v6226_v6 }
 0x294   :  { %v2332_v39 = vadd.f32 %v2331_v52, %v2267_v62  ;;  %2463 = vmatmul.f32.gmra.mxu2 %v1831_v35  ;;  %v2070_v52 = vld [vmem:[%s7149_s5 + $0x1f0] sm:$0xff]  ;;  %v2269_v15 = vpop.f32.mrf.mxu3  ;;  %v1844_v35 = vmax.f32 %v1307_v24, 0.0  ;;  %v7339_v24 = vld [vmem:[#allocation70_spill] sm:$0xff] }
 0x295   :  { %2658 = vmatmul.f32.gmra.mxu1 %v1834_v30  ;;  %2777 = vmatpush.xpose.msra.mxu3 %v2070_v52  ;;  %v1440_v3 = vadd.f32 %v7339_v24, %v6229_v28  ;;  %v2143_v52 = vadd.f32 %v6254_v14, %v5961_v29  ;;  %v2072_v29 = vld [vmem:[%s7149_s5 + $0x200] sm:$0xff] }
 0x296   :  { %v6307_v10 = vadd.f32 %v2396_v17, %v2332_v39  ;;  %v1375_v17 = vadd.f32 %v5637_v25, %v6220_v33  ;;  %v2071_v39 = vld [vmem:[%s7149_s5 + $0x1f8] sm:$0xff]  ;;  %2907 = vmatpush.xpose.msra.mxu1 %v2072_v29 }
 0x297   :  { %v2204_v1 = vpop.f32.mrf.mxu2  ;;  %v2337_v58 = vpop.f32.mrf.mxu0  ;;  %2842 = vmatpush.xpose.msra.mxu0 %v2071_v39  ;;  %v7340_v25 = vld [vmem:[#allocation68_spill] sm:$0xff]  ;;  %v7342_v39 = vld [vmem:[#allocation73_spill] sm:$0xff] }
 0x298   :  { %v2205_v22 = vadd.f32 %v2204_v1, %v2140_v42  ;;  %v1505_v44 = vadd.f32 %v7340_v25, %v6234_v0  ;;  %v1858_v4 = vmax.f32 %v1375_v17, 0.0  ;;  %v1857_v1 = vmax.f32 %v1310_v18, 0.0  ;;  %v2056_v17 = vld [vmem:[%s7149_s5 + $0x180] sm:$0xff] }
 0x299   :  { %2531 = vmatmul.f32.gmra.mxu3 %v1845_v45  ;;  %v1443_v31 = vadd.f32 %v7342_v39, %v6229_v28  ;;  %v2146_v18 = vadd.f32 %v6254_v14, %v5980_v13  ;;  %2713 = vmatpush.xpose.msra.mxu2 %v2056_v17 }
 0x29a   :  { %v2270_v62 = vadd.f32 %v2269_v15, %v2205_v22  ;;  %v2402_v30 = vpop.f32.mrf.mxu1  ;;  %2596 = vmatmul.f32.gmra.mxu0 %v1846_v41  ;;  %v1859_v22 = vmax.f32 %v1440_v3, 0.0  ;;  %v1860_v41 = vmax.f32 %v1505_v44, 0.0 }
 0x29c   :  { %v2335_v59 = vadd.f32 %v2334_v20, %v2270_v62  ;;  %2466 = vmatmul.f32.gmra.mxu2 %v1844_v35  ;;  %v2272_v20 = vpop.f32.mrf.mxu3 }
 0x29d   :  { %2661 = vmatmul.f32.gmra.mxu1 %v1847_v32 }
 0x29e   :  { %v6322_v50 = vadd.f32 %v2399_v40, %v2335_v59  ;;  %v7341_v40 = vld [vmem:[#allocation20_spill] sm:$0xff]  ;;  %v1378_v59 = vadd.f32 %v5656_v49, %v6220_v33  ;;  %v7343_v49 = vld [vmem:[#allocation71_spill] sm:$0xff] }
 0x29f   :  { %v2207_v42 = vpop.f32.mrf.mxu2  ;;  %v2340_v46 = vpop.f32.mrf.mxu0  ;;  %v1313_v32 = vadd.f32 %v7341_v40, %v6226_v6  ;;  %v1446_v40 = vadd.f32 %v5677_v23, %v6229_v28 }
 0x2a0   :  { %v2208_v15 = vadd.f32 %v2207_v42, %v2143_v52  ;;  %v1508_v52 = vadd.f32 %v7343_v49, %v6234_v0  ;;  %v1871_v44 = vmax.f32 %v1378_v59, 0.0 }
 0x2a1   :  { %2534 = vmatmul.f32.gmra.mxu3 %v1858_v4  ;;  %v1872_v4 = vmax.f32 %v1443_v31, 0.0  ;;  %v1885_v49 = vmax.f32 %v1446_v40, 0.0 }
 0x2a2   :  { %v2273_v45 = vadd.f32 %v2272_v20, %v2208_v15  ;;  %v2405_v35 = vpop.f32.mrf.mxu1  ;;  %2599 = vmatmul.f32.gmra.mxu0 %v1859_v22  ;;  %v1870_v15 = vmax.f32 %v1313_v32, 0.0  ;;  %v2149_v32 = vadd.f32 %v6254_v14, %v6005_v47  ;;  %v2059_v47 = vld [vmem:[%s7149_s5 + $0x198] sm:$0xff] }
 0x2a3   :  { %2908 = vmatpush.xpose.msra.mxu1 %v2059_v47 }
 0x2a4   :  { %v2338_v62 = vadd.f32 %v2337_v58, %v2273_v45  ;;  %2469 = vmatmul.f32.gmra.mxu2 %v1857_v1  ;;  %v2057_v58 = vld [vmem:[%s7149_s5 + $0x188] sm:$0xff]  ;;  %v2275_v24 = vpop.f32.mrf.mxu3  ;;  %v1873_v45 = vmax.f32 %v1508_v52, 0.0 }
 0x2a5   :  { %2664 = vmatmul.f32.gmra.mxu1 %v1860_v41  ;;  %2778 = vmatpush.xpose.msra.mxu3 %v2057_v58  ;;  %v2058_v41 = vld [vmem:[%s7149_s5 + $0x190] sm:$0xff] }
 0x2a6   :  { %v6343_v3 = vadd.f32 %v2402_v30, %v2338_v62  ;;  %v1381_v30 = vadd.f32 %v5681_v43, %v6220_v33  ;;  %v7344_v62 = vld [vmem:[#allocation21_spill] sm:$0xff]  ;;  %2843 = vmatpush.xpose.msra.mxu0 %v2058_v41  ;;  %v7345_v43 = vld [vmem:[#allocation74_spill] sm:$0xff] }
 0x2a7   :  { %v2210_v20 = vpop.f32.mrf.mxu2  ;;  %v2343_v42 = vpop.f32.mrf.mxu0  ;;  %v1316_v29 = vadd.f32 %v7344_v62, %v6226_v6  ;;  %v1511_v17 = vadd.f32 %v7345_v43, %v6234_v0 }
 0x2a8   :  { %v2211_v25 = vadd.f32 %v2210_v20, %v2146_v18  ;;  %v1884_v31 = vmax.f32 %v1381_v30, 0.0 }
 0x2a9   :  { %2537 = vmatmul.f32.gmra.mxu3 %v1871_v44 }
 0x2aa   :  { %v2276_v1 = vadd.f32 %v2275_v24, %v2211_v25  ;;  %v2408_v22 = vpop.f32.mrf.mxu1  ;;  %2602 = vmatmul.f32.gmra.mxu0 %v1872_v4  ;;  %v1883_v24 = vmax.f32 %v1316_v29, 0.0  ;;  %v1886_v25 = vmax.f32 %v1511_v17, 0.0  ;;  %v2043_v4 = vld [vmem:[%s7149_s5 + $0x118] sm:$0xff] }
 0x2ab   :  { %2714 = vmatpush.xpose.msra.mxu2 %v2043_v4 }
 0x2ac   :  { %v2341_v13 = vadd.f32 %v2340_v46, %v2276_v1  ;;  %2472 = vmatmul.f32.gmra.mxu2 %v1870_v15  ;;  %v2278_v46 = vpop.f32.mrf.mxu3  ;;  %v1384_v15 = vadd.f32 %v5698_v5, %v6220_v33  ;;  %v1449_v1 = vadd.f32 %v5696_v55, %v6229_v28  ;;  %v1514_v5 = vadd.f32 %v5683_v26, %v6234_v0  ;;  %v2045_v26 = vld [vmem:[%s7149_s5 + $0x128] sm:$0xff] }
 0x2ad   :  { %2667 = vmatmul.f32.gmra.mxu1 %v1873_v45  ;;  %v2152_v45 = vadd.f32 %v6254_v14, %v6024_v38  ;;  %2844 = vmatpush.xpose.msra.mxu0 %v2045_v26 }
 0x2ae   :  { %v6358_v59 = vadd.f32 %v2405_v35, %v2341_v13  ;;  %v7346_v35 = vld [vmem:[#allocation23_spill] sm:$0xff]  ;;  %v1897_v29 = vmax.f32 %v1384_v15, 0.0  ;;  %v1899_v17 = vmax.f32 %v1514_v5, 0.0 }
 0x2af   :  { %v2213_v58 = vpop.f32.mrf.mxu2  ;;  %v2346_v18 = vpop.f32.mrf.mxu0  ;;  %v1319_v44 = vadd.f32 %v7346_v35, %v6226_v6  ;;  %v2030_v5 = vld [vmem:[%s7149_s5 + $0xb0] sm:$0xff] }
 0x2b0   :  { %v2214_v39 = vadd.f32 %v2213_v58, %v2149_v32  ;;  %v7347_v58 = vld [vmem:[#allocation26_spill] sm:$0xff]  ;;  %2715 = vmatpush.xpose.msra.mxu2 %v2030_v5 }
 0x2b1   :  { %2540 = vmatmul.f32.gmra.mxu3 %v1884_v31  ;;  %v1896_v32 = vmax.f32 %v1319_v44, 0.0  ;;  %v1452_v31 = vadd.f32 %v5720_v61, %v6229_v28 }
 0x2b2   :  { %v2279_v52 = vadd.f32 %v2278_v46, %v2214_v39  ;;  %v2411_v20 = vpop.f32.mrf.mxu1  ;;  %2605 = vmatmul.f32.gmra.mxu0 %v1885_v49  ;;  %v1898_v46 = vmax.f32 %v1449_v1, 0.0  ;;  %v1322_v39 = vadd.f32 %v7347_v58, %v6226_v6 }
 0x2b3   :  { %v1911_v15 = vmax.f32 %v1452_v31, 0.0 }
 0x2b4   :  { %v2344_v23 = vadd.f32 %v2343_v42, %v2279_v52  ;;  %2475 = vmatmul.f32.gmra.mxu2 %v1883_v24  ;;  %v2044_v42 = vld [vmem:[%s7149_s5 + $0x120] sm:$0xff]  ;;  %v2281_v13 = vpop.f32.mrf.mxu3  ;;  %v2155_v24 = vadd.f32 %v6254_v14, %v6049_v21  ;;  %v1909_v44 = vmax.f32 %v1322_v39, 0.0  ;;  %v2046_v21 = vld [vmem:[%s7149_s5 + $0x130] sm:$0xff] }
 0x2b5   :  { %2670 = vmatmul.f32.gmra.mxu1 %v1886_v25  ;;  %2779 = vmatpush.xpose.msra.mxu3 %v2044_v42 }
 0x2b6   :  { %v6379_v30 = vadd.f32 %v2408_v22, %v2344_v23  ;;  %v1387_v22 = vadd.f32 %v5722_v63, %v6220_v33  ;;  %v7348_v63 = vld [vmem:[#allocation77_spill] sm:$0xff]  ;;  %2909 = vmatpush.xpose.msra.mxu1 %v2046_v21 }
 0x2b7   :  { %v2216_v41 = vpop.f32.mrf.mxu2  ;;  %v2349_v40 = vpop.f32.mrf.mxu0  ;;  %v1517_v52 = vadd.f32 %v7348_v63, %v6234_v0 }
 0x2b8   :  { %v2217_v62 = vadd.f32 %v2216_v41, %v2152_v45  ;;  %v1910_v47 = vmax.f32 %v1387_v22, 0.0  ;;  %v2031_v41 = vld [vmem:[%s7149_s5 + $0xb8] sm:$0xff] }
 0x2b9   :  { %2543 = vmatmul.f32.gmra.mxu3 %v1897_v29  ;;  %v1912_v1 = vmax.f32 %v1517_v52, 0.0  ;;  %v2158_v29 = vadd.f32 %v6254_v14, %v6067_v27  ;;  %v1458_v52 = vadd.f32 %v5762_v19, %v6229_v28 }
 0x2ba   :  { %v2282_v43 = vadd.f32 %v2281_v13, %v2217_v62  ;;  %v2414_v55 = vpop.f32.mrf.mxu1  ;;  %2608 = vmatmul.f32.gmra.mxu0 %v1898_v46  ;;  %v1390_v13 = vadd.f32 %v5740_v53, %v6220_v33  ;;  %v1455_v62 = vadd.f32 %v5738_v16, %v6229_v28  ;;  %v7350_v53 = vld [vmem:[#allocation79_spill] sm:$0xff]  ;;  %2780 = vmatpush.xpose.msra.mxu3 %v2031_v41 }
 0x2bb   :  { %v1520_v46 = vadd.f32 %v7350_v53, %v6234_v0  ;;  %v1937_v21 = vmax.f32 %v1458_v52, 0.0  ;;  %v1396_v41 = vadd.f32 %v5782_v37, %v6220_v33  ;;  %v7355_v37 = vld [vmem:[#allocation83_spill] sm:$0xff]  ;;  %v2019_v52 = vld [vmem:[%s7149_s5 + $0x58] sm:$0xff] }
 0x2bc   :  { %v2347_v38 = vadd.f32 %v2346_v18, %v2282_v43  ;;  %2478 = vmatmul.f32.gmra.mxu2 %v1896_v32  ;;  %v2284_v18 = vpop.f32.mrf.mxu3  ;;  %v1924_v58 = vmax.f32 %v1455_v62, 0.0  ;;  %v2017_v62 = vld [vmem:[%s7149_s5 + $0x48] sm:$0xff] }
 0x2bd   :  { %2673 = vmatmul.f32.gmra.mxu1 %v1899_v17  ;;  %v1925_v31 = vmax.f32 %v1520_v46, 0.0  ;;  %v2164_v46 = vadd.f32 %v6254_v14, %v6109_v54  ;;  %2716 = vmatpush.xpose.msra.mxu2 %v2017_v62 }
 0x2be   :  { %v6394_v49 = vadd.f32 %v2411_v20, %v2347_v38  ;;  %v7349_v20 = vld [vmem:[#allocation30_spill] sm:$0xff]  ;;  %v1923_v38 = vmax.f32 %v1390_v13, 0.0 }
 0x2bf   :  { %v2219_v25 = vpop.f32.mrf.mxu2  ;;  %v2352_v35 = vpop.f32.mrf.mxu0  ;;  %v1325_v45 = vadd.f32 %v7349_v20, %v6226_v6 }
 0x2c0   :  { %v2220_v23 = vadd.f32 %v2219_v25, %v2155_v24  ;;  %v2032_v24 = vld [vmem:[%s7149_s5 + $0xc0] sm:$0xff]  ;;  %v2161_v25 = vadd.f32 %v6254_v14, %v6091_v51  ;;  %v2033_v51 = vld [vmem:[%s7149_s5 + $0xc8] sm:$0xff] }
 0x2c1   :  { %2546 = vmatmul.f32.gmra.mxu3 %v1910_v47  ;;  %v1922_v26 = vmax.f32 %v1325_v45, 0.0  ;;  %2845 = vmatpush.xpose.msra.mxu0 %v2032_v24 }
 0x2c2   :  { %v2285_v4 = vadd.f32 %v2284_v18, %v2220_v23  ;;  %v2417_v42 = vpop.f32.mrf.mxu1  ;;  %2611 = vmatmul.f32.gmra.mxu0 %v1911_v15  ;;  %v7351_v18 = vld [vmem:[#allocation34_spill] sm:$0xff]  ;;  %2910 = vmatpush.xpose.msra.mxu1 %v2033_v51  ;;  %v2020_v51 = vld [vmem:[%s7149_s5 + $0x60] sm:$0xff] }
 0x2c3   :  { %v1328_v63 = vadd.f32 %v7351_v18, %v6226_v6 }
 0x2c4   :  { %v2350_v61 = vadd.f32 %v2349_v40, %v2285_v4  ;;  %2481 = vmatmul.f32.gmra.mxu2 %v1909_v44  ;;  %v2287_v40 = vpop.f32.mrf.mxu3 }
 0x2c5   :  { %2676 = vmatmul.f32.gmra.mxu1 %v1912_v1  ;;  %2846 = vmatpush.xpose.msra.mxu0 %v2019_v52 }
 0x2c6   :  { %v6415_v32 = vadd.f32 %v2414_v55, %v2350_v61  ;;  %v1393_v55 = vadd.f32 %v5764_v12, %v6220_v33  ;;  %v7352_v12 = vld [vmem:[#allocation81_spill] sm:$0xff]  ;;  %v1935_v61 = vmax.f32 %v1328_v63, 0.0  ;;  %2911 = vmatpush.xpose.msra.mxu1 %v2020_v51 }
 0x2c7   :  { %v2222_v43 = vpop.f32.mrf.mxu2  ;;  %v2355_v22 = vpop.f32.mrf.mxu0 }
 0x2c8   :  { %v2223_v17 = vadd.f32 %v2222_v43, %v2158_v29  ;;  %v1936_v4 = vmax.f32 %v1393_v55, 0.0  ;;  %v2018_v29 = vld [vmem:[%s7149_s5 + $0x50] sm:$0xff] }
 0x2c9   :  { %2549 = vmatmul.f32.gmra.mxu3 %v1923_v38  ;;  %v1526_v38 = vadd.f32 %v7355_v37, %v6234_v0 }
 0x2ca   :  { %v2288_v39 = vadd.f32 %v2287_v40, %v2223_v17  ;;  %v2420_v16 = vpop.f32.mrf.mxu1  ;;  %2614 = vmatmul.f32.gmra.mxu0 %v1924_v58  ;;  %v7354_v40 = vld [vmem:[#allocation85_spill] sm:$0xff]  ;;  %2781 = vmatpush.xpose.msra.mxu3 %v2018_v29  ;;  %v1949_v58 = vmax.f32 %v1396_v41, 0.0 }
 0x2cb   :  { %v1461_v53 = vadd.f32 %v7354_v40, %v6229_v28  ;;  %v1951_v18 = vmax.f32 %v1526_v38, 0.0  ;;  %v7360_v29 = vld [vmem:[#allocation93_spill] sm:$0xff]  ;;  %v2170_v38 = vadd.f32 %v6254_v14, %v6154_v57 }
 0x2cc   :  { %v2353_v27 = vadd.f32 %v2352_v35, %v2288_v39  ;;  %2484 = vmatmul.f32.gmra.mxu2 %v1922_v26  ;;  %v2290_v23 = vpop.f32.mrf.mxu3  ;;  %v1523_v35 = vadd.f32 %v7352_v12, %v6234_v0  ;;  %v7358_v12 = vld [vmem:[#allocation88_spill] sm:$0xff]  ;;  %v1402_v40 = vadd.f32 %v7360_v29, %v6220_v33  ;;  %v7364_v57 = vld [vmem:[#allocation97_spill] sm:$0xff] }
 0x2cd   :  { %2679 = vmatmul.f32.gmra.mxu1 %v1925_v31 }
 0x2ce   :  { %v6430_v47 = vadd.f32 %v2417_v42, %v2353_v27  ;;  %v1938_v13 = vmax.f32 %v1523_v35, 0.0  ;;  %v7353_v42 = vld [vmem:[#allocation38_spill] sm:$0xff]  ;;  %v1950_v27 = vmax.f32 %v1461_v53, 0.0  ;;  %v1464_v35 = vadd.f32 %v7358_v12, %v6229_v28 }
 0x2cf   :  { %v2225_v44 = vpop.f32.mrf.mxu2  ;;  %v2358_v1 = vpop.f32.mrf.mxu0  ;;  %v1331_v5 = vadd.f32 %v7353_v42, %v6226_v6  ;;  %v7361_v53 = vld [vmem:[#allocation46_spill] sm:$0xff] }
 0x2d0   :  { %v2226_v15 = vadd.f32 %v2225_v44, %v2161_v25  ;;  %v7357_v25 = vld [vmem:[#allocation42_spill] sm:$0xff]  ;;  %v2167_v44 = vadd.f32 %v6254_v14, %v6133_v7 }
 0x2d1   :  { %2552 = vmatmul.f32.gmra.mxu3 %v1936_v4  ;;  %v1948_v31 = vmax.f32 %v1331_v5, 0.0  ;;  %v1963_v5 = vmax.f32 %v1464_v35, 0.0  ;;  %v7365_v12 = vld [vmem:[#allocation50_spill] sm:$0xff] }
 0x2d2   :  { %v2291_v20 = vadd.f32 %v2290_v23, %v2226_v15  ;;  %v2423_v45 = vpop.f32.mrf.mxu1  ;;  %2617 = vmatmul.f32.gmra.mxu0 %v1937_v21  ;;  %v1334_v23 = vadd.f32 %v7357_v25, %v6226_v6  ;;  %v1340_v35 = vadd.f32 %v7365_v12, %v6226_v6 }
 0x2d4   :  { %v2356_v19 = vadd.f32 %v2355_v22, %v2291_v20  ;;  %2487 = vmatmul.f32.gmra.mxu2 %v1935_v61  ;;  %v2293_v43 = vpop.f32.mrf.mxu3  ;;  %v1961_v42 = vmax.f32 %v1334_v23, 0.0 }
 0x2d5   :  { %2682 = vmatmul.f32.gmra.mxu1 %v1938_v13 }
 0x2d6   :  { %v6451_v17 = vadd.f32 %v2420_v16, %v2356_v19  ;;  %v7356_v16 = vld [vmem:[#allocation89_spill] sm:$0xff] }
 0x2d7   :  { %v2228_v22 = vpop.f32.mrf.mxu2  ;;  %v2361_v39 = vpop.f32.mrf.mxu0  ;;  %v1399_v63 = vadd.f32 %v7356_v16, %v6220_v33 }
 0x2d8   :  { %v2229_v26 = vadd.f32 %v2228_v22, %v2164_v46  ;;  %v1337_v46 = vadd.f32 %v7361_v53, %v6226_v6 }
 0x2d9   :  { %2555 = vmatmul.f32.gmra.mxu3 %v1949_v58  ;;  %v1962_v13 = vmax.f32 %v1399_v63, 0.0  ;;  %v7363_v58 = vld [vmem:[#allocation90_spill] sm:$0xff] }
 0x2da   :  { %v2294_v55 = vadd.f32 %v2293_v43, %v2229_v26  ;;  %v2426_v24 = vpop.f32.mrf.mxu1  ;;  %2620 = vmatmul.f32.gmra.mxu0 %v1950_v27  ;;  %v7362_v43 = vld [vmem:[#allocation92_spill] sm:$0xff] }
 0x2db   :  { %v1467_v37 = vadd.f32 %v7362_v43, %v6229_v28  ;;  %v1473_v43 = vadd.f32 %v5884_v11, %v6229_v28 }
 0x2dc   :  { %v2359_v54 = vadd.f32 %v2358_v1, %v2294_v55  ;;  %2490 = vmatmul.f32.gmra.mxu2 %v1948_v31  ;;  %v2296_v15 = vpop.f32.mrf.mxu3  ;;  %v7359_v1 = vld [vmem:[#allocation86_spill] sm:$0xff]  ;;  %v1975_v55 = vmax.f32 %v1402_v40, 0.0 }
 0x2dd   :  { %2685 = vmatmul.f32.gmra.mxu1 %v1951_v18  ;;  %v1529_v61 = vadd.f32 %v7359_v1, %v6234_v0  ;;  %v1976_v16 = vmax.f32 %v1467_v37, 0.0  ;;  %v2173_v1 = vadd.f32 %v6254_v14, %v6175_v34  ;;  %v1408_v34 = vadd.f32 %v5888_v8, %v6220_v33 }
 0x2de   :  { %v6466_v4 = vadd.f32 %v2423_v45, %v2359_v54  ;;  %v1974_v54 = vmax.f32 %v1337_v46, 0.0  ;;  %v2176_v37 = vadd.f32 %v6254_v14, %v6193_v2  ;;  %v6510_v8 = vperm.slane %v6217_v9, 1 }
 0x2df   :  { %v2231_v21 = vpop.f32.mrf.mxu2  ;;  %v2364_v19 = vpop.f32.mrf.mxu0  ;;  %v1964_v7 = vmax.f32 %v1529_v61, 0.0  ;;  %v6516_v2 = vperm.slane %v6217_v9, 3 }
 0x2e0   :  { %v2232_v20 = vadd.f32 %v2231_v21, %v2167_v44  ;;  %v7366_v44 = vld [vmem:[#allocation96_spill] sm:$0xff] }
 0x2e1   :  { %2558 = vmatmul.f32.gmra.mxu3 %v1962_v13 }
 0x2e2   :  { %v2297_v41 = vadd.f32 %v2296_v15, %v2232_v20  ;;  %v2429_v62 = vpop.f32.mrf.mxu1  ;;  %2623 = vmatmul.f32.gmra.mxu0 %v1963_v5  ;;  %v1470_v15 = vadd.f32 %v7366_v44, %v6229_v28  ;;  %v7367_v20 = vld [vmem:[#allocation94_spill] sm:$0xff]  ;;  %v2002_v28 = vmax.f32 %v1473_v43, 0.0 }
 0x2e3   :  { %v1535_v13 = vadd.f32 %v7367_v20, %v6234_v0 }
 0x2e4   :  { %v2362_v45 = vadd.f32 %v2361_v39, %v2297_v41  ;;  %2493 = vmatmul.f32.gmra.mxu2 %v1961_v42  ;;  %v2299_v22 = vpop.f32.mrf.mxu3  ;;  %v1532_v39 = vadd.f32 %v7363_v58, %v6234_v0  ;;  %v1987_v41 = vmax.f32 %v1340_v35, 0.0  ;;  %v7369_v58 = vld [vmem:[#allocation98_spill] sm:$0xff]  ;;  %v7371_v35 = vld [vmem:[#allocation100_spill] sm:$0xff] }
 0x2e5   :  { %2688 = vmatmul.f32.gmra.mxu1 %v1964_v7  ;;  %v1989_v7 = vmax.f32 %v1470_v15, 0.0  ;;  %v1990_v40 = vmax.f32 %v1535_v13, 0.0 }
 0x2e6   :  { %v6481_v26 = vadd.f32 %v2426_v24, %v2362_v45  ;;  %v1977_v25 = vmax.f32 %v1532_v39, 0.0  ;;  %v1405_v24 = vadd.f32 %v7364_v57, %v6220_v33  ;;  %v1538_v39 = vadd.f32 %v7369_v58, %v6234_v0 }
 0x2e7   :  { %v2234_v31 = vpop.f32.mrf.mxu2  ;;  %v2367_v18 = vpop.f32.mrf.mxu0  ;;  %v2001_v33 = vmax.f32 %v1408_v34, 0.0  ;;  %v6519_v0 = vperm.slane %v6217_v9, 4  ;;  %v1688_v57 = vadd.f32 %v5909_v36, %v6516_v2 }
 0x2e8   :  { %v2235_v27 = vadd.f32 %v2234_v31, %v2170_v38  ;;  %v1988_v42 = vmax.f32 %v1405_v24, 0.0  ;;  %v2179_v24 = vadd.f32 %v6254_v14, %v6231_v56  ;;  %v7372_v14 = vld [vmem:[#allocation103_spill] sm:$0xff] }
 0x2e9   :  { %2561 = vmatmul.f32.gmra.mxu3 %v1975_v55  ;;  %v1753_v44 = vadd.f32 %v7371_v35, %v6519_v0  ;;  %v1811_v13 = vmax.f32 %v1688_v57, 0.0 }
 0x2ea   :  { %v2300_v63 = vadd.f32 %v2299_v22, %v2235_v27  ;;  %v2432_v52 = vpop.f32.mrf.mxu1  ;;  %2626 = vmatmul.f32.gmra.mxu0 %v1976_v16  ;;  %v2003_v16 = vmax.f32 %v1538_v39, 0.0 }
 0x2ec   :  { %v2365_v23 = vadd.f32 %v2364_v19, %v2300_v63  ;;  %2496 = vmatmul.f32.gmra.mxu2 %v1974_v54  ;;  %v2302_v61 = vpop.f32.mrf.mxu3 }
 0x2ed   :  { %2691 = vmatmul.f32.gmra.mxu1 %v1977_v25  ;;  %v7370_v25 = vld [vmem:[#allocation57_spill] sm:$0xff] }
 0x2ee   :  { %v6493_v21 = vadd.f32 %v2429_v62, %v2365_v23  ;;  %v7368_v62 = vld [vmem:[#allocation54_spill] sm:$0xff]  ;;  %v1558_v23 = vadd.f32 %v7370_v25, %v6510_v8 }
 0x2ef   :  { %v2237_v19 = vpop.f32.mrf.mxu2  ;;  %v2370_v5 = vpop.f32.mrf.mxu0  ;;  %v1343_v46 = vadd.f32 %v7368_v62, %v6226_v6  ;;  %v6513_v6 = vperm.slane %v6217_v9, 2 }
 0x2f0   :  { %v2238_v51 = vadd.f32 %v2237_v19, %v2173_v1  ;;  %v1809_v20 = vmax.f32 %v1558_v23, 0.0 }
 0x2f1   :  { %2564 = vmatmul.f32.gmra.mxu3 %v1988_v42  ;;  %v2000_v11 = vmax.f32 %v1343_v46, 0.0  ;;  %v1812_v42 = vmax.f32 %v1753_v44, 0.0  ;;  %v1626_v56 = vadd.f32 %v7372_v14, %v6513_v6 }
 0x2f2   :  { %v2303_v45 = vadd.f32 %v2302_v61, %v2238_v51  ;;  %v2435_v29 = vpop.f32.mrf.mxu1  ;;  %2629 = vmatmul.f32.gmra.mxu0 %v1989_v7  ;;  %v7374_v7 = vld [vmem:[#allocation102_spill] sm:$0xff] }
 0x2f3   :  { %v1823_v43 = vmax.f32 %v1626_v56, 0.0  ;;  %v7383_v56 = vld [vmem:[#allocation107_spill] sm:$0xff] }
 0x2f4   :  { %v2368_v53 = vadd.f32 %v2367_v18, %v2303_v45  ;;  %2499 = vmatmul.f32.gmra.mxu2 %v1987_v41  ;;  %v2305_v38 = vpop.f32.mrf.mxu3  ;;  %v1691_v45 = vadd.f32 %v7374_v7, %v6516_v2 }
 0x2f5   :  { %2694 = vmatmul.f32.gmra.mxu1 %v1990_v40 }
 0x2f6   :  { %v6505_v22 = vadd.f32 %v2432_v52, %v2368_v53  ;;  %v1623_v52 = vadd.f32 %v5913_v48, %v6513_v6  ;;  %v7375_v53 = vld [vmem:[#allocation101_spill] sm:$0xff]  ;;  %v1824_v58 = vmax.f32 %v1691_v45, 0.0 }
 0x2f7   :  { %v2240_v31 = vpop.f32.mrf.mxu2  ;;  %v2373_v55 = vpop.f32.mrf.mxu0  ;;  %v1756_v34 = vadd.f32 %v7375_v53, %v6519_v0 }
 0x2f8   :  { %v2241_v27 = vadd.f32 %v2240_v31, %v2176_v37  ;;  %v1810_v61 = vmax.f32 %v1623_v52, 0.0  ;;  %v7379_v52 = vld [vmem:[#allocation104_spill] sm:$0xff] }
 0x2f9   :  { %2567 = vmatmul.f32.gmra.mxu3 %v2001_v33  ;;  %v1759_v25 = vadd.f32 %v7379_v52, %v6519_v0 }
 0x2fa   :  { %v2306_v18 = vadd.f32 %v2305_v38, %v2241_v27  ;;  %v2438_v54 = vpop.f32.mrf.mxu1  ;;  %2632 = vmatmul.f32.gmra.mxu0 %v2002_v28  ;;  %v1825_v27 = vmax.f32 %v1756_v34, 0.0  ;;  %v7377_v28 = vld [vmem:[#allocation63_spill] sm:$0xff] }
 0x2fc   :  { %v2371_v63 = vadd.f32 %v2370_v5, %v2306_v18  ;;  %2502 = vmatmul.f32.gmra.mxu2 %v2000_v11  ;;  %v2308_v12 = vpop.f32.mrf.mxu3  ;;  %v7373_v5 = vld [vmem:[#allocation60_spill] sm:$0xff]  ;;  %v1564_v18 = vadd.f32 %v7377_v28, %v6510_v8 }
 0x2fd   :  { %2697 = vmatmul.f32.gmra.mxu1 %v2003_v16  ;;  %v1561_v41 = vadd.f32 %v7373_v5, %v6510_v8  ;;  %v1762_v5 = vadd.f32 %v7383_v56, %v6519_v0 }
 0x2fe   :  { %v6529_v9 = vadd.f32 %v2435_v29, %v2371_v63  ;;  %v1835_v35 = vmax.f32 %v1564_v18, 0.0 }
 0x2ff   :  { %v2243_v15 = vpop.f32.mrf.mxu2  ;;  %v2588_v48 = vpop.f32.mrf.mxu0  ;;  %v1822_v38 = vmax.f32 %v1561_v41, 0.0 }
 0x300   :  { %v2244_v1 = vadd.f32 %v2243_v15, %v2179_v24 }
 0x301   :  { %2782 = vmatmul.f32.vlgmr.msra.gmra.mxu3 %v1810_v61  ;;  %v1838_v61 = vmax.f32 %v1759_v25, 0.0 }
 0x302   :  { %v2309_v19 = vadd.f32 %v2308_v12, %v2244_v1  ;;  %v2653_v51 = vpop.f32.mrf.mxu1  ;;  %2847 = vmatmul.f32.vlgmr.msra.gmra.mxu0 %v1811_v13 }
 0x304   :  { %v2374_v36 = vadd.f32 %v2373_v55, %v2309_v19  ;;  %2717 = vmatmul.f32.vlgmr.msra.gmra.mxu2 %v1809_v20  ;;  %v2523_v29 = vpop.f32.mrf.mxu3  ;;  %v7376_v55 = vld [vmem:[#allocation106_spill] sm:$0xff]  ;;  %v7380_v20 = vld [vmem:[#allocation109_spill] sm:$0xff] }
 0x305   :  { %2912 = vmatmul.f32.vlgmr.msra.gmra.mxu1 %v1812_v42  ;;  %v1629_v11 = vadd.f32 %v7376_v55, %v6513_v6  ;;  %v1632_v13 = vadd.f32 %v7380_v20, %v6513_v6  ;;  %v7381_v19 = vld [vmem:[#allocation66_spill] sm:$0xff] }
 0x306   :  { %v6539_v40 = vadd.f32 %v2438_v54, %v2374_v36 }
 0x307   :  { %v2458_v62 = vpop.f32.mrf.mxu2  ;;  %v2591_v37 = vpop.f32.mrf.mxu0  ;;  %v1836_v24 = vmax.f32 %v1629_v11, 0.0  ;;  %v1849_v45 = vmax.f32 %v1632_v13, 0.0  ;;  %v7387_v11 = vld [vmem:[#allocation110_spill] sm:$0xff]  ;;  %v7391_v13 = vld [vmem:[#allocation113_spill] sm:$0xff] }
 0x308   :  { %v2459_v46 = vadd.f32 %v2458_v62, %v6286_v60  ;;  %v7378_v60 = vld [vmem:[#allocation105_spill] sm:$0xff]  ;;  %v1765_v28 = vadd.f32 %v7387_v11, %v6519_v0 }
 0x309   :  { %2785 = vmatmul.f32.gmra.mxu3 %v1823_v43  ;;  %v1694_v54 = vadd.f32 %v7378_v60, %v6516_v2  ;;  %v1851_v43 = vmax.f32 %v1762_v5, 0.0 }
 0x30a   :  { %v2524_v39 = vadd.f32 %v2523_v29, %v2459_v46  ;;  %v2656_v31 = vpop.f32.mrf.mxu1  ;;  %2850 = vmatmul.f32.gmra.mxu0 %v1824_v58 }
 0x30b   :  { %v1837_v44 = vmax.f32 %v1694_v54, 0.0 }
 0x30c   :  { %v2589_v33 = vadd.f32 %v2588_v48, %v2524_v39  ;;  %2720 = vmatmul.f32.gmra.mxu2 %v1822_v38  ;;  %v2526_v16 = vpop.f32.mrf.mxu3  ;;  %v7384_v38 = vld [vmem:[#allocation112_spill] sm:$0xff]  ;;  %v7385_v39 = vld [vmem:[#allocation69_spill] sm:$0xff] }
 0x30d   :  { %2915 = vmatmul.f32.gmra.mxu1 %v1825_v27  ;;  %v1635_v58 = vadd.f32 %v7384_v38, %v6513_v6 }
 0x30e   :  { %v6550_v63 = vadd.f32 %v2653_v51, %v2589_v33  ;;  %v1567_v51 = vadd.f32 %v7381_v19, %v6510_v8  ;;  %v1768_v19 = vadd.f32 %v7391_v13, %v6519_v0 }
 0x30f   :  { %v2461_v23 = vpop.f32.mrf.mxu2  ;;  %v2594_v12 = vpop.f32.mrf.mxu0  ;;  %v1862_v54 = vmax.f32 %v1635_v58, 0.0  ;;  %v7395_v58 = vld [vmem:[#allocation116_spill] sm:$0xff] }
 0x310   :  { %v2462_v57 = vadd.f32 %v2461_v23, %v6307_v10  ;;  %v7382_v10 = vld [vmem:[#allocation108_spill] sm:$0xff]  ;;  %v1848_v53 = vmax.f32 %v1567_v51, 0.0 }
 0x311   :  { %2788 = vmatmul.f32.gmra.mxu3 %v1836_v24  ;;  %v1697_v42 = vadd.f32 %v7382_v10, %v6516_v2  ;;  %v1864_v24 = vmax.f32 %v1765_v28, 0.0 }
 0x312   :  { %v2527_v15 = vadd.f32 %v2526_v16, %v2462_v57  ;;  %v2659_v1 = vpop.f32.mrf.mxu1  ;;  %2853 = vmatmul.f32.gmra.mxu0 %v1837_v44 }
 0x313   :  { %v1850_v34 = vmax.f32 %v1697_v42, 0.0 }
 0x314   :  { %v2592_v48 = vadd.f32 %v2591_v37, %v2527_v15  ;;  %2723 = vmatmul.f32.gmra.mxu2 %v1835_v35  ;;  %v2529_v36 = vpop.f32.mrf.mxu3  ;;  %v7388_v35 = vld [vmem:[#allocation115_spill] sm:$0xff]  ;;  %v7389_v15 = vld [vmem:[#allocation72_spill] sm:$0xff] }
 0x315   :  { %2918 = vmatmul.f32.gmra.mxu1 %v1838_v61  ;;  %v1638_v44 = vadd.f32 %v7388_v35, %v6513_v6 }
 0x316   :  { %v6561_v14 = vadd.f32 %v2656_v31, %v2592_v48  ;;  %v1570_v31 = vadd.f32 %v7385_v39, %v6510_v8  ;;  %v1771_v39 = vadd.f32 %v7395_v58, %v6519_v0 }
 0x317   :  { %v2464_v41 = vpop.f32.mrf.mxu2  ;;  %v2597_v29 = vpop.f32.mrf.mxu0  ;;  %v1875_v42 = vmax.f32 %v1638_v44, 0.0  ;;  %v7399_v44 = vld [vmem:[#allocation22_spill] sm:$0xff] }
 0x318   :  { %v2465_v7 = vadd.f32 %v2464_v41, %v6322_v50  ;;  %v7386_v50 = vld [vmem:[#allocation111_spill] sm:$0xff]  ;;  %v1861_v52 = vmax.f32 %v1570_v31, 0.0 }
 0x319   :  { %2791 = vmatmul.f32.gmra.mxu3 %v1849_v45  ;;  %v1700_v27 = vadd.f32 %v7386_v50, %v6516_v2  ;;  %v1877_v45 = vmax.f32 %v1768_v19, 0.0 }
 0x31a   :  { %v2530_v62 = vadd.f32 %v2529_v36, %v2465_v7  ;;  %v2662_v46 = vpop.f32.mrf.mxu1  ;;  %2856 = vmatmul.f32.gmra.mxu0 %v1850_v34 }
 0x31b   :  { %v1863_v25 = vmax.f32 %v1700_v27, 0.0 }
 0x31c   :  { %v2595_v37 = vadd.f32 %v2594_v12, %v2530_v62  ;;  %2726 = vmatmul.f32.gmra.mxu2 %v1848_v53  ;;  %v2532_v33 = vpop.f32.mrf.mxu3  ;;  %v7392_v53 = vld [vmem:[#allocation24_spill] sm:$0xff]  ;;  %v7393_v62 = vld [vmem:[#allocation75_spill] sm:$0xff] }
 0x31d   :  { %2921 = vmatmul.f32.gmra.mxu1 %v1851_v43  ;;  %v1641_v34 = vadd.f32 %v7392_v53, %v6513_v6 }
 0x31e   :  { %v6572_v55 = vadd.f32 %v2659_v1, %v2595_v37  ;;  %v1573_v1 = vadd.f32 %v7389_v15, %v6510_v8  ;;  %v1774_v15 = vadd.f32 %v7399_v44, %v6519_v0 }
 0x31f   :  { %v2467_v18 = vpop.f32.mrf.mxu2  ;;  %v2600_v16 = vpop.f32.mrf.mxu0  ;;  %v1888_v27 = vmax.f32 %v1641_v34, 0.0  ;;  %v7403_v34 = vld [vmem:[#allocation25_spill] sm:$0xff] }
 0x320   :  { %v2468_v60 = vadd.f32 %v2467_v18, %v6343_v3  ;;  %v7390_v3 = vld [vmem:[#allocation114_spill] sm:$0xff]  ;;  %v1874_v56 = vmax.f32 %v1573_v1, 0.0 }
 0x321   :  { %2794 = vmatmul.f32.gmra.mxu3 %v1862_v54  ;;  %v1703_v61 = vadd.f32 %v7390_v3, %v6516_v2  ;;  %v1890_v54 = vmax.f32 %v1771_v39, 0.0 }
 0x322   :  { %v2533_v23 = vadd.f32 %v2532_v33, %v2468_v60  ;;  %v2665_v57 = vpop.f32.mrf.mxu1  ;;  %2859 = vmatmul.f32.gmra.mxu0 %v1863_v25 }
 0x323   :  { %v1876_v5 = vmax.f32 %v1703_v61, 0.0 }
 0x324   :  { %v2598_v12 = vadd.f32 %v2597_v29, %v2533_v23  ;;  %2729 = vmatmul.f32.gmra.mxu2 %v1861_v52  ;;  %v2535_v48 = vpop.f32.mrf.mxu3  ;;  %v7396_v52 = vld [vmem:[#allocation27_spill] sm:$0xff]  ;;  %v7397_v23 = vld [vmem:[#allocation76_spill] sm:$0xff] }
 0x325   :  { %2924 = vmatmul.f32.gmra.mxu1 %v1864_v24  ;;  %v1644_v25 = vadd.f32 %v7396_v52, %v6513_v6 }
 0x326   :  { %v6583_v20 = vadd.f32 %v2662_v46, %v2598_v12  ;;  %v1576_v46 = vadd.f32 %v7393_v62, %v6510_v8  ;;  %v1777_v62 = vadd.f32 %v7403_v34, %v6519_v0 }
 0x327   :  { %v2470_v51 = vpop.f32.mrf.mxu2  ;;  %v2603_v36 = vpop.f32.mrf.mxu0  ;;  %v1901_v61 = vmax.f32 %v1644_v25, 0.0  ;;  %v7407_v25 = vld [vmem:[#allocation31_spill] sm:$0xff] }
 0x328   :  { %v2471_v10 = vadd.f32 %v2470_v51, %v6358_v59  ;;  %v7394_v59 = vld [vmem:[#allocation13_spill] sm:$0xff]  ;;  %v1887_v11 = vmax.f32 %v1576_v46, 0.0 }
 0x329   :  { %2797 = vmatmul.f32.gmra.mxu3 %v1875_v42  ;;  %v1706_v43 = vadd.f32 %v7394_v59, %v6516_v2  ;;  %v1903_v42 = vmax.f32 %v1774_v15, 0.0 }
 0x32a   :  { %v2536_v41 = vadd.f32 %v2535_v48, %v2471_v10  ;;  %v2668_v7 = vpop.f32.mrf.mxu1  ;;  %2862 = vmatmul.f32.gmra.mxu0 %v1876_v5 }
 0x32b   :  { %v1889_v28 = vmax.f32 %v1706_v43, 0.0 }
 0x32c   :  { %v2601_v29 = vadd.f32 %v2600_v16, %v2536_v41  ;;  %2732 = vmatmul.f32.gmra.mxu2 %v1874_v56  ;;  %v2538_v37 = vpop.f32.mrf.mxu3  ;;  %v7400_v56 = vld [vmem:[#allocation32_spill] sm:$0xff]  ;;  %v7401_v41 = vld [vmem:[#allocation78_spill] sm:$0xff] }
 0x32d   :  { %2927 = vmatmul.f32.gmra.mxu1 %v1877_v45  ;;  %v1647_v5 = vadd.f32 %v7400_v56, %v6513_v6 }
 0x32e   :  { %v6594_v38 = vadd.f32 %v2665_v57, %v2601_v29  ;;  %v1579_v57 = vadd.f32 %v7397_v23, %v6510_v8  ;;  %v1780_v23 = vadd.f32 %v7407_v25, %v6519_v0 }
 0x32f   :  { %v2473_v31 = vpop.f32.mrf.mxu2  ;;  %v2606_v33 = vpop.f32.mrf.mxu0  ;;  %v1914_v43 = vmax.f32 %v1647_v5, 0.0  ;;  %v7411_v5 = vld [vmem:[#allocation36_spill] sm:$0xff] }
 0x330   :  { %v2474_v50 = vadd.f32 %v2473_v31, %v6379_v30  ;;  %v7398_v30 = vld [vmem:[#allocation28_spill] sm:$0xff]  ;;  %v1900_v13 = vmax.f32 %v1579_v57, 0.0 }
 0x331   :  { %2800 = vmatmul.f32.gmra.mxu3 %v1888_v27  ;;  %v1709_v24 = vadd.f32 %v7398_v30, %v6516_v2  ;;  %v1916_v27 = vmax.f32 %v1777_v62, 0.0 }
 0x332   :  { %v2539_v18 = vadd.f32 %v2538_v37, %v2474_v50  ;;  %v2671_v60 = vpop.f32.mrf.mxu1  ;;  %2865 = vmatmul.f32.gmra.mxu0 %v1889_v28 }
 0x333   :  { %v1902_v19 = vmax.f32 %v1709_v24, 0.0 }
 0x334   :  { %v2604_v16 = vadd.f32 %v2603_v36, %v2539_v18  ;;  %2735 = vmatmul.f32.gmra.mxu2 %v1887_v11  ;;  %v2541_v12 = vpop.f32.mrf.mxu3  ;;  %v7404_v11 = vld [vmem:[#allocation7_spill] sm:$0xff]  ;;  %v7405_v18 = vld [vmem:[#allocation80_spill] sm:$0xff] }
 0x335   :  { %2930 = vmatmul.f32.gmra.mxu1 %v1890_v54  ;;  %v1650_v28 = vadd.f32 %v7404_v11, %v6513_v6 }
 0x336   :  { %v6605_v35 = vadd.f32 %v2668_v7, %v2604_v16  ;;  %v1582_v7 = vadd.f32 %v7401_v41, %v6510_v8  ;;  %v1783_v41 = vadd.f32 %v7411_v5, %v6519_v0 }
 0x337   :  { %v2476_v1 = vpop.f32.mrf.mxu2  ;;  %v2609_v48 = vpop.f32.mrf.mxu0  ;;  %v1927_v24 = vmax.f32 %v1650_v28, 0.0  ;;  %v7415_v28 = vld [vmem:[#allocation8_spill] sm:$0xff] }
 0x338   :  { %v2477_v3 = vadd.f32 %v2476_v1, %v6394_v49  ;;  %v7402_v49 = vld [vmem:[#allocation6_spill] sm:$0xff]  ;;  %v1913_v58 = vmax.f32 %v1582_v7, 0.0 }
 0x339   :  { %2803 = vmatmul.f32.gmra.mxu3 %v1901_v61  ;;  %v1712_v45 = vadd.f32 %v7402_v49, %v6516_v2  ;;  %v1929_v61 = vmax.f32 %v1780_v23, 0.0 }
 0x33a   :  { %v2542_v51 = vadd.f32 %v2541_v12, %v2477_v3  ;;  %v2674_v10 = vpop.f32.mrf.mxu1  ;;  %2868 = vmatmul.f32.gmra.mxu0 %v1902_v19 }
 0x33b   :  { %v1915_v39 = vmax.f32 %v1712_v45, 0.0 }
 0x33c   :  { %v2607_v36 = vadd.f32 %v2606_v33, %v2542_v51  ;;  %2738 = vmatmul.f32.gmra.mxu2 %v1900_v13  ;;  %v2544_v29 = vpop.f32.mrf.mxu3  ;;  %v7408_v13 = vld [vmem:[#allocation33_spill] sm:$0xff]  ;;  %v7409_v51 = vld [vmem:[#allocation82_spill] sm:$0xff] }
 0x33d   :  { %2933 = vmatmul.f32.gmra.mxu1 %v1903_v42  ;;  %v1653_v19 = vadd.f32 %v7408_v13, %v6513_v6 }
 0x33e   :  { %v6616_v53 = vadd.f32 %v2671_v60, %v2607_v36  ;;  %v1585_v60 = vadd.f32 %v7405_v18, %v6510_v8  ;;  %v1786_v18 = vadd.f32 %v7415_v28, %v6519_v0 }
 0x33f   :  { %v2479_v46 = vpop.f32.mrf.mxu2  ;;  %v2612_v37 = vpop.f32.mrf.mxu0  ;;  %v1940_v45 = vmax.f32 %v1653_v19, 0.0  ;;  %v7419_v19 = vld [vmem:[#allocation37_spill] sm:$0xff] }
 0x340   :  { %v2480_v59 = vadd.f32 %v2479_v46, %v6415_v32  ;;  %v7406_v32 = vld [vmem:[#allocation29_spill] sm:$0xff]  ;;  %v1926_v44 = vmax.f32 %v1585_v60, 0.0 }
 0x341   :  { %2806 = vmatmul.f32.gmra.mxu3 %v1914_v43  ;;  %v1715_v54 = vadd.f32 %v7406_v32, %v6516_v2  ;;  %v1942_v43 = vmax.f32 %v1783_v41, 0.0 }
 0x342   :  { %v2545_v31 = vadd.f32 %v2544_v29, %v2480_v59  ;;  %v2677_v50 = vpop.f32.mrf.mxu1  ;;  %2871 = vmatmul.f32.gmra.mxu0 %v1915_v39 }
 0x343   :  { %v1928_v15 = vmax.f32 %v1715_v54, 0.0 }
 0x344   :  { %v2610_v33 = vadd.f32 %v2609_v48, %v2545_v31  ;;  %2741 = vmatmul.f32.gmra.mxu2 %v1913_v58  ;;  %v2547_v16 = vpop.f32.mrf.mxu3  ;;  %v7412_v58 = vld [vmem:[#allocation39_spill] sm:$0xff]  ;;  %v7413_v31 = vld [vmem:[#allocation84_spill] sm:$0xff] }
 0x345   :  { %2936 = vmatmul.f32.gmra.mxu1 %v1916_v27  ;;  %v1656_v39 = vadd.f32 %v7412_v58, %v6513_v6 }
 0x346   :  { %v6627_v52 = vadd.f32 %v2674_v10, %v2610_v33  ;;  %v1588_v10 = vadd.f32 %v7409_v51, %v6510_v8  ;;  %v1789_v51 = vadd.f32 %v7419_v19, %v6519_v0 }
 0x347   :  { %v2482_v57 = vpop.f32.mrf.mxu2  ;;  %v2615_v12 = vpop.f32.mrf.mxu0  ;;  %v1953_v54 = vmax.f32 %v1656_v39, 0.0  ;;  %v7423_v39 = vld [vmem:[#allocation43_spill] sm:$0xff] }
 0x348   :  { %v2483_v30 = vadd.f32 %v2482_v57, %v6430_v47  ;;  %v7410_v47 = vld [vmem:[#allocation35_spill] sm:$0xff]  ;;  %v1939_v34 = vmax.f32 %v1588_v10, 0.0 }
 0x349   :  { %2809 = vmatmul.f32.gmra.mxu3 %v1927_v24  ;;  %v1718_v42 = vadd.f32 %v7410_v47, %v6516_v2  ;;  %v1955_v24 = vmax.f32 %v1786_v18, 0.0 }
 0x34a   :  { %v2548_v1 = vadd.f32 %v2547_v16, %v2483_v30  ;;  %v2680_v3 = vpop.f32.mrf.mxu1  ;;  %2874 = vmatmul.f32.gmra.mxu0 %v1928_v15 }
 0x34b   :  { %v1941_v62 = vmax.f32 %v1718_v42, 0.0 }
 0x34c   :  { %v2613_v48 = vadd.f32 %v2612_v37, %v2548_v1  ;;  %2744 = vmatmul.f32.gmra.mxu2 %v1926_v44  ;;  %v2550_v36 = vpop.f32.mrf.mxu3  ;;  %v7416_v44 = vld [vmem:[#allocation44_spill] sm:$0xff]  ;;  %v7417_v1 = vld [vmem:[#allocation87_spill] sm:$0xff] }
 0x34d   :  { %2939 = vmatmul.f32.gmra.mxu1 %v1929_v61  ;;  %v1659_v15 = vadd.f32 %v7416_v44, %v6513_v6 }
 0x34e   :  { %v6638_v56 = vadd.f32 %v2677_v50, %v2613_v48  ;;  %v1591_v50 = vadd.f32 %v7413_v31, %v6510_v8  ;;  %v1792_v31 = vadd.f32 %v7423_v39, %v6519_v0 }
 0x34f   :  { %v2485_v7 = vpop.f32.mrf.mxu2  ;;  %v2618_v29 = vpop.f32.mrf.mxu0  ;;  %v1966_v42 = vmax.f32 %v1659_v15, 0.0  ;;  %v7427_v15 = vld [vmem:[#allocation48_spill] sm:$0xff] }
 0x350   :  { %v2486_v49 = vadd.f32 %v2485_v7, %v6451_v17  ;;  %v7414_v17 = vld [vmem:[#allocation40_spill] sm:$0xff]  ;;  %v1952_v25 = vmax.f32 %v1591_v50, 0.0 }
 0x351   :  { %2812 = vmatmul.f32.gmra.mxu3 %v1940_v45  ;;  %v1721_v27 = vadd.f32 %v7414_v17, %v6516_v2  ;;  %v1968_v45 = vmax.f32 %v1789_v51, 0.0 }
 0x352   :  { %v2551_v46 = vadd.f32 %v2550_v36, %v2486_v49  ;;  %v2683_v59 = vpop.f32.mrf.mxu1  ;;  %2877 = vmatmul.f32.gmra.mxu0 %v1941_v62 }
 0x353   :  { %v1954_v23 = vmax.f32 %v1721_v27, 0.0 }
 0x354   :  { %v2616_v37 = vadd.f32 %v2615_v12, %v2551_v46  ;;  %2747 = vmatmul.f32.gmra.mxu2 %v1939_v34  ;;  %v2553_v33 = vpop.f32.mrf.mxu3  ;;  %v7420_v34 = vld [vmem:[#allocation10_spill] sm:$0xff]  ;;  %v7421_v46 = vld [vmem:[#allocation91_spill] sm:$0xff] }
 0x355   :  { %2942 = vmatmul.f32.gmra.mxu1 %v1942_v43  ;;  %v1662_v62 = vadd.f32 %v7420_v34, %v6513_v6 }
 0x356   :  { %v6649_v11 = vadd.f32 %v2680_v3, %v2616_v37  ;;  %v1594_v3 = vadd.f32 %v7417_v1, %v6510_v8  ;;  %v1795_v1 = vadd.f32 %v7427_v15, %v6519_v0 }
 0x357   :  { %v2488_v60 = vpop.f32.mrf.mxu2  ;;  %v2621_v16 = vpop.f32.mrf.mxu0  ;;  %v1979_v27 = vmax.f32 %v1662_v62, 0.0  ;;  %v7431_v62 = vld [vmem:[#allocation11_spill] sm:$0xff] }
 0x358   :  { %v2489_v32 = vadd.f32 %v2488_v60, %v6466_v4  ;;  %v7418_v4 = vld [vmem:[#allocation9_spill] sm:$0xff]  ;;  %v1965_v5 = vmax.f32 %v1594_v3, 0.0 }
 0x359   :  { %2815 = vmatmul.f32.gmra.mxu3 %v1953_v54  ;;  %v1724_v61 = vadd.f32 %v7418_v4, %v6516_v2  ;;  %v1981_v54 = vmax.f32 %v1792_v31, 0.0 }
 0x35a   :  { %v2554_v57 = vadd.f32 %v2553_v33, %v2489_v32  ;;  %v2686_v30 = vpop.f32.mrf.mxu1  ;;  %2880 = vmatmul.f32.gmra.mxu0 %v1954_v23 }
 0x35b   :  { %v1967_v41 = vmax.f32 %v1724_v61, 0.0 }
 0x35c   :  { %v2619_v12 = vadd.f32 %v2618_v29, %v2554_v57  ;;  %2750 = vmatmul.f32.gmra.mxu2 %v1952_v25  ;;  %v2556_v48 = vpop.f32.mrf.mxu3  ;;  %v7424_v25 = vld [vmem:[#allocation45_spill] sm:$0xff]  ;;  %v7425_v57 = vld [vmem:[#allocation95_spill] sm:$0xff] }
 0x35d   :  { %2945 = vmatmul.f32.gmra.mxu1 %v1955_v24  ;;  %v1665_v23 = vadd.f32 %v7424_v25, %v6513_v6 }
 0x35e   :  { %v6660_v13 = vadd.f32 %v2683_v59, %v2619_v12  ;;  %v1597_v59 = vadd.f32 %v7421_v46, %v6510_v8  ;;  %v1798_v46 = vadd.f32 %v7431_v62, %v6519_v0 }
 0x35f   :  { %v2491_v10 = vpop.f32.mrf.mxu2  ;;  %v2624_v36 = vpop.f32.mrf.mxu0  ;;  %v1992_v61 = vmax.f32 %v1665_v23, 0.0 }
 0x360   :  { %v2492_v47 = vadd.f32 %v2491_v10, %v6481_v26  ;;  %v7422_v26 = vld [vmem:[#allocation41_spill] sm:$0xff]  ;;  %v1978_v28 = vmax.f32 %v1597_v59, 0.0 }
 0x361   :  { %2818 = vmatmul.f32.gmra.mxu3 %v1966_v42  ;;  %v1727_v43 = vadd.f32 %v7422_v26, %v6516_v2  ;;  %v1994_v42 = vmax.f32 %v1795_v1, 0.0 }
 0x362   :  { %v2557_v7 = vadd.f32 %v2556_v48, %v2492_v47  ;;  %v2689_v49 = vpop.f32.mrf.mxu1  ;;  %2883 = vmatmul.f32.gmra.mxu0 %v1967_v41 }
 0x363   :  { %v1980_v18 = vmax.f32 %v1727_v43, 0.0 }
 0x364   :  { %v2622_v29 = vadd.f32 %v2621_v16, %v2557_v7  ;;  %2753 = vmatmul.f32.gmra.mxu2 %v1965_v5  ;;  %v2559_v37 = vpop.f32.mrf.mxu3  ;;  %v7428_v5 = vld [vmem:[#allocation51_spill] sm:$0xff] }
 0x365   :  { %2948 = vmatmul.f32.gmra.mxu1 %v1968_v45  ;;  %v1668_v41 = vadd.f32 %v7428_v5, %v6513_v6  ;;  %v7429_v7 = vld [vmem:[#allocation99_spill] sm:$0xff] }
 0x366   :  { %v6671_v58 = vadd.f32 %v2686_v30, %v2622_v29  ;;  %v1600_v30 = vadd.f32 %v7425_v57, %v6510_v8 }
 0x367   :  { %v2494_v50 = vpop.f32.mrf.mxu2  ;;  %v2627_v33 = vpop.f32.mrf.mxu0  ;;  %v2005_v43 = vmax.f32 %v1668_v41, 0.0 }
 0x368   :  { %v2495_v17 = vadd.f32 %v2494_v50, %v6493_v21  ;;  %v7426_v21 = vld [vmem:[#allocation47_spill] sm:$0xff]  ;;  %v1991_v19 = vmax.f32 %v1600_v30, 0.0 }
 0x369   :  { %2821 = vmatmul.f32.gmra.mxu3 %v1979_v27  ;;  %v1730_v24 = vadd.f32 %v7426_v21, %v6516_v2 }
 0x36a   :  { %v2560_v60 = vadd.f32 %v2559_v37, %v2495_v17  ;;  %v2692_v32 = vpop.f32.mrf.mxu1  ;;  %2886 = vmatmul.f32.gmra.mxu0 %v1980_v18  ;;  %v2007_v17 = vmax.f32 %v1798_v46, 0.0 }
 0x36b   :  { %v1993_v51 = vmax.f32 %v1730_v24, 0.0 }
 0x36c   :  { %v2625_v16 = vadd.f32 %v2624_v36, %v2560_v60  ;;  %2756 = vmatmul.f32.gmra.mxu2 %v1978_v28  ;;  %v2562_v12 = vpop.f32.mrf.mxu3 }
 0x36d   :  { %2951 = vmatmul.f32.gmra.mxu1 %v1981_v54 }
 0x36e   :  { %v6682_v44 = vadd.f32 %v2689_v49, %v2625_v16  ;;  %v1603_v49 = vadd.f32 %v7429_v7, %v6510_v8 }
 0x36f   :  { %v2497_v3 = vpop.f32.mrf.mxu2  ;;  %v2630_v48 = vpop.f32.mrf.mxu0 }
 0x370   :  { %v2498_v4 = vadd.f32 %v2497_v3, %v6505_v22  ;;  %v7430_v22 = vld [vmem:[#allocation52_spill] sm:$0xff]  ;;  %v2004_v39 = vmax.f32 %v1603_v49, 0.0 }
 0x371   :  { %2824 = vmatmul.f32.gmra.mxu3 %v1992_v61  ;;  %v1733_v45 = vadd.f32 %v7430_v22, %v6516_v2 }
 0x372   :  { %v2563_v10 = vadd.f32 %v2562_v12, %v2498_v4  ;;  %v2695_v47 = vpop.f32.mrf.mxu1  ;;  %2889 = vmatmul.f32.gmra.mxu0 %v1993_v51 }
 0x373   :  { %v2006_v6 = vmax.f32 %v1733_v45, 0.0 }
 0x374   :  { %v2628_v36 = vadd.f32 %v2627_v33, %v2563_v10  ;;  %2759 = vmatmul.f32.gmra.mxu2 %v1991_v19  ;;  %v2565_v29 = vpop.f32.mrf.mxu3 }
 0x375   :  { %2954 = vmatmul.f32.gmra.mxu1 %v1994_v42 }
 0x376   :  { %v6693_v34 = vadd.f32 %v2692_v32, %v2628_v36 }
 0x377   :  { %v2500_v59 = vpop.f32.mrf.mxu2  ;;  %v2633_v37 = vpop.f32.mrf.mxu0 }
 0x378   :  { %v2501_v26 = vadd.f32 %v2500_v59, %v6529_v9 }
 0x379   :  { %2827 = vmatmul.f32.gmra.mxu3 %v2005_v43 }
 0x37a   :  { %v2566_v31 = vadd.f32 %v2565_v29, %v2501_v26  ;;  %v2698_v50 = vpop.f32.mrf.mxu1  ;;  %2892 = vmatmul.f32.gmra.mxu0 %v2006_v6 }
 0x37c   :  { %v2631_v8 = vadd.f32 %v2630_v48, %v2566_v31  ;;  %2762 = vmatmul.f32.gmra.mxu2 %v2004_v39  ;;  %v2568_v2 = vpop.f32.mrf.mxu3 }
 0x37d   :  { %2957 = vmatmul.f32.gmra.mxu1 %v2007_v17 }
 0x37e   :  { %v6698_v27 = vadd.f32 %v2695_v47, %v2631_v8 }
 0x37f   :  { %v2503_v33 = vpop.f32.mrf.mxu2  ;;  %v2848_v28 = vpop.f32.mrf.mxu0 }
 0x380   :  { %v2504_v0 = vadd.f32 %v2503_v33, %v6539_v40 }
 0x382   :  { %v2569_v9 = vadd.f32 %v2568_v2, %v2504_v0  ;;  %v2913_v18 = vpop.f32.mrf.mxu1 }
 0x384   :  { %v2634_v60 = vadd.f32 %v2633_v37, %v2569_v9  ;;  %v2783_v32 = vpop.f32.mrf.mxu3 }
 0x386   :  { %v6701_v54 = vadd.f32 %v2698_v50, %v2634_v60 }
 0x387   :  { %v2718_v16 = vpop.f32.mrf.mxu2  ;;  %v2851_v23 = vpop.f32.mrf.mxu0 }
 0x388   :  { %v2719_v25 = vadd.f32 %v2718_v16, %v6550_v63 }
 0x38a   :  { %v2784_v57 = vadd.f32 %v2783_v32, %v2719_v25  ;;  %v2916_v30 = vpop.f32.mrf.mxu1 }
 0x38c   :  { %v2849_v21 = vadd.f32 %v2848_v28, %v2784_v57  ;;  %v2786_v12 = vpop.f32.mrf.mxu3 }
 0x38e   :  { %v6704_v24 = vadd.f32 %v2913_v18, %v2849_v21 }
 0x38f   :  { %v2721_v15 = vpop.f32.mrf.mxu2  ;;  %v2854_v1 = vpop.f32.mrf.mxu0 }
 0x390   :  { %v2722_v40 = vadd.f32 %v2721_v15, %v6561_v14 }
 0x392   :  { %v2787_v3 = vadd.f32 %v2786_v12, %v2722_v40  ;;  %v2919_v4 = vpop.f32.mrf.mxu1 }
 0x394   :  { %v2852_v61 = vadd.f32 %v2851_v23, %v2787_v3  ;;  %v2789_v19 = vpop.f32.mrf.mxu3 }
 0x396   :  { %v6707_v48 = vadd.f32 %v2916_v30, %v2852_v61 }
 0x397   :  { %v2724_v51 = vpop.f32.mrf.mxu2  ;;  %v2857_v10 = vpop.f32.mrf.mxu0 }
 0x398   :  { %v2725_v63 = vadd.f32 %v2724_v51, %v6572_v55 }
 0x39a   :  { %v2790_v47 = vadd.f32 %v2789_v19, %v2725_v63  ;;  %v2922_v42 = vpop.f32.mrf.mxu1 }
 0x39c   :  { %v2855_v36 = vadd.f32 %v2854_v1, %v2790_v47  ;;  %v2792_v41 = vpop.f32.mrf.mxu3 }
 0x39e   :  { %v6710_v5 = vadd.f32 %v2919_v4, %v2855_v36 }
 0x39f   :  { %v2727_v7 = vpop.f32.mrf.mxu2  ;;  %v2860_v49 = vpop.f32.mrf.mxu0 }
 0x3a0   :  { %v2728_v14 = vadd.f32 %v2727_v7, %v6583_v20 }
 0x3a2   :  { %v2793_v22 = vadd.f32 %v2792_v41, %v2728_v14  ;;  %v2925_v45 = vpop.f32.mrf.mxu1 }
 0x3a4   :  { %v2858_v29 = vadd.f32 %v2857_v10, %v2793_v22  ;;  %v2795_v46 = vpop.f32.mrf.mxu3 }
 0x3a6   :  { %v6713_v62 = vadd.f32 %v2922_v42, %v2858_v29 }
 0x3a7   :  { %v2730_v59 = vpop.f32.mrf.mxu2  ;;  %v2863_v26 = vpop.f32.mrf.mxu0 }
 0x3a8   :  { %v2731_v55 = vadd.f32 %v2730_v59, %v6594_v38 }
 0x3aa   :  { %v2796_v43 = vadd.f32 %v2795_v46, %v2731_v55  ;;  %v2928_v37 = vpop.f32.mrf.mxu1 }
 0x3ac   :  { %v2861_v39 = vadd.f32 %v2860_v49, %v2796_v43  ;;  %v2798_v31 = vpop.f32.mrf.mxu3 }
 0x3ae   :  { %v6716_v6 = vadd.f32 %v2925_v45, %v2861_v39 }
 0x3af   :  { %v2733_v50 = vpop.f32.mrf.mxu2  ;;  %v2866_v17 = vpop.f32.mrf.mxu0 }
 0x3b0   :  { %v2734_v20 = vadd.f32 %v2733_v50, %v6605_v35 }
 0x3b2   :  { %v2799_v8 = vadd.f32 %v2798_v31, %v2734_v20  ;;  %v2931_v2 = vpop.f32.mrf.mxu1 }
 0x3b4   :  { %v2864_v33 = vadd.f32 %v2863_v26, %v2799_v8  ;;  %v2801_v28 = vpop.f32.mrf.mxu3 }
 0x3b6   :  { %v6719_v0 = vadd.f32 %v2928_v37, %v2864_v33 }
 0x3b7   :  { %v2736_v9 = vpop.f32.mrf.mxu2  ;;  %v2869_v18 = vpop.f32.mrf.mxu0 }
 0x3b8   :  { %v2737_v38 = vadd.f32 %v2736_v9, %v6616_v53 }
 0x3ba   :  { %v2802_v60 = vadd.f32 %v2801_v28, %v2737_v38  ;;  %v2934_v32 = vpop.f32.mrf.mxu1 }
 0x3bc   :  { %v2867_v16 = vadd.f32 %v2866_v17, %v2802_v60  ;;  %v2804_v23 = vpop.f32.mrf.mxu3 }
 0x3be   :  { %v6722_v25 = vadd.f32 %v2931_v2, %v2867_v16 }
 0x3bf   :  { %v2739_v57 = vpop.f32.mrf.mxu2  ;;  %v2872_v30 = vpop.f32.mrf.mxu0 }
 0x3c0   :  { %v2740_v35 = vadd.f32 %v2739_v57, %v6627_v52 }
 0x3c2   :  { %v2805_v21 = vadd.f32 %v2804_v23, %v2740_v35  ;;  %v2937_v12 = vpop.f32.mrf.mxu1 }
 0x3c4   :  { %v2870_v15 = vadd.f32 %v2869_v18, %v2805_v21  ;;  %v2807_v1 = vpop.f32.mrf.mxu3 }
 0x3c6   :  { %v6725_v40 = vadd.f32 %v2934_v32, %v2870_v15 }
 0x3c7   :  { %v2742_v3 = vpop.f32.mrf.mxu2  ;;  %v6727_v4 = vpop.f32.mrf.mxu0 }
 0x3c8   :  { %v2743_v55 = vadd.f32 %v2742_v3, %v6638_v56 }
 0x3ca   :  { %v6729_v53 = vpop.f32.mrf.mxu1  ;;  %v2808_v31 = vadd.f32 %v2807_v1, %v2743_v55 }
 0x3cc   :  { %v2810_v61 = vpop.f32.mrf.mxu3  ;;  %v2873_v33 = vadd.f32 %v2872_v30, %v2808_v31 }
 0x3ce   :  { %v2938_v9 = vadd.f32 %v2937_v12, %v2873_v33 }
 0x3cf   :  { %v2745_v19 = vpop.f32.mrf.mxu2  ;;  %v6731_v51 = vpop.f32.mrf.mxu0 }
 0x3d0   :  { %v2746_v35 = vadd.f32 %v2745_v19, %v6649_v11 }
 0x3d2   :  { %v6733_v63 = vpop.f32.mrf.mxu1  ;;  %v2811_v3 = vadd.f32 %v2810_v61, %v2746_v35 }
 0x3d4   :  { %v6735_v10 = vpop.f32.mrf.mxu3 }
 0x3d7   :  { %v2748_v52 = vpop.f32.mrf.mxu2  ;;  %v2881_v47 = vpop.f32.mrf.mxu0 }
 0x3d8   :  { %v2749_v61 = vadd.f32 %v2748_v52, %v6660_v13 }
 0x3da   :  { %v2946_v42 = vpop.f32.mrf.mxu1 }
 0x3dc   :  { %v2816_v36 = vpop.f32.mrf.mxu3 }
 0x3df   :  { %v2751_v41 = vpop.f32.mrf.mxu2  ;;  %v2884_v14 = vpop.f32.mrf.mxu0 }
 0x3e0   :  { %v2752_v7 = vadd.f32 %v2751_v41, %v6671_v58 }
 0x3e2   :  { %v2949_v22 = vpop.f32.mrf.mxu1  ;;  %v2817_v29 = vadd.f32 %v2816_v36, %v2752_v7 }
 0x3e4   :  { %v2819_v49 = vpop.f32.mrf.mxu3  ;;  %v2882_v26 = vadd.f32 %v2881_v47, %v2817_v29 }
 0x3e6   :  { %v2947_v17 = vadd.f32 %v2946_v42, %v2882_v26 }
 0x3e7   :  { %v2754_v45 = vpop.f32.mrf.mxu2  ;;  %v2887_v50 = vpop.f32.mrf.mxu0 }
 0x3e8   :  { %v2755_v46 = vadd.f32 %v2754_v45, %v6682_v44  ;;  %v6746_v28 = vmax.f32 %v2947_v17, 0.0 }
 0x3ea   :  { %v2820_v59 = vadd.f32 %v2819_v49, %v2755_v46  ;;  %v2952_v58 = vpop.f32.mrf.mxu1  ;;  %v2989_v16 = vmul.f32 %v6746_v28, %v6746_v28 }
 0x3ec   :  { %v2885_v43 = vadd.f32 %v2884_v14, %v2820_v59  ;;  %v2822_v37 = vpop.f32.mrf.mxu3  ;;  %v3028_v1 = vsel %vm2994_vm1, %v2989_v16, 0.0  ;;  %v2876_v14 = vadd.f32 %v6727_v4, %v2811_v3  ;;  %v6769_v59 = vmax.f32 %v6719_v0, 0.0  ;;  %v6784_v0 = vld [vmem:[%s7145_s1] sm:$0xff] }
 0x3ed   :  { %v2814_v4 = vadd.f32 %v6735_v10, %v2749_v61  ;;  %v3253_v17 = vmul.f32 %v6784_v0, %v6784_v0 }
 0x3ee   :  { %v2950_v39 = vadd.f32 %v2949_v22, %v2885_v43  ;;  %v2941_v26 = vadd.f32 %v6729_v53, %v2876_v14  ;;  %v2983_v52 = vmul.f32 %v6769_v59, %v6769_v59 }
 0x3ef   :  { %v2757_v20 = vpop.f32.mrf.mxu2  ;;  %v2890_v23 = vpop.f32.mrf.mxu0  ;;  %v2879_v53 = vadd.f32 %v6731_v51, %v2814_v4  ;;  %v3254_v33 = vsel %vm2994_vm1, %v3253_v17, 0.0 }
 0x3f0   :  { %v6740_v8 = vmax.f32 %v2950_v39, 0.0  ;;  %v2758_v44 = vadd.f32 %v2757_v20, %v6693_v34  ;;  %v6752_v34 = vmax.f32 %v2938_v9, 0.0  ;;  %v6789_v31 = vmax.f32 %v2941_v26, 0.0 }
 0x3f1   :  { %v6793_v20 = vmax.f32 %v6710_v5, 0.0  ;;  %v6807_v5 = vmax.f32 %v6722_v25, 0.0  ;;  %v6820_v25 = vmax.f32 %v6713_v62, 0.0 }
 0x3f2   :  { %v2990_v2 = vmul.f32 %v6740_v8, %v6740_v8  ;;  %v2823_v60 = vadd.f32 %v2822_v37, %v2758_v44  ;;  %v2955_v30 = vpop.f32.mrf.mxu1  ;;  %v2987_v51 = vmul.f32 %v6789_v31, %v6789_v31 }
 0x3f4   :  { %v3031_v56 = vsel %vm2994_vm1, %v2990_v2, 0.0  ;;  %v2825_v18 = vpop.f32.mrf.mxu3  ;;  %v2888_v21 = vadd.f32 %v2887_v50, %v2823_v60  ;;  %v3010_v50 = vsel %vm2994_vm1, %v2983_v52, 0.0  ;;  %v2980_v2 = vmul.f32 %v6793_v20, %v6793_v20 }
 0x3f5   :  { %3032 = vadd.xlane.f32.xlu2 %v3031_v56  ;;  %v3022_v44 = vsel %vm2994_vm1, %v2987_v51, 0.0 }
 0x3f6   :  { %v2953_v42 = vadd.f32 %v2952_v58, %v2888_v21  ;;  %v2944_v58 = vadd.f32 %v6733_v63, %v2879_v53  ;;  %v3001_v9 = vsel %vm2994_vm1, %v2980_v2, 0.0 }
 0x3f7   :  { %v2760_v38 = vpop.f32.mrf.mxu2  ;;  %v2893_v49 = vpop.f32.mrf.mxu0 }
 0x3f8   :  { %v2761_v32 = vadd.f32 %v2760_v38, %v6698_v27  ;;  %v2986_v27 = vmul.f32 %v6752_v34, %v6752_v34  ;;  %v6766_v46 = vmax.f32 %v2953_v42, 0.0  ;;  %v6804_v56 = vmax.f32 %v2944_v58, 0.0 }
 0x3f9   :  { %v2984_v38 = vmul.f32 %v6807_v5, %v6807_v5 }
 0x3fa   :  { %v2826_v57 = vadd.f32 %v2825_v18, %v2761_v32  ;;  %v3019_v22 = vsel %vm2994_vm1, %v2986_v27, 0.0  ;;  %v2991_v13 = vmul.f32 %v6766_v46, %v6766_v46  ;;  %v2988_v63 = vmul.f32 %v6804_v56, %v6804_v56 }
 0x3fb   :  { %v3013_v60 = vsel %vm2994_vm1, %v2984_v38, 0.0  ;;  %v6817_v32 = vmax.f32 %v6725_v40, 0.0  ;;  %v6832_v40 = vmax.f32 %v6704_v24, 0.0 }
 0x3fc   :  { %v2891_v15 = vadd.f32 %v2890_v23, %v2826_v57  ;;  %v2828_v11 = vpop.f32.mrf.mxu3  ;;  %v3034_v39 = vsel %vm2994_vm1, %v2991_v13, 0.0  ;;  %v3025_v18 = vsel %vm2994_vm1, %v2988_v63, 0.0  ;;  %v2981_v23 = vmul.f32 %v6820_v25, %v6820_v25 }
 0x3fd   :  { %3029 = vadd.xlane.f32.xlu2 %v3028_v1  ;;  %v2985_v16 = vmul.f32 %v6817_v32, %v6817_v32  ;;  %v2978_v21 = vmul.f32 %v6832_v40, %v6832_v40 }
 0x3fe   :  { %v2956_v12 = vadd.f32 %v2955_v30, %v2891_v15  ;;  %v3004_v35 = vsel %vm2994_vm1, %v2981_v23, 0.0  ;;  %v6829_v30 = vmax.f32 %v6716_v6, 0.0 }
 0x3ff   :  { %v2763_v47 = vpop.f32.mrf.mxu2  ;;  %v3016_v57 = vsel %vm2994_vm1, %v2985_v16, 0.0  ;;  %v2995_v1 = vsel %vm2994_vm1, %v2978_v21, 0.0 }
 0x400   :  { %v2764_v36 = vadd.f32 %v2763_v47, %v6701_v54  ;;  %v6758_v41 = vmax.f32 %v2956_v12, 0.0  ;;  %v2958_v54 = vpop.f32.mrf.mxu1  ;;  %v2982_v62 = vmul.f32 %v6829_v30, %v6829_v30  ;;  %v6841_v12 = vmax.f32 %v6707_v48, 0.0 }
 0x402   :  { %v2829_v19 = vadd.f32 %v2828_v11, %v2764_v36  ;;  %v2992_v7 = vmul.f32 %v6758_v41, %v6758_v41  ;;  %v3007_v15 = vsel %vm2994_vm1, %v2982_v62, 0.0  ;;  %v2979_v24 = vmul.f32 %v6841_v12, %v6841_v12 }
 0x404   :  { %v2894_v45 = vadd.f32 %v2893_v49, %v2829_v19  ;;  %v3037_v29 = vsel %vm2994_vm1, %v2992_v7, 0.0  ;;  %v2998_v6 = vsel %vm2994_vm1, %v2979_v24, 0.0 }
 0x405   :  { %3038 = vadd.xlane.f32.xlu1 %v3037_v29  ;;  %3020 = vadd.xlane.f32.xlu2 %v3019_v22 }
 0x406   :  { %v2959_v55 = vadd.f32 %v2958_v54, %v2894_v45 }
 0x408   :  { %v6773_v43 = vmax.f32 %v2959_v55, 0.0 }
 0x40a   :  { %v2993_v37 = vmul.f32 %v6773_v43, %v6773_v43 }
 0x40c   :  { %v3040_v10 = vsel %vm2994_vm1, %v2993_v37, 0.0 }
 0x40d   :  { %3041 = vadd.xlane.f32.xlu0 %v3040_v10  ;;  %3035 = vadd.xlane.f32.xlu1 %v3034_v39 }
 0x40e   :  { %3011 = vadd.xlane.f32.xlu2 %v3010_v50 }
 0x415   :  { %3255 = vadd.xlane.f32.xlu0 %v3254_v33  ;;  %3023 = vadd.xlane.f32.xlu1 %v3022_v44 }
 0x416   :  { %3002 = vadd.xlane.f32.xlu2 %v3001_v9 }
 0x41d   :  { %3026 = vadd.xlane.f32.xlu0 %v3025_v18  ;;  %3014 = vadd.xlane.f32.xlu1 %v3013_v60 }
 0x425   :  { %3017 = vadd.xlane.f32.xlu0 %v3016_v57  ;;  %3005 = vadd.xlane.f32.xlu1 %v3004_v35 }
 0x42d   :  { %3008 = vadd.xlane.f32.xlu0 %v3007_v15  ;;  %2996 = vadd.xlane.f32.xlu1 %v2995_v1 }
 0x435   :  { %2999 = vadd.xlane.f32.xlu0 %v2998_v6 }
 0x468   :  { %v3033_v3 = vpop.xlane.xlu2 %3032 }
 0x469   :  { %v6846_v47 = vmax.f32 %v3033_v3, 1e-24 }
 0x46b   :  { %3840 = vrsqrt.f32 %v6846_v47  ;;  %vm3185_vm2 = vweird.f32 %v6846_v47 }
 0x470   :  { %v3030_v27 = vpop.xlane.xlu2 %3029 }
 0x471   :  { %v6849_v11 = vmax.f32 %v3030_v27, 1e-24  ;;  %v6851_v48 = vpop.eup %3840 }
 0x472   :  { %v3180_v19 = vmul.f32 %v6851_v48, %v6846_v47  ;;  %vm3186_vm3 = vweird.f32 %v6851_v48 }
 0x473   :  { %vm6919_vm11 = vmor %vm3185_vm2, %vm3186_vm3  ;;  %vm3175_vm3 = vweird.f32 %v6849_v11 }
 0x474   :  { %v3181_v54 = vmul.f32 %v6851_v48, %v3180_v19 }
 0x476   :  { %v3182_v13 = vmul.f32 0.5, %v3181_v54 }
 0x478   :  { %v3039_v42 = vpop.xlane.xlu1 %3038  ;;  %v3021_v29 = vpop.xlane.xlu2 %3020  ;;  %v3183_v33 = vsub.f32 1.5, %v3182_v13 }
 0x479   :  { %v3057_v36 = vmax.f32 %v3039_v42, 1e-24  ;;  %v6864_v26 = vmax.f32 %v3021_v29, 1e-24 }
 0x47a   :  { %v3184_v57 = vmul.f32 %v6851_v48, %v3183_v33 }
 0x47b   :  { %3842 = vrsqrt.f32 %v3057_v36  ;;  %vm3205_vm6 = vweird.f32 %v3057_v36 }
 0x47c   :  { %3844 = vrsqrt.f32 %v6849_v11 }
 0x480   :  { %v3042_v7 = vpop.xlane.xlu0 %3041  ;;  %v3036_v14 = vpop.xlane.xlu1 %3035 }
 0x481   :  { %v6856_v49 = vpop.eup %3842  ;;  %v3058_v22 = vmax.f32 %v3042_v7, 1e-24  ;;  %v6858_v61 = vmax.f32 %v3036_v14, 1e-24  ;;  %v3012_v23 = vpop.xlane.xlu2 %3011 }
 0x482   :  { %v3200_v45 = vmul.f32 %v6856_v49, %v3057_v36  ;;  %v6866_v4 = vpop.eup %3844  ;;  %vm3206_vm4 = vweird.f32 %v6856_v49  ;;  %v6903_v14 = vmax.f32 %v3012_v23, 1e-24 }
 0x483   :  { %3846 = vrsqrt.f32 %v3058_v22  ;;  %v3170_v39 = vmul.f32 %v6866_v4, %v6849_v11  ;;  %vm6894_vm7 = vmor %vm3205_vm6, %vm3206_vm4  ;;  %vm3215_vm8 = vweird.f32 %v3058_v22  ;;  %vm3195_vm12 = vweird.f32 %v6858_v61 }
 0x484   :  { %v3201_v55 = vmul.f32 %v6856_v49, %v3200_v45  ;;  %3848 = vrsqrt.f32 %v6858_v61  ;;  %vm3176_vm14 = vweird.f32 %v6866_v4 }
 0x485   :  { %3850 = vrsqrt.f32 %v6864_v26  ;;  %v3171_v63 = vmul.f32 %v6866_v4, %v3170_v39  ;;  %vm6976_vm4 = vmor %vm3175_vm3, %vm3176_vm14 }
 0x486   :  { %v3202_v52 = vmul.f32 0.5, %v3201_v55 }
 0x487   :  { %v3172_v24 = vmul.f32 0.5, %v3171_v63 }
 0x488   :  { %v3256_v37 = vpop.xlane.xlu0 %3255  ;;  %v3024_v53 = vpop.xlane.xlu1 %3023  ;;  %v3203_v44 = vsub.f32 1.5, %v3202_v52 }
 0x489   :  { %v3847_v10 = vpop.eup %3846  ;;  %v6871_v50 = vmax.f32 %v3256_v37, 1e-24  ;;  %v6875_v51 = vmax.f32 %v3024_v53, 1e-24  ;;  %v3173_v52 = vsub.f32 1.5, %v3172_v24  ;;  %v6926_v37 = vstv %s7144_s0  ;;  %v3003_v24 = vpop.xlane.xlu2 %3002  ;;  %s3919_s0 = smov [#allocation3]  }
 0x48a   :  { %v6873_v17 = vpop.eup %3848  ;;  %v3210_v58 = vmul.f32 %v3847_v10, %v3058_v22  ;;  %v3204_v35 = vmul.f32 %v6856_v49, %v3203_v44  ;;  %vm3216_vm5 = vweird.f32 %v3847_v10  ;;  %s3362_s12 = sshll.u32 %s3919_s0, 4  ;;  %s3363_s12 = int_to_ptr.vmem [resolvable:$true] %s3362_s12 }
 0x48b   :  { %v3190_v2 = vmul.f32 %v6873_v17, %v6858_v61  ;;  %3852 = vrsqrt.f32 %v6871_v50  ;;  %v6883_v60 = vpop.eup %3850  ;;  %vm3217_vm9 = vmor %vm3215_vm8, %vm3216_vm5  ;;  %vm3196_vm10 = vweird.f32 %v6873_v17  ;;  %v3174_v63 = vmul.f32 %v6866_v4, %v3173_v52 }
 0x48c   :  { %v3211_v9 = vmul.f32 %v3847_v10, %v3210_v58  ;;  %3854 = vrsqrt.f32 %v6875_v51  ;;  %v3140_v42 = vmul.f32 %v6883_v60, %v6864_v26  ;;  %v3208_v29 = vsel %vm6894_vm7, %v6856_v49, %v3204_v35  ;;  %vm6940_vm13 = vmor %vm3195_vm12, %vm3196_vm10 }
 0x48d   :  { %v3191_v38 = vmul.f32 %v6873_v17, %v3190_v2  ;;  %v3233_v58 = vmul.f32 %v3208_v29, %v6758_v41  ;;  %vm3264_vm0 = vweird.f32 %v6871_v50  ;;  %vm3155_vm10 = vweird.f32 %v6875_v51 }
 0x48e   :  { %v3212_v18 = vmul.f32 0.5, %v3211_v9  ;;  %v3141_v47 = vmul.f32 %v6883_v60, %v3140_v42  ;;  %vm3145_vm12 = vweird.f32 %v6864_v26 }
 0x48f   :  { %v3192_v16 = vmul.f32 0.5, %v3191_v38  ;;  %v3250_v35 = vmul.f32 %v6926_v37, %v3233_v58 }
 0x490   :  { %v3213_v62 = vsub.f32 1.5, %v3212_v18  ;;  %v3027_v21 = vpop.xlane.xlu0 %3026  ;;  %v3015_v15 = vpop.xlane.xlu1 %3014  ;;  %v3142_v18 = vmul.f32 0.5, %v3141_v47 }
 0x491   :  { %v6890_v1 = vpop.eup %3852  ;;  %v3193_v6 = vsub.f32 1.5, %v3192_v16  ;;  %v6892_v3 = vmax.f32 %v3027_v21, 1e-24  ;;  %v6906_v36 = vmax.f32 %v3015_v15, 1e-24 }
 0x492   :  { %v3214_v19 = vmul.f32 %v3847_v10, %v3213_v62  ;;  %v3259_v7 = vmul.f32 %v6890_v1, %v6871_v50  ;;  %v6908_v45 = vpop.eup %3854  ;;  %vm3265_vm15 = vweird.f32 %v6890_v1 }
 0x493   :  { %3856 = vrsqrt.f32 %v6892_v3  ;;  %v3194_v22 = vmul.f32 %v6873_v17, %v3193_v6  ;;  %v3150_v53 = vmul.f32 %v6908_v45, %v6875_v51  ;;  %vm3266_vm2 = vmor %vm3264_vm0, %vm3265_vm15  ;;  %vm3165_vm6 = vweird.f32 %v6892_v3 }
 0x494   :  { %v3218_v54 = vsel %vm3217_vm9, %v3847_v10, %v3214_v19  ;;  %v3260_v55 = vmul.f32 %v6890_v1, %v3259_v7  ;;  %v3188_v10 = vsel %vm6919_vm11, %v6851_v48, %v3184_v57  ;;  %3858 = vrsqrt.f32 %v6906_v36 }
 0x495   :  { %v3234_v49 = vmul.f32 %v3218_v54, %v6773_v43  ;;  %v3151_v33 = vmul.f32 %v6908_v45, %v3150_v53  ;;  %v3198_v48 = vsel %vm6940_vm13, %v6873_v17, %v3194_v22  ;;  %3860 = vrsqrt.f32 %v6903_v14 }
 0x496   :  { %v3261_v39 = vmul.f32 0.5, %v3260_v55  ;;  %v3231_v9 = vmul.f32 %v3188_v10, %v6740_v8  ;;  %v3232_v23 = vmul.f32 %v3198_v48, %v6766_v46  ;;  %v3143_v19 = vsub.f32 1.5, %v3142_v18 }
 0x497   :  { %v3251_v2 = vmul.f32 %v6926_v37, %v3234_v49  ;;  %v3152_v57 = vmul.f32 0.5, %v3151_v33  ;;  %vm3156_vm7 = vweird.f32 %v6908_v45  ;;  %vm3146_vm9 = vweird.f32 %v6883_v60 }
 0x498   :  { %v3262_v41 = vsub.f32 1.5, %v3261_v39  ;;  %v3018_v61 = vpop.xlane.xlu0 %3017  ;;  %v3006_v8 = vpop.xlane.xlu1 %3005  ;;  %v3248_v11 = vmul.f32 %v6926_v37, %v3231_v9  ;;  %v3249_v29 = vmul.f32 %v6926_v37, %v3232_v23  ;;  %vm7024_vm11 = vmor %vm3155_vm10, %vm3156_vm7 }
 0x499   :  { %v6951_v44 = vpop.eup %3856  ;;  %v6956_v38 = vmax.f32 %v3018_v61, 1e-24  ;;  %3789 = vmatpush.xpose.msk.msrb.mxu2 %vm2994_vm1, %v3251_v2  ;;  %v6980_v27 = vmax.f32 %v3006_v8, 1e-24  ;;  %v3153_v7 = vsub.f32 1.5, %v3152_v57  ;;  %vm7041_vm13 = vmor %vm3145_vm12, %vm3146_vm9 }
 0x49a   :  { %v3160_v17 = vmul.f32 %v6951_v44, %v6892_v3  ;;  %v3263_v16 = vmul.f32 %v6890_v1, %v3262_v41  ;;  %v6967_v21 = vpop.eup %3858  ;;  %vm3166_vm5 = vweird.f32 %v6951_v44 }
 0x49b   :  { %3862 = vrsqrt.f32 %v6956_v38  ;;  %v6972_v15 = vpop.eup %3860  ;;  %v3120_v22 = vmul.f32 %v6967_v21, %v6906_v36  ;;  %v3154_v58 = vmul.f32 %v6908_v45, %v3153_v7  ;;  %vm3167_vm8 = vmor %vm3165_vm6, %vm3166_vm5  ;;  %vm3135_vm15 = vweird.f32 %v6956_v38 }
 0x49c   :  { %v3161_v62 = vmul.f32 %v6951_v44, %v3160_v17  ;;  %v3267_v50 = vsel %vm3266_vm2, %v6890_v1, %v3263_v16  ;;  %v3178_v1 = vsel %vm6976_vm4, %v6866_v4, %v3174_v63  ;;  %v3110_v52 = vmul.f32 %v6972_v15, %v6903_v14 }
 0x49d   :  { %3790 = vmatpush.xpose.msk.msrb.mxu2 %vm2994_vm1, %v3250_v35  ;;  %v6983_v42 = vmul.f32 %v3267_v50, %v6784_v0  ;;  %v6999_v4 = vmax.f32 %v3003_v24, 1e-24  ;;  %3864 = vrsqrt.f32 %v6980_v27  ;;  %v3230_v39 = vmul.f32 %v3178_v1, %v6746_v28 }
 0x49e   :  { %v3162_v6 = vmul.f32 0.5, %v3161_v62  ;;  %v3121_v2 = vmul.f32 %v6967_v21, %v3120_v22  ;;  %v3144_v28 = vmul.f32 %v6883_v60, %v3143_v19  ;;  %v3111_v33 = vmul.f32 %v6972_v15, %v3110_v52 }
 0x49f   :  { %v3269_v0 = vmul.f32 %v6983_v42, %v6983_v42  ;;  %v3158_v61 = vsel %vm7024_vm11, %v6908_v45, %v3154_v58  ;;  %v3247_v51 = vmul.f32 %v6926_v37, %v3230_v39  ;;  %vm3126_vm2 = vweird.f32 %v6967_v21 }
 0x4a0   :  { %v3163_v54 = vsub.f32 1.5, %v3162_v6  ;;  %v3009_v55 = vpop.xlane.xlu0 %3008  ;;  %v3122_v63 = vmul.f32 0.5, %v3121_v2  ;;  %v2997_v17 = vpop.xlane.xlu1 %2996  ;;  %v3112_v26 = vmul.f32 0.5, %v3111_v33  ;;  %v3228_v8 = vmul.f32 %v3158_v61, %v6789_v31 }
 0x4a1   :  { %v6995_v13 = vpop.eup %3862  ;;  %v7002_v49 = vmax.f32 %v3009_v55, 1e-24  ;;  %3791 = vmatpush.xpose.msk.msrb.mxu2 %vm2994_vm1, %v3249_v29  ;;  %v3270_v47 = vsel %vm2994_vm1, %v3269_v0, 0.0  ;;  %v7056_v50 = vmax.f32 %v2997_v17, 1e-24  ;;  %vm3116_vm3 = vweird.f32 %v6972_v15 }
 0x4a2   :  { %v3164_v53 = vmul.f32 %v6951_v44, %v3163_v54  ;;  %v3130_v10 = vmul.f32 %v6995_v13, %v6956_v38  ;;  %3271 = vadd.xlane.f32.xlu2 %v3270_v47  ;;  %v3123_v6 = vsub.f32 1.5, %v3122_v63  ;;  %vm3136_vm14 = vweird.f32 %v6995_v13 }
 0x4a3   :  { %3866 = vrsqrt.f32 %v7002_v49  ;;  %v7034_v9 = vpop.eup %3864  ;;  %v3113_v1 = vsub.f32 1.5, %v3112_v26  ;;  %vm7070_vm0 = vmor %vm3135_vm15, %vm3136_vm14  ;;  %v3245_v54 = vmul.f32 %v6926_v37, %v3228_v8  ;;  %vm3125_vm4 = vweird.f32 %v6906_v36 }
 0x4a4   :  { %v3168_v3 = vsel %vm3167_vm8, %v6951_v44, %v3164_v53  ;;  %v3131_v43 = vmul.f32 %v6995_v13, %v3130_v10  ;;  %3868 = vrsqrt.f32 %v6999_v4  ;;  %v3090_v62 = vmul.f32 %v7034_v9, %v6980_v27  ;;  %vm3127_vm5 = vmor %vm3125_vm4, %vm3126_vm2 }
 0x4a5   :  { %3792 = vmatpush.xpose.msk.msrb.mxu2 %vm2994_vm1, %v3248_v11  ;;  %v3229_v44 = vmul.f32 %v3168_v3, %v6804_v56  ;;  %v3148_v56 = vsel %vm7041_vm13, %v6883_v60, %v3144_v28  ;;  %v3124_v22 = vmul.f32 %v6967_v21, %v3123_v6  ;;  %v3114_v0 = vmul.f32 %v6972_v15, %v3113_v1 }
 0x4a6   :  { %v3132_v41 = vmul.f32 0.5, %v3131_v43  ;;  %v3227_v11 = vmul.f32 %v3148_v56, %v6752_v34  ;;  %v3091_v29 = vmul.f32 %v7034_v9, %v3090_v62  ;;  %vm3115_vm6 = vweird.f32 %v6903_v14 }
 0x4a7   :  { %v3246_v46 = vmul.f32 %v6926_v37, %v3229_v44  ;;  %vm3117_vm7 = vmor %vm3115_vm6, %vm3116_vm3  ;;  %vm3105_vm9 = vweird.f32 %v7002_v49  ;;  %vm3096_vm10 = vweird.f32 %v7034_v9  ;;  %vm3095_vm12 = vweird.f32 %v6980_v27 }
 0x4a8   :  { %v3133_v18 = vsub.f32 1.5, %v3132_v41  ;;  %v3000_v16 = vpop.xlane.xlu0 %2999  ;;  %v3092_v10 = vmul.f32 0.5, %v3091_v29  ;;  %v3244_v47 = vmul.f32 %v6926_v37, %v3227_v11  ;;  %v3118_v36 = vsel %vm3117_vm7, %v6972_v15, %v3114_v0  ;;  %vm3097_vm14 = vmor %vm3095_vm12, %vm3096_vm10 }
 0x4a9   :  { %v7037_v23 = vpop.eup %3866  ;;  %v7045_v45 = vmax.f32 %v3000_v16, 1e-24  ;;  %3793 = vmatpush.xpose.msk.msrb.mxu2 %vm2994_vm1, %v3247_v51  ;;  %v3224_v15 = vmul.f32 %v3118_v36, %v6769_v59  ;;  %vm3085_vm15 = vweird.f32 %v6999_v4  ;;  %vm3065_vm6 = vweird.f32 %v7056_v50 }
 0x4aa   :  { %v3100_v35 = vmul.f32 %v7037_v23, %v7002_v49  ;;  %v7060_v24 = vpop.eup %3868  ;;  %v3134_v60 = vmul.f32 %v6995_v13, %v3133_v18  ;;  %v3093_v43 = vsub.f32 1.5, %v3092_v10  ;;  %vm3106_vm8 = vweird.f32 %v7037_v23 }
 0x4ab   :  { %3870 = vrsqrt.f32 %v7045_v45  ;;  %v3080_v19 = vmul.f32 %v7060_v24, %v6999_v4  ;;  %vm3107_vm11 = vmor %vm3105_vm9, %vm3106_vm8  ;;  %vm3086_vm13 = vweird.f32 %v7060_v24  ;;  %v3241_v49 = vmul.f32 %v6926_v37, %v3224_v15 }
 0x4ac   :  { %v3101_v31 = vmul.f32 %v7037_v23, %v3100_v35  ;;  %3872 = vrsqrt.f32 %v7056_v50  ;;  %v3138_v34 = vsel %vm7070_vm0, %v6995_v13, %v3134_v60  ;;  %v3128_v13 = vsel %vm3127_vm5, %v6967_v21, %v3124_v22  ;;  %vm3087_vm0 = vmor %vm3085_vm15, %vm3086_vm13 }
 0x4ad   :  { %3794 = vmatpush.xpose.msk.msrb.mxu2 %vm2994_vm1, %v3246_v46  ;;  %v3081_v52 = vmul.f32 %v7060_v24, %v3080_v19  ;;  %v3226_v53 = vmul.f32 %v3138_v34, %v6817_v32  ;;  %v3225_v32 = vmul.f32 %v3128_v13, %v6807_v5  ;;  %v3094_v41 = vmul.f32 %v7034_v9, %v3093_v43 }
 0x4ae   :  { %v3102_v38 = vmul.f32 0.5, %v3101_v31  ;;  %vm3075_vm3 = vweird.f32 %v7045_v45 }
 0x4af   :  { %v3082_v2 = vmul.f32 0.5, %v3081_v52  ;;  %v3243_v28 = vmul.f32 %v6926_v37, %v3226_v53  ;;  %v3242_v5 = vmul.f32 %v6926_v37, %v3225_v32  ;;  %v3098_v18 = vsel %vm3097_vm14, %v7034_v9, %v3094_v41 }
 0x4b0   :  { %v3103_v39 = vsub.f32 1.5, %v3102_v38  ;;  %v3222_v27 = vmul.f32 %v3098_v18, %v6820_v25 }
 0x4b1   :  { %v7082_v55 = vpop.eup %3870  ;;  %3795 = vmatpush.xpose.msk.msrb.mxu2 %vm2994_vm1, %v3245_v54  ;;  %v3083_v48 = vsub.f32 1.5, %v3082_v2 }
 0x4b2   :  { %v3070_v58 = vmul.f32 %v7082_v55, %v7045_v45  ;;  %v3873_v3 = vpop.eup %3872  ;;  %v3104_v14 = vmul.f32 %v7037_v23, %v3103_v39  ;;  %vm3076_vm2 = vweird.f32 %v7082_v55  ;;  %v3239_v4 = vmul.f32 %v6926_v37, %v3222_v27 }
 0x4b3   :  { %v3060_v21 = vmul.f32 %v3873_v3, %v7056_v50  ;;  %v3084_v63 = vmul.f32 %v7060_v24, %v3083_v48  ;;  %vm3077_vm4 = vmor %vm3075_vm3, %vm3076_vm2  ;;  %vm3066_vm5 = vweird.f32 %v3873_v3 }
 0x4b4   :  { %v3071_v33 = vmul.f32 %v7082_v55, %v3070_v58  ;;  %v3108_v61 = vsel %vm3107_vm11, %v7037_v23, %v3104_v14  ;;  %vm3067_vm7 = vmor %vm3065_vm6, %vm3066_vm5 }
 0x4b5   :  { %3796 = vmatpush.xpose.msk.msrb.mxu2 %vm2994_vm1, %v3244_v47  ;;  %v3061_v44 = vmul.f32 %v3873_v3, %v3060_v21  ;;  %v3223_v59 = vmul.f32 %v3108_v61, %v6829_v30  ;;  %v3088_v57 = vsel %vm3087_vm0, %v7060_v24, %v3084_v63 }
 0x4b6   :  { %v3072_v51 = vmul.f32 0.5, %v3071_v33  ;;  %v3221_v9 = vmul.f32 %v3088_v57, %v6793_v20 }
 0x4b7   :  { %v3062_v17 = vmul.f32 0.5, %v3061_v44  ;;  %v3240_v23 = vmul.f32 %v6926_v37, %v3223_v59 }
 0x4b8   :  { %v3073_v16 = vsub.f32 1.5, %v3072_v51  ;;  %v3238_v35 = vmul.f32 %v6926_v37, %v3221_v9 }
 0x4b9   :  { %3797 = vmatpush.xpose.msk.msrb.mxu2 %vm2994_vm1, %v3243_v28  ;;  %v3063_v30 = vsub.f32 1.5, %v3062_v17 }
 0x4ba   :  { %v3074_v56 = vmul.f32 %v7082_v55, %v3073_v16 }
 0x4bb   :  { %v3064_v26 = vmul.f32 %v3873_v3, %v3063_v30 }
 0x4bc   :  { %v3078_v25 = vsel %vm3077_vm4, %v7082_v55, %v3074_v56 }
 0x4bd   :  { %3798 = vmatpush.xpose.msk.msrb.mxu2 %vm2994_vm1, %v3242_v5  ;;  %v3220_v8 = vmul.f32 %v3078_v25, %v6841_v12  ;;  %v3068_v62 = vsel %vm3067_vm7, %v3873_v3, %v3064_v26 }
 0x4be   :  { %v3219_v20 = vmul.f32 %v3068_v62, %v6832_v40 }
 0x4bf   :  { %v3237_v45 = vmul.f32 %v6926_v37, %v3220_v8 }
 0x4c0   :  { %v3236_v46 = vmul.f32 %v6926_v37, %v3219_v20 }
 0x4c1   :  { %3799 = vmatpush.xpose.msk.msrb.mxu2 %vm2994_vm1, %v3241_v49 }
 0x4c5   :  { %3800 = vmatpush.xpose.msk.msrb.mxu2 %vm2994_vm1, %v3240_v23 }
 0x4c9   :  { %3801 = vmatpush.xpose.msk.msrb.mxu2 %vm2994_vm1, %v3239_v4 }
 0x4cd   :  { %3802 = vmatpush.xpose.msk.msrb.mxu2 %vm2994_vm1, %v3238_v35 }
 0x4d1   :  { %3803 = vmatpush.xpose.msk.msrb.mxu2 %vm2994_vm1, %v3237_v45 }
 0x4d5   :  { %3804 = vmatpush.xpose.msk.msrb.mxu2 %vm2994_vm1, %v3236_v46 }
 0x515   :  { %v3272_v24 = vpop.xlane.xlu2 %3271 }
 0x516   :  { %v3273_v50 = vmax.f32 %v3272_v24, 1e-24 }
 0x518   :  { %3874 = vrsqrt.f32 %v3273_v50  ;;  %vm3280_vm9 = vweird.f32 %v3273_v50 }
 0x51e   :  { %v3875_v6 = vpop.eup %3874 }
 0x51f   :  { %v3275_v12 = vmul.f32 %v3875_v6, %v3273_v50  ;;  %vm3281_vm8 = vweird.f32 %v3875_v6 }
 0x520   :  { %vm3282_vm10 = vmor %vm3280_vm9, %vm3281_vm8 }
 0x521   :  { %v3276_v60 = vmul.f32 %v3875_v6, %v3275_v12 }
 0x523   :  { %v3277_v31 = vmul.f32 0.5, %v3276_v60 }
 0x525   :  { %v3278_v11 = vsub.f32 1.5, %v3277_v31 }
 0x527   :  { %v3279_v1 = vmul.f32 %v3875_v6, %v3278_v11 }
 0x529   :  { %v3283_v40 = vsel %vm3282_vm10, %v3875_v6, %v3279_v1 }
 0x52a   :  { %v3284_v19 = vmul.f32 %v3283_v40, %v6983_v42 }
 0x52c   :  { %3805 = vmatmul.msk.f32.vlgmr.msrb.gmra.mxu2 %vm2994_vm1, %v3284_v19 }
 0x5af   :  { %v3353_v37 = vpop.f32.mrf.mxu2 }
 0x5b0   :  { %3356 = vst [vmem:[#allocation3] sm:$0xff] %v3353_v37 }
 0x5b1   :  { %3367 = dma.vmem_to_hbm [thread:$0]  %s3363_s12, 128, %s3365_s14, [#allocation4]  }
 0x5b2   :  { %3917 = dma.done.wait [#allocation4], 128  }
 0x5b3   :  { %3918 = vsyncadd [#allocation4], 4294967168 }
 0x5b4   :  { %3372 = vsyncpa [#allocation4], 1 }

</bundles_post_ra>
